<compile_context>
chip_gen: v5e
topology: v5e:2x2
jax: 0.10.0
libtpu: 0.0.40
codegen_flags: <defaults>
</compile_context>

<pallas_src>
import functools

import numpy as np

import jax
import jax.numpy as jnp
from jax.experimental import pallas as pl
from jax.experimental.pallas import tpu as pltpu


def _patch_encoder_kernel(img_ref, a_ref, bias_ref, out_ref):
    """One (batch-block, column-block) tile of:  out = img @ A + bias.

    img_ref:  (bb, CHW)  float32  raw image rows (cast to A's dtype in-register)
    a_ref:    (CHW, bn)  bf16     fused unfold+projection matrix (column block)
    bias_ref: (1, bn)    float32  cls/pos-embedding bias (column block)
    out_ref:  (bb, bn)   float32
    """
    x = img_ref[...].astype(a_ref.dtype)
    acc = jnp.dot(x, a_ref[...], preferred_element_type=jnp.float32)
    out_ref[...] = (acc + bias_ref[...]).astype(out_ref.dtype)


def prepare_patch_encoder_params(weight, cls_token, pos_embedding, *, img_size, n_channels,
                                 patch_size=8, overlap=2, compute_dtype=jnp.bfloat16):
    """__init__-time prep: fold torch's unfold/unfold/contiguous/view gather pattern,
    the nn.Linear weight, the cls token and the positional embedding into (A, bias).

    Returns (a_mat (C*H*W, seq*proj) compute_dtype, bias (1, seq*proj) f32, seq, proj)."""
    win = patch_size + 2 * overlap
    stride = (img_size - patch_size - 2 * overlap) // patch_size + 1
    assert stride >= 1, "invalid derived stride"
    # Fail loudly if the unfold grid would not tile exactly like the torch module assumes.
    assert (img_size - win) % stride == 0, (
        "img_size/patch_size/overlap combination does not produce an exact unfold grid")
    n_side = (img_size - (win - 1) - 1) // stride + 1
    n_token = n_side * n_side
    token_size = n_channels * win * win
    proj = weight.shape[0]
    assert weight.shape == (proj, token_size), "weight must be (proj_output_size, token_size)"
    seq = n_token + 1
    chw = n_channels * img_size * img_size

    # Static (numpy) map from flat unfolded index f (order c, i, j, p, q — exactly the
    # memory order of torch .unfold(2,w,s).unfold(3,w,s).contiguous()) to:
    #   pix = source pixel, (t, k) = (token, within-token column) after .view(B, nT, Tsz).
    f = np.arange(n_token * token_size)
    cell, r = np.divmod(f, win * win)            # cell = (c*n_side + i)*n_side + j
    p_off, q_off = np.divmod(r, win)
    c, ij = np.divmod(cell, n_side * n_side)
    i, j = np.divmod(ij, n_side)
    y = i * stride + p_off
    x = j * stride + q_off
    pix = (c * img_size + y) * img_size + x      # flat pixel index in (C, H, W)
    t, k = np.divmod(f, token_size)

    # A0[pix, t, :] = sum over all k hitting that pixel of W[:, k]
    # (overlapping windows reuse pixels; scatter-add accumulates duplicates correctly).
    wt = jnp.asarray(weight, jnp.float32).T                      # (token_size, proj)
    a0 = jnp.zeros((chw, n_token, proj), jnp.float32)
    a0 = a0.at[pix, t].add(wt[k])
    # Output column layout per batch row: [cls(proj) | token0(proj) | ... | tokenN(proj)].
    # The cls slot receives no image contribution.
    a_full = jnp.concatenate([jnp.zeros((chw, 1, proj), jnp.float32), a0], axis=1)
    a_full = a_full.reshape(chw, seq * proj).astype(compute_dtype)

    bias = jnp.asarray(pos_embedding, jnp.float32)               # (seq, proj)
    bias = bias.at[0].add(jnp.asarray(cls_token, jnp.float32).reshape(proj))
    bias = bias.reshape(1, seq * proj)
    return a_full, bias, seq, proj


def patch_encoder_forward(imgs, a_mat, bias, *, seq, proj_size, block_n=512, block_b=128):
    """imgs: (B, C, H, W) f32.  a_mat/bias: from prepare_patch_encoder_params.
    Returns (B, seq, proj) f32 — same forward semantics as the PyTorch module
    (dropout p=0.0 is the identity)."""
    assert imgs.ndim == 4, "Expected input image tensor to be of shape BxCxHxW"
    assert imgs.shape[2] == imgs.shape[3], "The provided images are not square shaped"
    assert block_n % 128 == 0 and block_b % 8 == 0
    B, C, H, W = imgs.shape
    chw = C * H * W
    n_cols = seq * proj_size
    assert a_mat.shape == (chw, n_cols), "a_mat does not match the image geometry"

    img2d = imgs.reshape(B, chw)                 # contiguous reshape: free

    bn = block_n if n_cols > block_n else n_cols
    bb = B if B <= block_b else block_b
    grid = (pl.cdiv(B, bb), pl.cdiv(n_cols, bn))

    out2d = pl.pallas_call(
        _patch_encoder_kernel,
        out_shape=jax.ShapeDtypeStruct((B, n_cols), jnp.float32),
        grid_spec=pltpu.PrefetchScalarGridSpec(
            num_scalar_prefetch=0,
            grid=grid,
            in_specs=[
                pl.BlockSpec((bb, chw), lambda b, n: (b, 0)),
                pl.BlockSpec((chw, bn), lambda b, n: (0, n)),
                pl.BlockSpec((1, bn), lambda b, n: (0, n)),
            ],
            out_specs=pl.BlockSpec((bb, bn), lambda b, n: (b, n)),
        ),
        compiler_params=pltpu.CompilerParams(
            dimension_semantics=("parallel", "parallel")),
    )(img2d, a_mat, bias)

    # Dropout(p=0.0) is the identity.  Contiguous reshape back to (B, seq, proj): free.
    return out2d.reshape(B, seq, proj_size)


if __name__ == "__main__":
    # Shapes consistent with the module: img_size=16, n_channels=4, patch_size=8,
    # overlap=2  ->  window=12, stride=1, n_token=25, token_size=576, proj=32.
    B, C, H = 2, 4, 16
    patch_size, overlap = 8, 2
    win = patch_size + 2 * overlap
    stride = (H - patch_size - 2 * overlap) // patch_size + 1
    n_side = (H - (win - 1) - 1) // stride + 1
    n_token = n_side * n_side
    token_size = C * win * win
    proj_size = 32  # projection_ouput_size

    key = jax.random.PRNGKey(0)
    k1, k2, k3, k4 = jax.random.split(key, 4)
    imgs = jax.random.normal(k1, (B, C, H, H), jnp.float32)
    weight = jax.random.normal(k2, (proj_size, token_size), jnp.float32) / jnp.sqrt(
        jnp.float32(token_size))
    cls_token = jax.random.normal(k3, (1, 1, proj_size), jnp.float32)
    pos_embedding = jax.random.normal(k4, (n_token + 1, proj_size), jnp.float32)

    # "__init__"-time parameter prep (outside the jitted hot path).
    a_mat, bias, seq, proj_out = prepare_patch_encoder_params(
        weight, cls_token, pos_embedding, img_size=H, n_channels=C,
        patch_size=patch_size, overlap=overlap)

    fwd = jax.jit(functools.partial(patch_encoder_forward, seq=seq, proj_size=proj_out))
    out = jax.block_until_ready(fwd(imgs, a_mat, bias))
    assert out.shape == (B, seq, proj_size)

    # Reference #1: identical arithmetic path (bf16 operands, f32 accumulation) via XLA.
    ref_same = (jnp.dot(imgs.reshape(B, -1).astype(a_mat.dtype), a_mat,
                        preferred_element_type=jnp.float32) + bias
                ).reshape(B, seq, proj_size)
    assert jnp.allclose(out, ref_same, atol=2e-3, rtol=2e-3)

    # Reference #2: f32 mirror of the PyTorch forward
    # (unfold/unfold/contiguous/view -> Linear -> cat(cls) -> + pos_embedding).
    idx = (jnp.arange(n_side) * stride)[:, None] + jnp.arange(win)[None, :]   # (n_side, win)
    patches = imgs[:, :, idx[:, None, :, None], idx[None, :, None, :]]        # (B,C,nH,nW,w,w)
    tokens = patches.reshape(B, n_token, token_size)
    ref_proj = jnp.einsum("btk,pk->btp", tokens, weight)
    ref = jnp.concatenate(
        [jnp.broadcast_to(cls_token, (B, 1, proj_size)), ref_proj], axis=1) + pos_embedding
    assert jnp.allclose(out, ref, atol=5e-2, rtol=5e-2)

    print("KERNEL_OK")
</pallas_src>

<mosaic_0001>
module attributes {stable_mosaic.version = 11 : i64} {
  func.func @_patch_encoder_kernel(%arg0: i32, %arg1: i32, %arg2: memref<2x1024xf32, #tpu.memory_space<vmem>>, %arg3: memref<1024x512xbf16, #tpu.memory_space<vmem>>, %arg4: memref<1x512xf32, #tpu.memory_space<vmem>>, %arg5: memref<2x512xf32, #tpu.memory_space<vmem>>) attributes {dimension_semantics = [#tpu.dimension_semantics<parallel>, #tpu.dimension_semantics<parallel>], iteration_bounds = array<i64: 1, 2>, scalar_prefetch = 0 : i64, scratch_operands = 0 : i64, tpu.core_type = #tpu.core_type<tc>, window_params = [{transform_indices = @transform_0, window_bounds = array<i64: 2, 1024>}, {transform_indices = @transform_1, window_bounds = array<i64: 1024, 512>}, {transform_indices = @transform_2, window_bounds = array<i64: 1, 512>}, {transform_indices = @transform_3, window_bounds = array<i64: 2, 512>}]} {
    %c0 = arith.constant 0 : index
    %c0_0 = arith.constant 0 : index
    %0 = vector.load %arg2[%c0, %c0_0] : memref<2x1024xf32, #tpu.memory_space<vmem>>, vector<2x1024xf32>
    %1 = arith.truncf %0 : vector<2x1024xf32> to vector<2x1024xbf16>
    %c0_1 = arith.constant 0 : index
    %c0_2 = arith.constant 0 : index
    %2 = vector.load %arg3[%c0_1, %c0_2] : memref<1024x512xbf16, #tpu.memory_space<vmem>>, vector<1024x512xbf16>
    %cst = arith.constant dense<0.000000e+00> : vector<2x512xf32>
    %3 = tpu.matmul %1, %2, %cst {dimension_numbers = #tpu.dot_dimension_numbers<[1], [0], [0], [1], [0, 0, 1, 1], [], []>} : vector<2x1024xbf16>, vector<1024x512xbf16>, vector<2x512xf32> -> vector<2x512xf32>
    %c0_3 = arith.constant 0 : index
    %c0_4 = arith.constant 0 : index
    %4 = vector.load %arg4[%c0_3, %c0_4] : memref<1x512xf32, #tpu.memory_space<vmem>>, vector<1x512xf32>
    %5 = vector.broadcast %4 : vector<1x512xf32> to vector<2x512xf32>
    %6 = arith.addf %3, %5 : vector<2x512xf32>
    %c0_5 = arith.constant 0 : index
    %c0_6 = arith.constant 0 : index
    %7 = vector.load %arg5[%c0_5, %c0_6] : memref<2x512xf32, #tpu.memory_space<vmem>>, vector<2x512xf32>
    tpu.vector_store %arg5[%c0_5, %c0_6], %6 {strides = array<i32>} : memref<2x512xf32, #tpu.memory_space<vmem>>, vector<2x512xf32>,
    return
  }
  func.func @transform_0(%arg0: i32, %arg1: i32) -> (i32, i32) {
    %c0_i32 = arith.constant 0 : i32
    %c0_i32_0 = arith.constant 0 : i32
    return %arg0, %c0_i32 : i32, i32
  }
  func.func @transform_1(%arg0: i32, %arg1: i32) -> (i32, i32) {
    %c0_i32 = arith.constant 0 : i32
    %c0_i32_0 = arith.constant 0 : i32
    return %c0_i32, %arg1 : i32, i32
  }
  func.func @transform_2(%arg0: i32, %arg1: i32) -> (i32, i32) {
    %c0_i32 = arith.constant 0 : i32
    %c0_i32_0 = arith.constant 0 : i32
    return %c0_i32, %arg1 : i32, i32
  }
  func.func @transform_3(%arg0: i32, %arg1: i32) -> (i32, i32) {
    %c0_i32 = arith.constant 0 : i32
    return %arg0, %arg1 : i32, i32
  }
}

</mosaic_0001>

<bundles_post_ra>
// kernel: patch_encoder_forward.1
= control target key start
LH: loop header
LB: loop body
LE: loop exit
PB: predicated region body
PF: predicated region fallthrough
CT: control target
= control target key end

     0   :  { %s5699_s12 = smov 0   ;;  %s5701_s13 = smov 0   ;;  %s8305_s0 = inlined_call_operand.vmem [shape: f32[2,1024], index: 0, kind: input, shape index: {}]   ;;  %s8306_s1 = inlined_call_operand.vmem [shape: bf16[1024,832], index: 1, kind: input, shape index: {}]   ;;  %s8307_s2 = inlined_call_operand.vmem [shape: f32[1,832], index: 2, kind: input, shape index: {}]   ;;  %s8308_s3 = inlined_call_operand.vmem [shape: f32[2,832], index: 3, kind: output, shape index: {}]  }
   0x1   :  { %s5703_s14 = smov 0   ;;  %s5705_s15 = smov 0  }
   0x2   :  { %s5707_s16 = smov 0  }
   0x3 LB: > { %s22_s17 = sadd.s32 1, %s5573_s15  ;;  %s3862_s18 = sadd.s32 4294967295, %s5577_s16   ;;  %s5577_s16 = sphi %s5707_s16, %s13_s16   ;;  %s5573_s15 = sphi %s5705_s15, %s8333_s15   ;;  %s5569_s14 = sphi %s5703_s14, %s8332_s14   ;;  %s5565_s13 = sphi %s5701_s13, %s8331_s13   ;;  %s5561_s12 = sphi %s5699_s12, %s8330_s12  }
   0x4   : > { %p23_p0 = scmp.ge.s32.totalorder %s22_s17, 2  ;;  %p65_p1 = scmp.ne.s32.totalorder %s5565_s13, %s5561_s12 }
   0x5   : > { %p66_p2 = scmp.eq.s32.totalorder %s5577_s16, 0  ;;  %p123_p4 = scmp.eq.s32.totalorder %s3862_s18, 1 }
   0x6   : > { %s8335_s17 = smov (%p23_p0, %s22_s17), 0  ;;  %s58_s20 = sadd.s32 1, %s5565_s13 }
   0x7   : > { %p67_p3 = por %p66_p2, %p65_p1  ;;  %s55_s19 = ssub.s32 %s5573_s15, %s8335_s17 }
   0x8   : > { %p56_p5 = scmp.eq.s32.totalorder %s55_s19, 0  ;;  %p5734_p6 = por %p123_p4, %p65_p1 }
   0x9   : > { %p3866_p7 = scmp.ge.s32.totalorder %s5577_s16, 2 }
   0xa   : > { %s5739_s22 = scalar_select %p56_p5, %s5565_s13, %s58_s20  }
   0xb   : > { %153 = sbr.rel (%p3866_p7) target bundleno = 567 (0x237), region = 20 }
  0x10   : > { %156 = sbr.rel (!%p67_p3) target bundleno = 567 (0x237), region = 24  ;;  %s158_s23 = sand.u32 (%p67_p3), 1, %s5565_s13  }
  0x11   : > { %s3868_s24 = sshll.u32 (%p67_p3), %s5573_s15, 2  ;;  %s3867_s25 = sshll.u32 (%p67_p3), %s158_s23, 11 }
  0x12   : > { %s162_s26 = ssub.s32 (%p67_p3), 7, %s3868_s24  ;;  %s4943_s27 = sshll.u32 (%p67_p3), %s5573_s15, 4 }
  0x13   : > { %p163_p8 = scmp.lt.s32.totalorder (%p67_p3), %s162_s26, 4  ;;  %s5748_s30 = scalar_lea.vmem (%p67_p3), %s8306_s1, %s4943_s27  }
  0x14   : > { %s5752_s6 = scalar_lea.vmem (%p67_p3), [#allocation2], %s3867_s25  }
  0x15   : > { %s8337_s26 = smov (!%p163_p8, %s162_s26), 4 }
  0x16   : > { %s3869_s4 = sshll.u32 %s8337_s26, 9  ;;  %s5750_s5 = sshll.u32 %s8337_s26, 2 }
  0x17   : > { %p3873_p9 = scmp.eq.s32.totalorder %s3869_s4, 0 }
  0x18   : > { %p173_p10 = scmp.lt.u32.totalorder (!%p3873_p9), %s5750_s5, 8 }
  0x19   : > { %172 = sbr.rel (%p3873_p9) target bundleno = 567 (0x237), region = 28 }
  0x1e   : > { %176 = sbr.rel (%p173_p10) target bundleno = 431 (0x1af), region = 32  ;;  %s5756_s7 = sand.u32 (!%p173_p10), 7, %s5750_s5  }
  0x1f   : > { %p447_p11 = scmp.eq.s32.totalorder (!%p173_p10), %s5756_s7, 0  ;;  %p3874_p12 = scmp.ne.s32.totalorder (!%p173_p10), %s5756_s7, 0 }
  0x23   : > { %450 = sbr.rel (%p3874_p12) target bundleno = 169 (0xa9), region = 47  ;;  %s451_s8 = sshrl.u32 (!%p3874_p12), %s5750_s5, 3 }
  0x24   : > { %s8310_s9 = smov (!%p3874_p12), %s5752_s6  ;;  %s8311_s10 = smov (!%p3874_p12), %s5748_s30 }
  0x25   : > { %s5767_s11 = smov (!%p3874_p12), 0   ;;  %s5769_s18 = smov (!%p3874_p12), 0  }
  0x28 LB: >> { %v461_v0 = vld [vmem:[%s5585_s10] sm:$0xff]  ;;  %v465_v2 = vld [vmem:[%s5585_s10 + $0x38] sm:$0xff]  ;;  %s717_s19 = sadd.s32 1, %s5589_s11  ;;  %v469_v4 = vld [vmem:[%s5585_s10 + $0x70] sm:$0xff]  ;;  %s455_s18 = sadd.s32 1, %s5593_s18   ;;  %s5593_s18 = sphi %s5769_s18, %s455_s18   ;;  %s5589_s11 = sphi %s5767_s11, %s8314_s11   ;;  %s5585_s10 = sphi %s8311_s10, %s8313_s10   ;;  %s5581_s9 = sphi %s8310_s9, %s8312_s9  }
  0x29   : >> { %v463_v1 = vld [vmem:[%s5585_s10 + $0x1c] sm:$0xff]  ;;  %462 = vst [vmem:[%s5581_s9] sm:$0xff] %v461_v0  ;;  %v467_v3 = vld [vmem:[%s5585_s10 + $0x54] sm:$0xff]  ;;  %p718_p13 = scmp.ge.s32.totalorder %s717_s19, %s451_s8  ;;  %v471_v5 = vld [vmem:[%s5585_s10 + $0x8c] sm:$0xff]  ;;  %p454_p0 = scmp.ge.s32.totalorder %s455_s18, %s451_s8 }
  0x2a   : >> { %464 = vst [vmem:[%s5581_s9 + $0x10] sm:$0xff] %v463_v1  ;;  %v473_v6 = vld [vmem:[%s5585_s10 + $0xa8] sm:$0xff]  ;;  %v477_v8 = vld [vmem:[%s5585_s10 + $0xe0] sm:$0xff]  ;;  %v481_v10 = vld [vmem:[%s5585_s10 + $0x118] sm:$0xff] }
  0x2b   : >> { %466 = vst [vmem:[%s5581_s9 + $0x20] sm:$0xff] %v465_v2  ;;  %s8339_s19 = smov (%p718_p13, %s717_s19), 0  ;;  %v475_v7 = vld [vmem:[%s5585_s10 + $0xc4] sm:$0xff]  ;;  %v479_v9 = vld [vmem:[%s5585_s10 + $0xfc] sm:$0xff]  ;;  %v483_v11 = vld [vmem:[%s5585_s10 + $0x134] sm:$0xff] }
  0x2c   : >> { %468 = vst [vmem:[%s5581_s9 + $0x30] sm:$0xff] %v467_v3  ;;  %s3876_s20 = sshll.u32 %s8339_s19, 3  ;;  %v485_v12 = vld [vmem:[%s5585_s10 + $0x150] sm:$0xff]  ;;  %v489_v14 = vld [vmem:[%s5585_s10 + $0x188] sm:$0xff]  ;;  %v493_v16 = vld [vmem:[%s5585_s10 + $0x1c0] sm:$0xff]  ;;  %s8314_s11 = smov %s8339_s19 }
  0x2d   : >> { %470 = vst [vmem:[%s5581_s9 + $0x40] sm:$0xff] %v469_v4  ;;  %s5802_s23 = scalar_lea.vmem %s5748_s30, %s3876_s20   ;;  %s5805_s24 = scalar_lea.vmem %s5752_s6, %s3876_s20 [#allocation2]   ;;  %v487_v13 = vld [vmem:[%s5585_s10 + $0x16c] sm:$0xff]  ;;  %v491_v15 = vld [vmem:[%s5585_s10 + $0x1a4] sm:$0xff]  ;;  %v495_v17 = vld [vmem:[%s5585_s10 + $0x1dc] sm:$0xff] }
  0x2e   : >> { %472 = vst [vmem:[%s5581_s9 + $0x50] sm:$0xff] %v471_v5  ;;  %v497_v18 = vld [vmem:[%s5585_s10 + $0x1f8] sm:$0xff]  ;;  %v501_v20 = vld [vmem:[%s5585_s10 + $0x230] sm:$0xff]  ;;  %v505_v22 = vld [vmem:[%s5585_s10 + $0x268] sm:$0xff] }
  0x2f   : >> { %474 = vst [vmem:[%s5581_s9 + $0x60] sm:$0xff] %v473_v6  ;;  %v499_v19 = vld [vmem:[%s5585_s10 + $0x214] sm:$0xff]  ;;  %v503_v21 = vld [vmem:[%s5585_s10 + $0x24c] sm:$0xff]  ;;  %v507_v23 = vld [vmem:[%s5585_s10 + $0x284] sm:$0xff] }
  0x30   : >> { %476 = vst [vmem:[%s5581_s9 + $0x70] sm:$0xff] %v475_v7  ;;  %v509_v24 = vld [vmem:[%s5585_s10 + $0x2a0] sm:$0xff]  ;;  %v513_v26 = vld [vmem:[%s5585_s10 + $0x2d8] sm:$0xff]  ;;  %v517_v28 = vld [vmem:[%s5585_s10 + $0x310] sm:$0xff] }
  0x31   : >> { %478 = vst [vmem:[%s5581_s9 + $0x80] sm:$0xff] %v477_v8  ;;  %v511_v25 = vld [vmem:[%s5585_s10 + $0x2bc] sm:$0xff]  ;;  %v515_v27 = vld [vmem:[%s5585_s10 + $0x2f4] sm:$0xff]  ;;  %v519_v29 = vld [vmem:[%s5585_s10 + $0x32c] sm:$0xff] }
  0x32   : >> { %480 = vst [vmem:[%s5581_s9 + $0x90] sm:$0xff] %v479_v9  ;;  %v521_v30 = vld [vmem:[%s5585_s10 + $0x348] sm:$0xff]  ;;  %v525_v32 = vld [vmem:[%s5585_s10 + $0x380] sm:$0xff]  ;;  %v529_v34 = vld [vmem:[%s5585_s10 + $0x3b8] sm:$0xff] }
  0x33   : >> { %482 = vst [vmem:[%s5581_s9 + $0xa0] sm:$0xff] %v481_v10  ;;  %v523_v31 = vld [vmem:[%s5585_s10 + $0x364] sm:$0xff]  ;;  %v527_v33 = vld [vmem:[%s5585_s10 + $0x39c] sm:$0xff]  ;;  %v531_v35 = vld [vmem:[%s5585_s10 + $0x3d4] sm:$0xff] }
  0x34   : >> { %484 = vst [vmem:[%s5581_s9 + $0xb0] sm:$0xff] %v483_v11  ;;  %v533_v36 = vld [vmem:[%s5585_s10 + $0x3f0] sm:$0xff]  ;;  %v537_v38 = vld [vmem:[%s5585_s10 + $0x428] sm:$0xff]  ;;  %v541_v40 = vld [vmem:[%s5585_s10 + $0x460] sm:$0xff] }
  0x35   : >> { %486 = vst [vmem:[%s5581_s9 + $0xc0] sm:$0xff] %v485_v12  ;;  %v535_v37 = vld [vmem:[%s5585_s10 + $0x40c] sm:$0xff]  ;;  %v539_v39 = vld [vmem:[%s5585_s10 + $0x444] sm:$0xff]  ;;  %v543_v41 = vld [vmem:[%s5585_s10 + $0x47c] sm:$0xff] }
  0x36   : >> { %488 = vst [vmem:[%s5581_s9 + $0xd0] sm:$0xff] %v487_v13  ;;  %v545_v42 = vld [vmem:[%s5585_s10 + $0x498] sm:$0xff]  ;;  %v549_v44 = vld [vmem:[%s5585_s10 + $0x4d0] sm:$0xff]  ;;  %v553_v46 = vld [vmem:[%s5585_s10 + $0x508] sm:$0xff] }
  0x37   : >> { %490 = vst [vmem:[%s5581_s9 + $0xe0] sm:$0xff] %v489_v14  ;;  %v547_v43 = vld [vmem:[%s5585_s10 + $0x4b4] sm:$0xff]  ;;  %v551_v45 = vld [vmem:[%s5585_s10 + $0x4ec] sm:$0xff]  ;;  %v555_v47 = vld [vmem:[%s5585_s10 + $0x524] sm:$0xff] }
  0x38   : >> { %492 = vst [vmem:[%s5581_s9 + $0xf0] sm:$0xff] %v491_v15  ;;  %v557_v48 = vld [vmem:[%s5585_s10 + $0x540] sm:$0xff]  ;;  %v561_v50 = vld [vmem:[%s5585_s10 + $0x578] sm:$0xff]  ;;  %v565_v52 = vld [vmem:[%s5585_s10 + $0x5b0] sm:$0xff] }
  0x39   : >> { %494 = vst [vmem:[%s5581_s9 + $0x100] sm:$0xff] %v493_v16  ;;  %v559_v49 = vld [vmem:[%s5585_s10 + $0x55c] sm:$0xff]  ;;  %v563_v51 = vld [vmem:[%s5585_s10 + $0x594] sm:$0xff]  ;;  %v567_v53 = vld [vmem:[%s5585_s10 + $0x5cc] sm:$0xff] }
  0x3a   : >> { %496 = vst [vmem:[%s5581_s9 + $0x110] sm:$0xff] %v495_v17  ;;  %v569_v54 = vld [vmem:[%s5585_s10 + $0x5e8] sm:$0xff]  ;;  %v573_v56 = vld [vmem:[%s5585_s10 + $0x620] sm:$0xff]  ;;  %v577_v58 = vld [vmem:[%s5585_s10 + $0x658] sm:$0xff] }
  0x3b   : >> { %498 = vst [vmem:[%s5581_s9 + $0x120] sm:$0xff] %v497_v18  ;;  %v571_v55 = vld [vmem:[%s5585_s10 + $0x604] sm:$0xff]  ;;  %v575_v57 = vld [vmem:[%s5585_s10 + $0x63c] sm:$0xff]  ;;  %v579_v59 = vld [vmem:[%s5585_s10 + $0x674] sm:$0xff] }
  0x3c   : >> { %500 = vst [vmem:[%s5581_s9 + $0x130] sm:$0xff] %v499_v19  ;;  %v581_v60 = vld [vmem:[%s5585_s10 + $0x690] sm:$0xff]  ;;  %v585_v62 = vld [vmem:[%s5585_s10 + $0x6c8] sm:$0xff]  ;;  %v589_v0 = vld [vmem:[%s5585_s10 + $0x700] sm:$0xff] }
  0x3d   : >> { %502 = vst [vmem:[%s5581_s9 + $0x140] sm:$0xff] %v501_v20  ;;  %v583_v61 = vld [vmem:[%s5585_s10 + $0x6ac] sm:$0xff]  ;;  %v587_v63 = vld [vmem:[%s5585_s10 + $0x6e4] sm:$0xff]  ;;  %v591_v1 = vld [vmem:[%s5585_s10 + $0x71c] sm:$0xff] }
  0x3e   : >> { %504 = vst [vmem:[%s5581_s9 + $0x150] sm:$0xff] %v503_v21  ;;  %v593_v2 = vld [vmem:[%s5585_s10 + $0x738] sm:$0xff]  ;;  %v597_v4 = vld [vmem:[%s5585_s10 + $0x770] sm:$0xff]  ;;  %v601_v6 = vld [vmem:[%s5585_s10 + $0x7a8] sm:$0xff] }
  0x3f   : >> { %506 = vst [vmem:[%s5581_s9 + $0x160] sm:$0xff] %v505_v22  ;;  %v595_v3 = vld [vmem:[%s5585_s10 + $0x754] sm:$0xff]  ;;  %v599_v5 = vld [vmem:[%s5585_s10 + $0x78c] sm:$0xff]  ;;  %v603_v7 = vld [vmem:[%s5585_s10 + $0x7c4] sm:$0xff] }
  0x40   : >> { %508 = vst [vmem:[%s5581_s9 + $0x170] sm:$0xff] %v507_v23  ;;  %v605_v8 = vld [vmem:[%s5585_s10 + $0x7e0] sm:$0xff]  ;;  %v609_v10 = vld [vmem:[%s5585_s10 + $0x818] sm:$0xff]  ;;  %v613_v12 = vld [vmem:[%s5585_s10 + $0x850] sm:$0xff] }
  0x41   : >> { %510 = vst [vmem:[%s5581_s9 + $0x180] sm:$0xff] %v509_v24  ;;  %v607_v9 = vld [vmem:[%s5585_s10 + $0x7fc] sm:$0xff]  ;;  %v611_v11 = vld [vmem:[%s5585_s10 + $0x834] sm:$0xff]  ;;  %v615_v13 = vld [vmem:[%s5585_s10 + $0x86c] sm:$0xff] }
  0x42   : >> { %512 = vst [vmem:[%s5581_s9 + $0x190] sm:$0xff] %v511_v25  ;;  %v617_v14 = vld [vmem:[%s5585_s10 + $0x888] sm:$0xff]  ;;  %v621_v16 = vld [vmem:[%s5585_s10 + $0x8c0] sm:$0xff]  ;;  %v625_v18 = vld [vmem:[%s5585_s10 + $0x8f8] sm:$0xff] }
  0x43   : >> { %514 = vst [vmem:[%s5581_s9 + $0x1a0] sm:$0xff] %v513_v26  ;;  %v619_v15 = vld [vmem:[%s5585_s10 + $0x8a4] sm:$0xff]  ;;  %v623_v17 = vld [vmem:[%s5585_s10 + $0x8dc] sm:$0xff]  ;;  %v627_v19 = vld [vmem:[%s5585_s10 + $0x914] sm:$0xff] }
  0x44   : >> { %516 = vst [vmem:[%s5581_s9 + $0x1b0] sm:$0xff] %v515_v27  ;;  %v629_v20 = vld [vmem:[%s5585_s10 + $0x930] sm:$0xff]  ;;  %v633_v22 = vld [vmem:[%s5585_s10 + $0x968] sm:$0xff]  ;;  %v637_v24 = vld [vmem:[%s5585_s10 + $0x9a0] sm:$0xff] }
  0x45   : >> { %518 = vst [vmem:[%s5581_s9 + $0x1c0] sm:$0xff] %v517_v28  ;;  %v631_v21 = vld [vmem:[%s5585_s10 + $0x94c] sm:$0xff]  ;;  %v635_v23 = vld [vmem:[%s5585_s10 + $0x984] sm:$0xff]  ;;  %v639_v25 = vld [vmem:[%s5585_s10 + $0x9bc] sm:$0xff] }
  0x46   : >> { %520 = vst [vmem:[%s5581_s9 + $0x1d0] sm:$0xff] %v519_v29  ;;  %v641_v26 = vld [vmem:[%s5585_s10 + $0x9d8] sm:$0xff]  ;;  %v645_v28 = vld [vmem:[%s5585_s10 + $0xa10] sm:$0xff] }
  0x47   : >> { %522 = vst [vmem:[%s5581_s9 + $0x1e0] sm:$0xff] %v521_v30  ;;  %v643_v27 = vld [vmem:[%s5585_s10 + $0x9f4] sm:$0xff]  ;;  %v647_v29 = vld [vmem:[%s5585_s10 + $0xa2c] sm:$0xff] }
  0x48   : >> { %524 = vst [vmem:[%s5581_s9 + $0x1f0] sm:$0xff] %v523_v31  ;;  %v649_v30 = vld [vmem:[%s5585_s10 + $0xa48] sm:$0xff] }
  0x49   : >> { %526 = vst [vmem:[%s5581_s9 + $0x200] sm:$0xff] %v525_v32  ;;  %v651_v31 = vld [vmem:[%s5585_s10 + $0xa64] sm:$0xff] }
  0x4a   : >> { %528 = vst [vmem:[%s5581_s9 + $0x210] sm:$0xff] %v527_v33  ;;  %v653_v32 = vld [vmem:[%s5585_s10 + $0xa80] sm:$0xff] }
  0x4b   : >> { %530 = vst [vmem:[%s5581_s9 + $0x220] sm:$0xff] %v529_v34  ;;  %v655_v33 = vld [vmem:[%s5585_s10 + $0xa9c] sm:$0xff] }
  0x4c   : >> { %532 = vst [vmem:[%s5581_s9 + $0x230] sm:$0xff] %v531_v35  ;;  %v657_v34 = vld [vmem:[%s5585_s10 + $0xab8] sm:$0xff] }
  0x4d   : >> { %534 = vst [vmem:[%s5581_s9 + $0x240] sm:$0xff] %v533_v36  ;;  %v659_v35 = vld [vmem:[%s5585_s10 + $0xad4] sm:$0xff] }
  0x4e   : >> { %536 = vst [vmem:[%s5581_s9 + $0x250] sm:$0xff] %v535_v37  ;;  %v661_v36 = vld [vmem:[%s5585_s10 + $0xaf0] sm:$0xff] }
  0x4f   : >> { %538 = vst [vmem:[%s5581_s9 + $0x260] sm:$0xff] %v537_v38  ;;  %v663_v37 = vld [vmem:[%s5585_s10 + $0xb0c] sm:$0xff] }
  0x50   : >> { %540 = vst [vmem:[%s5581_s9 + $0x270] sm:$0xff] %v539_v39  ;;  %v665_v38 = vld [vmem:[%s5585_s10 + $0xb28] sm:$0xff] }
  0x51   : >> { %542 = vst [vmem:[%s5581_s9 + $0x280] sm:$0xff] %v541_v40  ;;  %v667_v39 = vld [vmem:[%s5585_s10 + $0xb44] sm:$0xff] }
  0x52   : >> { %544 = vst [vmem:[%s5581_s9 + $0x290] sm:$0xff] %v543_v41  ;;  %v669_v40 = vld [vmem:[%s5585_s10 + $0xb60] sm:$0xff] }
  0x53   : >> { %546 = vst [vmem:[%s5581_s9 + $0x2a0] sm:$0xff] %v545_v42  ;;  %v671_v41 = vld [vmem:[%s5585_s10 + $0xb7c] sm:$0xff] }
  0x54   : >> { %548 = vst [vmem:[%s5581_s9 + $0x2b0] sm:$0xff] %v547_v43  ;;  %v673_v42 = vld [vmem:[%s5585_s10 + $0xb98] sm:$0xff] }
  0x55   : >> { %550 = vst [vmem:[%s5581_s9 + $0x2c0] sm:$0xff] %v549_v44  ;;  %v675_v43 = vld [vmem:[%s5585_s10 + $0xbb4] sm:$0xff] }
  0x56   : >> { %552 = vst [vmem:[%s5581_s9 + $0x2d0] sm:$0xff] %v551_v45  ;;  %v677_v44 = vld [vmem:[%s5585_s10 + $0xbd0] sm:$0xff] }
  0x57   : >> { %554 = vst [vmem:[%s5581_s9 + $0x2e0] sm:$0xff] %v553_v46  ;;  %v679_v45 = vld [vmem:[%s5585_s10 + $0xbec] sm:$0xff] }
  0x58   : >> { %556 = vst [vmem:[%s5581_s9 + $0x2f0] sm:$0xff] %v555_v47  ;;  %v681_v46 = vld [vmem:[%s5585_s10 + $0xc08] sm:$0xff] }
  0x59   : >> { %558 = vst [vmem:[%s5581_s9 + $0x300] sm:$0xff] %v557_v48  ;;  %v683_v47 = vld [vmem:[%s5585_s10 + $0xc24] sm:$0xff] }
  0x5a   : >> { %560 = vst [vmem:[%s5581_s9 + $0x310] sm:$0xff] %v559_v49  ;;  %v685_v48 = vld [vmem:[%s5585_s10 + $0xc40] sm:$0xff] }
  0x5b   : >> { %562 = vst [vmem:[%s5581_s9 + $0x320] sm:$0xff] %v561_v50  ;;  %v687_v49 = vld [vmem:[%s5585_s10 + $0xc5c] sm:$0xff] }
  0x5c   : >> { %564 = vst [vmem:[%s5581_s9 + $0x330] sm:$0xff] %v563_v51  ;;  %v689_v50 = vld [vmem:[%s5585_s10 + $0xc78] sm:$0xff] }
  0x5d   : >> { %566 = vst [vmem:[%s5581_s9 + $0x340] sm:$0xff] %v565_v52  ;;  %v691_v51 = vld [vmem:[%s5585_s10 + $0xc94] sm:$0xff] }
  0x5e   : >> { %568 = vst [vmem:[%s5581_s9 + $0x350] sm:$0xff] %v567_v53  ;;  %v693_v52 = vld [vmem:[%s5585_s10 + $0xcb0] sm:$0xff] }
  0x5f   : >> { %570 = vst [vmem:[%s5581_s9 + $0x360] sm:$0xff] %v569_v54  ;;  %v695_v53 = vld [vmem:[%s5585_s10 + $0xccc] sm:$0xff] }
  0x60   : >> { %572 = vst [vmem:[%s5581_s9 + $0x370] sm:$0xff] %v571_v55  ;;  %v697_v54 = vld [vmem:[%s5585_s10 + $0xce8] sm:$0xff] }
  0x61   : >> { %574 = vst [vmem:[%s5581_s9 + $0x380] sm:$0xff] %v573_v56  ;;  %v699_v55 = vld [vmem:[%s5585_s10 + $0xd04] sm:$0xff] }
  0x62   : >> { %576 = vst [vmem:[%s5581_s9 + $0x390] sm:$0xff] %v575_v57  ;;  %v701_v56 = vld [vmem:[%s5585_s10 + $0xd20] sm:$0xff] }
  0x63   : >> { %578 = vst [vmem:[%s5581_s9 + $0x3a0] sm:$0xff] %v577_v58  ;;  %v703_v57 = vld [vmem:[%s5585_s10 + $0xd3c] sm:$0xff] }
  0x64   : >> { %580 = vst [vmem:[%s5581_s9 + $0x3b0] sm:$0xff] %v579_v59  ;;  %v705_v58 = vld [vmem:[%s5585_s10 + $0xd58] sm:$0xff] }
  0x65   : >> { %582 = vst [vmem:[%s5581_s9 + $0x3c0] sm:$0xff] %v581_v60  ;;  %v707_v59 = vld [vmem:[%s5585_s10 + $0xd74] sm:$0xff] }
  0x66   : >> { %584 = vst [vmem:[%s5581_s9 + $0x3d0] sm:$0xff] %v583_v61  ;;  %v709_v60 = vld [vmem:[%s5585_s10 + $0xd90] sm:$0xff] }
  0x67   : >> { %586 = vst [vmem:[%s5581_s9 + $0x3e0] sm:$0xff] %v585_v62  ;;  %v711_v61 = vld [vmem:[%s5585_s10 + $0xdac] sm:$0xff] }
  0x68   : >> { %588 = vst [vmem:[%s5581_s9 + $0x3f0] sm:$0xff] %v587_v63  ;;  %v713_v62 = vld [vmem:[%s5585_s10 + $0xdc8] sm:$0xff] }
  0x69   : >> { %590 = vst [vmem:[%s5581_s9 + $0x400] sm:$0xff] %v589_v0  ;;  %v715_v63 = vld [vmem:[%s5585_s10 + $0xde4] sm:$0xff]  ;;  %s8313_s10 = smov %s5802_s23 }
  0x6a   : >> { %592 = vst [vmem:[%s5581_s9 + $0x410] sm:$0xff] %v591_v1 }
  0x6b   : >> { %594 = vst [vmem:[%s5581_s9 + $0x420] sm:$0xff] %v593_v2 }
  0x6c   : >> { %596 = vst [vmem:[%s5581_s9 + $0x430] sm:$0xff] %v595_v3 }
  0x6d   : >> { %598 = vst [vmem:[%s5581_s9 + $0x440] sm:$0xff] %v597_v4 }
  0x6e   : >> { %600 = vst [vmem:[%s5581_s9 + $0x450] sm:$0xff] %v599_v5 }
  0x6f   : >> { %602 = vst [vmem:[%s5581_s9 + $0x460] sm:$0xff] %v601_v6 }
  0x70   : >> { %604 = vst [vmem:[%s5581_s9 + $0x470] sm:$0xff] %v603_v7 }
  0x71   : >> { %606 = vst [vmem:[%s5581_s9 + $0x480] sm:$0xff] %v605_v8 }
  0x72   : >> { %608 = vst [vmem:[%s5581_s9 + $0x490] sm:$0xff] %v607_v9 }
  0x73   : >> { %610 = vst [vmem:[%s5581_s9 + $0x4a0] sm:$0xff] %v609_v10 }
  0x74   : >> { %612 = vst [vmem:[%s5581_s9 + $0x4b0] sm:$0xff] %v611_v11 }
  0x75   : >> { %614 = vst [vmem:[%s5581_s9 + $0x4c0] sm:$0xff] %v613_v12 }
  0x76   : >> { %616 = vst [vmem:[%s5581_s9 + $0x4d0] sm:$0xff] %v615_v13 }
  0x77   : >> { %618 = vst [vmem:[%s5581_s9 + $0x4e0] sm:$0xff] %v617_v14 }
  0x78   : >> { %620 = vst [vmem:[%s5581_s9 + $0x4f0] sm:$0xff] %v619_v15 }
  0x79   : >> { %622 = vst [vmem:[%s5581_s9 + $0x500] sm:$0xff] %v621_v16 }
  0x7a   : >> { %624 = vst [vmem:[%s5581_s9 + $0x510] sm:$0xff] %v623_v17 }
  0x7b   : >> { %626 = vst [vmem:[%s5581_s9 + $0x520] sm:$0xff] %v625_v18 }
  0x7c   : >> { %628 = vst [vmem:[%s5581_s9 + $0x530] sm:$0xff] %v627_v19 }
  0x7d   : >> { %630 = vst [vmem:[%s5581_s9 + $0x540] sm:$0xff] %v629_v20 }
  0x7e   : >> { %632 = vst [vmem:[%s5581_s9 + $0x550] sm:$0xff] %v631_v21 }
  0x7f   : >> { %634 = vst [vmem:[%s5581_s9 + $0x560] sm:$0xff] %v633_v22 }
  0x80   : >> { %636 = vst [vmem:[%s5581_s9 + $0x570] sm:$0xff] %v635_v23 }
  0x81   : >> { %638 = vst [vmem:[%s5581_s9 + $0x580] sm:$0xff] %v637_v24 }
  0x82   : >> { %640 = vst [vmem:[%s5581_s9 + $0x590] sm:$0xff] %v639_v25 }
  0x83   : >> { %642 = vst [vmem:[%s5581_s9 + $0x5a0] sm:$0xff] %v641_v26 }
  0x84   : >> { %644 = vst [vmem:[%s5581_s9 + $0x5b0] sm:$0xff] %v643_v27 }
  0x85   : >> { %646 = vst [vmem:[%s5581_s9 + $0x5c0] sm:$0xff] %v645_v28 }
  0x86   : >> { %648 = vst [vmem:[%s5581_s9 + $0x5d0] sm:$0xff] %v647_v29 }
  0x87   : >> { %650 = vst [vmem:[%s5581_s9 + $0x5e0] sm:$0xff] %v649_v30 }
  0x88   : >> { %652 = vst [vmem:[%s5581_s9 + $0x5f0] sm:$0xff] %v651_v31 }
  0x89   : >> { %654 = vst [vmem:[%s5581_s9 + $0x600] sm:$0xff] %v653_v32 }
  0x8a   : >> { %656 = vst [vmem:[%s5581_s9 + $0x610] sm:$0xff] %v655_v33 }
  0x8b   : >> { %658 = vst [vmem:[%s5581_s9 + $0x620] sm:$0xff] %v657_v34 }
  0x8c   : >> { %660 = vst [vmem:[%s5581_s9 + $0x630] sm:$0xff] %v659_v35 }
  0x8d   : >> { %662 = vst [vmem:[%s5581_s9 + $0x640] sm:$0xff] %v661_v36 }
  0x8e   : >> { %664 = vst [vmem:[%s5581_s9 + $0x650] sm:$0xff] %v663_v37 }
  0x8f   : >> { %666 = vst [vmem:[%s5581_s9 + $0x660] sm:$0xff] %v665_v38 }
  0x90   : >> { %668 = vst [vmem:[%s5581_s9 + $0x670] sm:$0xff] %v667_v39 }
  0x91   : >> { %670 = vst [vmem:[%s5581_s9 + $0x680] sm:$0xff] %v669_v40 }
  0x92   : >> { %672 = vst [vmem:[%s5581_s9 + $0x690] sm:$0xff] %v671_v41 }
  0x93   : >> { %674 = vst [vmem:[%s5581_s9 + $0x6a0] sm:$0xff] %v673_v42 }
  0x94   : >> { %676 = vst [vmem:[%s5581_s9 + $0x6b0] sm:$0xff] %v675_v43 }
  0x95   : >> { %678 = vst [vmem:[%s5581_s9 + $0x6c0] sm:$0xff] %v677_v44 }
  0x96   : >> { %680 = vst [vmem:[%s5581_s9 + $0x6d0] sm:$0xff] %v679_v45 }
  0x97   : >> { %682 = vst [vmem:[%s5581_s9 + $0x6e0] sm:$0xff] %v681_v46 }
  0x98   : >> { %684 = vst [vmem:[%s5581_s9 + $0x6f0] sm:$0xff] %v683_v47 }
  0x99   : >> { %686 = vst [vmem:[%s5581_s9 + $0x700] sm:$0xff] %v685_v48 }
  0x9a   : >> { %688 = vst [vmem:[%s5581_s9 + $0x710] sm:$0xff] %v687_v49 }
  0x9b   : >> { %690 = vst [vmem:[%s5581_s9 + $0x720] sm:$0xff] %v689_v50 }
  0x9c   : >> { %692 = vst [vmem:[%s5581_s9 + $0x730] sm:$0xff] %v691_v51 }
  0x9d   : >> { %694 = vst [vmem:[%s5581_s9 + $0x740] sm:$0xff] %v693_v52 }
  0x9e   : >> { %696 = vst [vmem:[%s5581_s9 + $0x750] sm:$0xff] %v695_v53 }
  0x9f   : >> { %698 = vst [vmem:[%s5581_s9 + $0x760] sm:$0xff] %v697_v54 }
  0xa0   : >> { %700 = vst [vmem:[%s5581_s9 + $0x770] sm:$0xff] %v699_v55 }
  0xa1   : >> { %702 = vst [vmem:[%s5581_s9 + $0x780] sm:$0xff] %v701_v56 }
  0xa2   : >> { %704 = vst [vmem:[%s5581_s9 + $0x790] sm:$0xff] %v703_v57 }
  0xa3   : >> { %706 = vst [vmem:[%s5581_s9 + $0x7a0] sm:$0xff] %v705_v58 }
  0xa4   : >> { %708 = vst [vmem:[%s5581_s9 + $0x7b0] sm:$0xff] %v707_v59  ;;  %457 = sbr.rel (!%p454_p0) target bundleno = 40 (0x28), region = 220 }
  0xa5   : >> { %710 = vst [vmem:[%s5581_s9 + $0x7c0] sm:$0xff] %v709_v60 }
  0xa6   : >> { %712 = vst [vmem:[%s5581_s9 + $0x7d0] sm:$0xff] %v711_v61 }
  0xa7   : >> { %714 = vst [vmem:[%s5581_s9 + $0x7e0] sm:$0xff] %v713_v62 }
  0xa8   : >> { %716 = vst [vmem:[%s5581_s9 + $0x7f0] sm:$0xff] %v715_v63  ;;  %s8312_s9 = smov %s5805_s24 }
  0xa9 PF: > { %726 = sbr.rel (%p447_p11) target bundleno = 431 (0x1af), region = 58  ;;  %s728_s25 = ssub.s32 (!%p447_p11), %s5750_s5, %s5756_s7 }
  0xaa   : > { %s732_s26 = sshrl.u32 (!%p447_p11), %s5750_s5, 3  ;;  %s6068_s27 = scalar_lea.vmem (!%p447_p11), %s5748_s30, %s728_s25 }
  0xab   : > { %s6071_s28 = scalar_lea.vmem (!%p447_p11), %s5752_s6, %s728_s25 [#allocation2]  ;;  %s8315_s29 = smov (!%p447_p11), %s5752_s6 }
  0xac   : > { %s8316_s4 = smov (!%p447_p11), %s5748_s30  ;;  %s6079_s8 = smov (!%p447_p11), 0  }
  0xad   : > { %s6081_s9 = smov (!%p447_p11), 0  }
  0xae LB: >> { %v742_v0 = vld [vmem:[%s5601_s4] sm:$0xff]  ;;  %v746_v2 = vld [vmem:[%s5601_s4 + $0x38] sm:$0xff]  ;;  %s998_s10 = sadd.s32 1, %s5605_s8  ;;  %v750_v4 = vld [vmem:[%s5601_s4 + $0x70] sm:$0xff]  ;;  %s736_s9 = sadd.s32 1, %s5609_s9   ;;  %s5609_s9 = sphi %s6081_s9, %s736_s9   ;;  %s5605_s8 = sphi %s6079_s8, %s8319_s8   ;;  %s5601_s4 = sphi %s8316_s4, %s8318_s4   ;;  %s5597_s29 = sphi %s8315_s29, %s8317_s29  }
  0xaf   : >> { %v744_v1 = vld [vmem:[%s5601_s4 + $0x1c] sm:$0xff]  ;;  %743 = vst [vmem:[%s5597_s29] sm:$0xff] %v742_v0  ;;  %v748_v3 = vld [vmem:[%s5601_s4 + $0x54] sm:$0xff]  ;;  %p999_p1 = scmp.ge.s32.totalorder %s998_s10, %s732_s26  ;;  %v752_v5 = vld [vmem:[%s5601_s4 + $0x8c] sm:$0xff]  ;;  %p735_p2 = scmp.ge.s32.totalorder %s736_s9, %s732_s26 }
  0xb0   : >> { %745 = vst [vmem:[%s5597_s29 + $0x10] sm:$0xff] %v744_v1  ;;  %v754_v6 = vld [vmem:[%s5601_s4 + $0xa8] sm:$0xff]  ;;  %v758_v8 = vld [vmem:[%s5601_s4 + $0xe0] sm:$0xff]  ;;  %v762_v10 = vld [vmem:[%s5601_s4 + $0x118] sm:$0xff]  ;;  %s5675_s20 = smov (%p735_p2), 1  }
  0xb1   : >> { %747 = vst [vmem:[%s5597_s29 + $0x20] sm:$0xff] %v746_v2  ;;  %s8341_s10 = smov (%p999_p1, %s998_s10), 0  ;;  %v756_v7 = vld [vmem:[%s5601_s4 + $0xc4] sm:$0xff]  ;;  %v760_v9 = vld [vmem:[%s5601_s4 + $0xfc] sm:$0xff]  ;;  %v764_v11 = vld [vmem:[%s5601_s4 + $0x134] sm:$0xff]  ;;  %s1005_s23 = sshll.u32 (%p735_p2), %s5675_s20, %s5756_s7 }
  0xb2   : >> { %749 = vst [vmem:[%s5597_s29 + $0x30] sm:$0xff] %v748_v3  ;;  %s3879_s11 = sshll.u32 %s8341_s10, 3  ;;  %v766_v12 = vld [vmem:[%s5601_s4 + $0x150] sm:$0xff]  ;;  %v770_v14 = vld [vmem:[%s5601_s4 + $0x188] sm:$0xff]  ;;  %v774_v16 = vld [vmem:[%s5601_s4 + $0x1c0] sm:$0xff]  ;;  %s8319_s8 = smov %s8341_s10 }
  0xb3   : >> { %751 = vst [vmem:[%s5597_s29 + $0x40] sm:$0xff] %v750_v4  ;;  %s6114_s18 = scalar_lea.vmem %s5748_s30, %s3879_s11   ;;  %s6117_s19 = scalar_lea.vmem %s5752_s6, %s3879_s11 [#allocation2]   ;;  %v768_v13 = vld [vmem:[%s5601_s4 + $0x16c] sm:$0xff]  ;;  %v772_v15 = vld [vmem:[%s5601_s4 + $0x1a4] sm:$0xff]  ;;  %v776_v17 = vld [vmem:[%s5601_s4 + $0x1dc] sm:$0xff] }
  0xb4   : >> { %753 = vst [vmem:[%s5597_s29 + $0x50] sm:$0xff] %v752_v5  ;;  %v778_v18 = vld [vmem:[%s5601_s4 + $0x1f8] sm:$0xff]  ;;  %v782_v20 = vld [vmem:[%s5601_s4 + $0x230] sm:$0xff]  ;;  %v786_v22 = vld [vmem:[%s5601_s4 + $0x268] sm:$0xff]  ;;  %s6375_s24 = sadd.s32 (%p735_p2), 4294967295, %s1005_s23 }
  0xb5   : >> { %755 = vst [vmem:[%s5597_s29 + $0x60] sm:$0xff] %v754_v6  ;;  %v780_v19 = vld [vmem:[%s5601_s4 + $0x214] sm:$0xff]  ;;  %v784_v21 = vld [vmem:[%s5601_s4 + $0x24c] sm:$0xff]  ;;  %v788_v23 = vld [vmem:[%s5601_s4 + $0x284] sm:$0xff] }
  0xb6   : >> { %757 = vst [vmem:[%s5597_s29 + $0x70] sm:$0xff] %v756_v7  ;;  %v790_v24 = vld [vmem:[%s5601_s4 + $0x2a0] sm:$0xff]  ;;  %v794_v26 = vld [vmem:[%s5601_s4 + $0x2d8] sm:$0xff]  ;;  %v798_v28 = vld [vmem:[%s5601_s4 + $0x310] sm:$0xff] }
  0xb7   : >> { %759 = vst [vmem:[%s5597_s29 + $0x80] sm:$0xff] %v758_v8  ;;  %v792_v25 = vld [vmem:[%s5601_s4 + $0x2bc] sm:$0xff]  ;;  %v796_v27 = vld [vmem:[%s5601_s4 + $0x2f4] sm:$0xff]  ;;  %v800_v29 = vld [vmem:[%s5601_s4 + $0x32c] sm:$0xff] }
  0xb8   : >> { %761 = vst [vmem:[%s5597_s29 + $0x90] sm:$0xff] %v760_v9  ;;  %v802_v30 = vld [vmem:[%s5601_s4 + $0x348] sm:$0xff]  ;;  %v806_v32 = vld [vmem:[%s5601_s4 + $0x380] sm:$0xff]  ;;  %v810_v34 = vld [vmem:[%s5601_s4 + $0x3b8] sm:$0xff] }
  0xb9   : >> { %763 = vst [vmem:[%s5597_s29 + $0xa0] sm:$0xff] %v762_v10  ;;  %v804_v31 = vld [vmem:[%s5601_s4 + $0x364] sm:$0xff]  ;;  %v808_v33 = vld [vmem:[%s5601_s4 + $0x39c] sm:$0xff]  ;;  %v812_v35 = vld [vmem:[%s5601_s4 + $0x3d4] sm:$0xff] }
  0xba   : >> { %765 = vst [vmem:[%s5597_s29 + $0xb0] sm:$0xff] %v764_v11  ;;  %v814_v36 = vld [vmem:[%s5601_s4 + $0x3f0] sm:$0xff]  ;;  %v818_v38 = vld [vmem:[%s5601_s4 + $0x428] sm:$0xff]  ;;  %v822_v40 = vld [vmem:[%s5601_s4 + $0x460] sm:$0xff] }
  0xbb   : >> { %767 = vst [vmem:[%s5597_s29 + $0xc0] sm:$0xff] %v766_v12  ;;  %v816_v37 = vld [vmem:[%s5601_s4 + $0x40c] sm:$0xff]  ;;  %v820_v39 = vld [vmem:[%s5601_s4 + $0x444] sm:$0xff]  ;;  %v824_v41 = vld [vmem:[%s5601_s4 + $0x47c] sm:$0xff] }
  0xbc   : >> { %769 = vst [vmem:[%s5597_s29 + $0xd0] sm:$0xff] %v768_v13  ;;  %v826_v42 = vld [vmem:[%s5601_s4 + $0x498] sm:$0xff]  ;;  %v830_v44 = vld [vmem:[%s5601_s4 + $0x4d0] sm:$0xff]  ;;  %v834_v46 = vld [vmem:[%s5601_s4 + $0x508] sm:$0xff] }
  0xbd   : >> { %771 = vst [vmem:[%s5597_s29 + $0xe0] sm:$0xff] %v770_v14  ;;  %v828_v43 = vld [vmem:[%s5601_s4 + $0x4b4] sm:$0xff]  ;;  %v832_v45 = vld [vmem:[%s5601_s4 + $0x4ec] sm:$0xff]  ;;  %v836_v47 = vld [vmem:[%s5601_s4 + $0x524] sm:$0xff] }
  0xbe   : >> { %773 = vst [vmem:[%s5597_s29 + $0xf0] sm:$0xff] %v772_v15  ;;  %v838_v48 = vld [vmem:[%s5601_s4 + $0x540] sm:$0xff]  ;;  %v842_v50 = vld [vmem:[%s5601_s4 + $0x578] sm:$0xff]  ;;  %v846_v52 = vld [vmem:[%s5601_s4 + $0x5b0] sm:$0xff] }
  0xbf   : >> { %775 = vst [vmem:[%s5597_s29 + $0x100] sm:$0xff] %v774_v16  ;;  %v840_v49 = vld [vmem:[%s5601_s4 + $0x55c] sm:$0xff]  ;;  %v844_v51 = vld [vmem:[%s5601_s4 + $0x594] sm:$0xff]  ;;  %v848_v53 = vld [vmem:[%s5601_s4 + $0x5cc] sm:$0xff] }
  0xc0   : >> { %777 = vst [vmem:[%s5597_s29 + $0x110] sm:$0xff] %v776_v17  ;;  %v850_v54 = vld [vmem:[%s5601_s4 + $0x5e8] sm:$0xff]  ;;  %v854_v56 = vld [vmem:[%s5601_s4 + $0x620] sm:$0xff]  ;;  %v858_v58 = vld [vmem:[%s5601_s4 + $0x658] sm:$0xff] }
  0xc1   : >> { %779 = vst [vmem:[%s5597_s29 + $0x120] sm:$0xff] %v778_v18  ;;  %v852_v55 = vld [vmem:[%s5601_s4 + $0x604] sm:$0xff]  ;;  %v856_v57 = vld [vmem:[%s5601_s4 + $0x63c] sm:$0xff]  ;;  %v860_v59 = vld [vmem:[%s5601_s4 + $0x674] sm:$0xff] }
  0xc2   : >> { %781 = vst [vmem:[%s5597_s29 + $0x130] sm:$0xff] %v780_v19  ;;  %v862_v60 = vld [vmem:[%s5601_s4 + $0x690] sm:$0xff]  ;;  %v866_v62 = vld [vmem:[%s5601_s4 + $0x6c8] sm:$0xff]  ;;  %v870_v0 = vld [vmem:[%s5601_s4 + $0x700] sm:$0xff] }
  0xc3   : >> { %783 = vst [vmem:[%s5597_s29 + $0x140] sm:$0xff] %v782_v20  ;;  %v864_v61 = vld [vmem:[%s5601_s4 + $0x6ac] sm:$0xff]  ;;  %v868_v63 = vld [vmem:[%s5601_s4 + $0x6e4] sm:$0xff]  ;;  %v872_v1 = vld [vmem:[%s5601_s4 + $0x71c] sm:$0xff] }
  0xc4   : >> { %785 = vst [vmem:[%s5597_s29 + $0x150] sm:$0xff] %v784_v21  ;;  %v874_v2 = vld [vmem:[%s5601_s4 + $0x738] sm:$0xff]  ;;  %v878_v4 = vld [vmem:[%s5601_s4 + $0x770] sm:$0xff]  ;;  %v882_v6 = vld [vmem:[%s5601_s4 + $0x7a8] sm:$0xff] }
  0xc5   : >> { %787 = vst [vmem:[%s5597_s29 + $0x160] sm:$0xff] %v786_v22  ;;  %v876_v3 = vld [vmem:[%s5601_s4 + $0x754] sm:$0xff]  ;;  %v880_v5 = vld [vmem:[%s5601_s4 + $0x78c] sm:$0xff]  ;;  %v884_v7 = vld [vmem:[%s5601_s4 + $0x7c4] sm:$0xff] }
  0xc6   : >> { %789 = vst [vmem:[%s5597_s29 + $0x170] sm:$0xff] %v788_v23  ;;  %v886_v8 = vld [vmem:[%s5601_s4 + $0x7e0] sm:$0xff]  ;;  %v890_v10 = vld [vmem:[%s5601_s4 + $0x818] sm:$0xff]  ;;  %v894_v12 = vld [vmem:[%s5601_s4 + $0x850] sm:$0xff] }
  0xc7   : >> { %791 = vst [vmem:[%s5597_s29 + $0x180] sm:$0xff] %v790_v24  ;;  %v888_v9 = vld [vmem:[%s5601_s4 + $0x7fc] sm:$0xff]  ;;  %v892_v11 = vld [vmem:[%s5601_s4 + $0x834] sm:$0xff]  ;;  %v896_v13 = vld [vmem:[%s5601_s4 + $0x86c] sm:$0xff] }
  0xc8   : >> { %793 = vst [vmem:[%s5597_s29 + $0x190] sm:$0xff] %v792_v25  ;;  %v898_v14 = vld [vmem:[%s5601_s4 + $0x888] sm:$0xff]  ;;  %v902_v16 = vld [vmem:[%s5601_s4 + $0x8c0] sm:$0xff]  ;;  %v906_v18 = vld [vmem:[%s5601_s4 + $0x8f8] sm:$0xff] }
  0xc9   : >> { %795 = vst [vmem:[%s5597_s29 + $0x1a0] sm:$0xff] %v794_v26  ;;  %v900_v15 = vld [vmem:[%s5601_s4 + $0x8a4] sm:$0xff]  ;;  %v904_v17 = vld [vmem:[%s5601_s4 + $0x8dc] sm:$0xff]  ;;  %v908_v19 = vld [vmem:[%s5601_s4 + $0x914] sm:$0xff] }
  0xca   : >> { %797 = vst [vmem:[%s5597_s29 + $0x1b0] sm:$0xff] %v796_v27  ;;  %v910_v20 = vld [vmem:[%s5601_s4 + $0x930] sm:$0xff]  ;;  %v914_v22 = vld [vmem:[%s5601_s4 + $0x968] sm:$0xff]  ;;  %v918_v24 = vld [vmem:[%s5601_s4 + $0x9a0] sm:$0xff] }
  0xcb   : >> { %799 = vst [vmem:[%s5597_s29 + $0x1c0] sm:$0xff] %v798_v28  ;;  %v912_v21 = vld [vmem:[%s5601_s4 + $0x94c] sm:$0xff]  ;;  %v916_v23 = vld [vmem:[%s5601_s4 + $0x984] sm:$0xff]  ;;  %v920_v25 = vld [vmem:[%s5601_s4 + $0x9bc] sm:$0xff] }
  0xcc   : >> { %801 = vst [vmem:[%s5597_s29 + $0x1d0] sm:$0xff] %v800_v29  ;;  %v922_v26 = vld [vmem:[%s5601_s4 + $0x9d8] sm:$0xff]  ;;  %v926_v28 = vld [vmem:[%s5601_s4 + $0xa10] sm:$0xff] }
  0xcd   : >> { %803 = vst [vmem:[%s5597_s29 + $0x1e0] sm:$0xff] %v802_v30  ;;  %v924_v27 = vld [vmem:[%s5601_s4 + $0x9f4] sm:$0xff]  ;;  %v928_v29 = vld [vmem:[%s5601_s4 + $0xa2c] sm:$0xff] }
  0xce   : >> { %805 = vst [vmem:[%s5597_s29 + $0x1f0] sm:$0xff] %v804_v31  ;;  %v930_v30 = vld [vmem:[%s5601_s4 + $0xa48] sm:$0xff] }
  0xcf   : >> { %807 = vst [vmem:[%s5597_s29 + $0x200] sm:$0xff] %v806_v32  ;;  %v932_v31 = vld [vmem:[%s5601_s4 + $0xa64] sm:$0xff] }
  0xd0   : >> { %809 = vst [vmem:[%s5597_s29 + $0x210] sm:$0xff] %v808_v33  ;;  %v934_v32 = vld [vmem:[%s5601_s4 + $0xa80] sm:$0xff] }
  0xd1   : >> { %811 = vst [vmem:[%s5597_s29 + $0x220] sm:$0xff] %v810_v34  ;;  %v936_v33 = vld [vmem:[%s5601_s4 + $0xa9c] sm:$0xff] }
  0xd2   : >> { %813 = vst [vmem:[%s5597_s29 + $0x230] sm:$0xff] %v812_v35  ;;  %v938_v34 = vld [vmem:[%s5601_s4 + $0xab8] sm:$0xff] }
  0xd3   : >> { %815 = vst [vmem:[%s5597_s29 + $0x240] sm:$0xff] %v814_v36  ;;  %v940_v35 = vld [vmem:[%s5601_s4 + $0xad4] sm:$0xff] }
  0xd4   : >> { %817 = vst [vmem:[%s5597_s29 + $0x250] sm:$0xff] %v816_v37  ;;  %v942_v36 = vld [vmem:[%s5601_s4 + $0xaf0] sm:$0xff] }
  0xd5   : >> { %819 = vst [vmem:[%s5597_s29 + $0x260] sm:$0xff] %v818_v38  ;;  %v944_v37 = vld [vmem:[%s5601_s4 + $0xb0c] sm:$0xff] }
  0xd6   : >> { %821 = vst [vmem:[%s5597_s29 + $0x270] sm:$0xff] %v820_v39  ;;  %v946_v38 = vld [vmem:[%s5601_s4 + $0xb28] sm:$0xff] }
  0xd7   : >> { %823 = vst [vmem:[%s5597_s29 + $0x280] sm:$0xff] %v822_v40  ;;  %v948_v39 = vld [vmem:[%s5601_s4 + $0xb44] sm:$0xff] }
  0xd8   : >> { %825 = vst [vmem:[%s5597_s29 + $0x290] sm:$0xff] %v824_v41  ;;  %v950_v40 = vld [vmem:[%s5601_s4 + $0xb60] sm:$0xff] }
  0xd9   : >> { %827 = vst [vmem:[%s5597_s29 + $0x2a0] sm:$0xff] %v826_v42  ;;  %v952_v41 = vld [vmem:[%s5601_s4 + $0xb7c] sm:$0xff] }
  0xda   : >> { %829 = vst [vmem:[%s5597_s29 + $0x2b0] sm:$0xff] %v828_v43  ;;  %v954_v42 = vld [vmem:[%s5601_s4 + $0xb98] sm:$0xff] }
  0xdb   : >> { %831 = vst [vmem:[%s5597_s29 + $0x2c0] sm:$0xff] %v830_v44  ;;  %v956_v43 = vld [vmem:[%s5601_s4 + $0xbb4] sm:$0xff] }
  0xdc   : >> { %833 = vst [vmem:[%s5597_s29 + $0x2d0] sm:$0xff] %v832_v45  ;;  %v958_v44 = vld [vmem:[%s5601_s4 + $0xbd0] sm:$0xff] }
  0xdd   : >> { %835 = vst [vmem:[%s5597_s29 + $0x2e0] sm:$0xff] %v834_v46  ;;  %v960_v45 = vld [vmem:[%s5601_s4 + $0xbec] sm:$0xff] }
  0xde   : >> { %837 = vst [vmem:[%s5597_s29 + $0x2f0] sm:$0xff] %v836_v47  ;;  %v962_v46 = vld [vmem:[%s5601_s4 + $0xc08] sm:$0xff] }
  0xdf   : >> { %839 = vst [vmem:[%s5597_s29 + $0x300] sm:$0xff] %v838_v48  ;;  %v964_v47 = vld [vmem:[%s5601_s4 + $0xc24] sm:$0xff] }
  0xe0   : >> { %841 = vst [vmem:[%s5597_s29 + $0x310] sm:$0xff] %v840_v49  ;;  %v966_v48 = vld [vmem:[%s5601_s4 + $0xc40] sm:$0xff] }
  0xe1   : >> { %843 = vst [vmem:[%s5597_s29 + $0x320] sm:$0xff] %v842_v50  ;;  %v968_v49 = vld [vmem:[%s5601_s4 + $0xc5c] sm:$0xff] }
  0xe2   : >> { %845 = vst [vmem:[%s5597_s29 + $0x330] sm:$0xff] %v844_v51  ;;  %v970_v50 = vld [vmem:[%s5601_s4 + $0xc78] sm:$0xff] }
  0xe3   : >> { %847 = vst [vmem:[%s5597_s29 + $0x340] sm:$0xff] %v846_v52  ;;  %v972_v51 = vld [vmem:[%s5601_s4 + $0xc94] sm:$0xff] }
  0xe4   : >> { %849 = vst [vmem:[%s5597_s29 + $0x350] sm:$0xff] %v848_v53  ;;  %v974_v52 = vld [vmem:[%s5601_s4 + $0xcb0] sm:$0xff] }
  0xe5   : >> { %851 = vst [vmem:[%s5597_s29 + $0x360] sm:$0xff] %v850_v54  ;;  %v976_v53 = vld [vmem:[%s5601_s4 + $0xccc] sm:$0xff] }
  0xe6   : >> { %853 = vst [vmem:[%s5597_s29 + $0x370] sm:$0xff] %v852_v55  ;;  %v978_v54 = vld [vmem:[%s5601_s4 + $0xce8] sm:$0xff] }
  0xe7   : >> { %855 = vst [vmem:[%s5597_s29 + $0x380] sm:$0xff] %v854_v56  ;;  %v980_v55 = vld [vmem:[%s5601_s4 + $0xd04] sm:$0xff] }
  0xe8   : >> { %857 = vst [vmem:[%s5597_s29 + $0x390] sm:$0xff] %v856_v57  ;;  %v982_v56 = vld [vmem:[%s5601_s4 + $0xd20] sm:$0xff] }
  0xe9   : >> { %859 = vst [vmem:[%s5597_s29 + $0x3a0] sm:$0xff] %v858_v58  ;;  %v984_v57 = vld [vmem:[%s5601_s4 + $0xd3c] sm:$0xff] }
  0xea   : >> { %861 = vst [vmem:[%s5597_s29 + $0x3b0] sm:$0xff] %v860_v59  ;;  %v986_v58 = vld [vmem:[%s5601_s4 + $0xd58] sm:$0xff] }
  0xeb   : >> { %863 = vst [vmem:[%s5597_s29 + $0x3c0] sm:$0xff] %v862_v60  ;;  %v988_v59 = vld [vmem:[%s5601_s4 + $0xd74] sm:$0xff] }
  0xec   : >> { %865 = vst [vmem:[%s5597_s29 + $0x3d0] sm:$0xff] %v864_v61  ;;  %v990_v60 = vld [vmem:[%s5601_s4 + $0xd90] sm:$0xff] }
  0xed   : >> { %867 = vst [vmem:[%s5597_s29 + $0x3e0] sm:$0xff] %v866_v62  ;;  %v992_v61 = vld [vmem:[%s5601_s4 + $0xdac] sm:$0xff] }
  0xee   : >> { %869 = vst [vmem:[%s5597_s29 + $0x3f0] sm:$0xff] %v868_v63  ;;  %v994_v62 = vld [vmem:[%s5601_s4 + $0xdc8] sm:$0xff] }
  0xef   : >> { %871 = vst [vmem:[%s5597_s29 + $0x400] sm:$0xff] %v870_v0  ;;  %v996_v63 = vld [vmem:[%s5601_s4 + $0xde4] sm:$0xff]  ;;  %s8318_s4 = smov %s6114_s18 }
  0xf0   : >> { %873 = vst [vmem:[%s5597_s29 + $0x410] sm:$0xff] %v872_v1  ;;  %v1015_v0 = vld [vmem:[%s6068_s27] sm:%s6375_s24] (%p735_p2) }
  0xf1   : >> { %875 = vst [vmem:[%s5597_s29 + $0x420] sm:$0xff] %v874_v2  ;;  %v1017_v1 = vld [vmem:[%s6068_s27 + $0x1c] sm:%s6375_s24] (%p735_p2) }
  0xf2   : >> { %877 = vst [vmem:[%s5597_s29 + $0x430] sm:$0xff] %v876_v3  ;;  %v1019_v2 = vld [vmem:[%s6068_s27 + $0x38] sm:%s6375_s24] (%p735_p2) }
  0xf3   : >> { %879 = vst [vmem:[%s5597_s29 + $0x440] sm:$0xff] %v878_v4  ;;  %v1021_v3 = vld [vmem:[%s6068_s27 + $0x54] sm:%s6375_s24] (%p735_p2) }
  0xf4   : >> { %881 = vst [vmem:[%s5597_s29 + $0x450] sm:$0xff] %v880_v5  ;;  %v1023_v4 = vld [vmem:[%s6068_s27 + $0x70] sm:%s6375_s24] (%p735_p2) }
  0xf5   : >> { %883 = vst [vmem:[%s5597_s29 + $0x460] sm:$0xff] %v882_v6  ;;  %v1025_v5 = vld [vmem:[%s6068_s27 + $0x8c] sm:%s6375_s24] (%p735_p2) }
  0xf6   : >> { %885 = vst [vmem:[%s5597_s29 + $0x470] sm:$0xff] %v884_v7  ;;  %v1027_v6 = vld [vmem:[%s6068_s27 + $0xa8] sm:%s6375_s24] (%p735_p2) }
  0xf7   : >> { %887 = vst [vmem:[%s5597_s29 + $0x480] sm:$0xff] %v886_v8  ;;  %v1029_v7 = vld [vmem:[%s6068_s27 + $0xc4] sm:%s6375_s24] (%p735_p2) }
  0xf8   : >> { %889 = vst [vmem:[%s5597_s29 + $0x490] sm:$0xff] %v888_v9  ;;  %v1031_v8 = vld [vmem:[%s6068_s27 + $0xe0] sm:%s6375_s24] (%p735_p2) }
  0xf9   : >> { %891 = vst [vmem:[%s5597_s29 + $0x4a0] sm:$0xff] %v890_v10  ;;  %v1033_v9 = vld [vmem:[%s6068_s27 + $0xfc] sm:%s6375_s24] (%p735_p2) }
  0xfa   : >> { %893 = vst [vmem:[%s5597_s29 + $0x4b0] sm:$0xff] %v892_v11  ;;  %v1035_v10 = vld [vmem:[%s6068_s27 + $0x118] sm:%s6375_s24] (%p735_p2) }
  0xfb   : >> { %895 = vst [vmem:[%s5597_s29 + $0x4c0] sm:$0xff] %v894_v12  ;;  %v1037_v11 = vld [vmem:[%s6068_s27 + $0x134] sm:%s6375_s24] (%p735_p2) }
  0xfc   : >> { %897 = vst [vmem:[%s5597_s29 + $0x4d0] sm:$0xff] %v896_v13  ;;  %v1039_v12 = vld [vmem:[%s6068_s27 + $0x150] sm:%s6375_s24] (%p735_p2) }
  0xfd   : >> { %899 = vst [vmem:[%s5597_s29 + $0x4e0] sm:$0xff] %v898_v14  ;;  %v1041_v13 = vld [vmem:[%s6068_s27 + $0x16c] sm:%s6375_s24] (%p735_p2) }
  0xfe   : >> { %901 = vst [vmem:[%s5597_s29 + $0x4f0] sm:$0xff] %v900_v15  ;;  %v1043_v14 = vld [vmem:[%s6068_s27 + $0x188] sm:%s6375_s24] (%p735_p2) }
  0xff   : >> { %903 = vst [vmem:[%s5597_s29 + $0x500] sm:$0xff] %v902_v16  ;;  %v1045_v15 = vld [vmem:[%s6068_s27 + $0x1a4] sm:%s6375_s24] (%p735_p2) }
 0x100   : >> { %905 = vst [vmem:[%s5597_s29 + $0x510] sm:$0xff] %v904_v17  ;;  %v1047_v16 = vld [vmem:[%s6068_s27 + $0x1c0] sm:%s6375_s24] (%p735_p2) }
 0x101   : >> { %907 = vst [vmem:[%s5597_s29 + $0x520] sm:$0xff] %v906_v18  ;;  %v1049_v17 = vld [vmem:[%s6068_s27 + $0x1dc] sm:%s6375_s24] (%p735_p2) }
 0x102   : >> { %909 = vst [vmem:[%s5597_s29 + $0x530] sm:$0xff] %v908_v19  ;;  %v1051_v18 = vld [vmem:[%s6068_s27 + $0x1f8] sm:%s6375_s24] (%p735_p2) }
 0x103   : >> { %911 = vst [vmem:[%s5597_s29 + $0x540] sm:$0xff] %v910_v20  ;;  %v1053_v19 = vld [vmem:[%s6068_s27 + $0x214] sm:%s6375_s24] (%p735_p2) }
 0x104   : >> { %913 = vst [vmem:[%s5597_s29 + $0x550] sm:$0xff] %v912_v21  ;;  %v1055_v20 = vld [vmem:[%s6068_s27 + $0x230] sm:%s6375_s24] (%p735_p2) }
 0x105   : >> { %915 = vst [vmem:[%s5597_s29 + $0x560] sm:$0xff] %v914_v22  ;;  %v1057_v21 = vld [vmem:[%s6068_s27 + $0x24c] sm:%s6375_s24] (%p735_p2) }
 0x106   : >> { %917 = vst [vmem:[%s5597_s29 + $0x570] sm:$0xff] %v916_v23  ;;  %v1059_v22 = vld [vmem:[%s6068_s27 + $0x268] sm:%s6375_s24] (%p735_p2) }
 0x107   : >> { %919 = vst [vmem:[%s5597_s29 + $0x580] sm:$0xff] %v918_v24  ;;  %v1061_v23 = vld [vmem:[%s6068_s27 + $0x284] sm:%s6375_s24] (%p735_p2) }
 0x108   : >> { %921 = vst [vmem:[%s5597_s29 + $0x590] sm:$0xff] %v920_v25  ;;  %v1063_v24 = vld [vmem:[%s6068_s27 + $0x2a0] sm:%s6375_s24] (%p735_p2) }
 0x109   : >> { %923 = vst [vmem:[%s5597_s29 + $0x5a0] sm:$0xff] %v922_v26  ;;  %v1065_v25 = vld [vmem:[%s6068_s27 + $0x2bc] sm:%s6375_s24] (%p735_p2) }
 0x10a   : >> { %925 = vst [vmem:[%s5597_s29 + $0x5b0] sm:$0xff] %v924_v27  ;;  %v1067_v26 = vld [vmem:[%s6068_s27 + $0x2d8] sm:%s6375_s24] (%p735_p2) }
 0x10b   : >> { %927 = vst [vmem:[%s5597_s29 + $0x5c0] sm:$0xff] %v926_v28  ;;  %v1069_v27 = vld [vmem:[%s6068_s27 + $0x2f4] sm:%s6375_s24] (%p735_p2) }
 0x10c   : >> { %929 = vst [vmem:[%s5597_s29 + $0x5d0] sm:$0xff] %v928_v29  ;;  %v1071_v28 = vld [vmem:[%s6068_s27 + $0x310] sm:%s6375_s24] (%p735_p2) }
 0x10d   : >> { %931 = vst [vmem:[%s5597_s29 + $0x5e0] sm:$0xff] %v930_v30  ;;  %v1073_v29 = vld [vmem:[%s6068_s27 + $0x32c] sm:%s6375_s24] (%p735_p2) }
 0x10e   : >> { %933 = vst [vmem:[%s5597_s29 + $0x5f0] sm:$0xff] %v932_v31  ;;  %v1075_v30 = vld [vmem:[%s6068_s27 + $0x348] sm:%s6375_s24] (%p735_p2) }
 0x10f   : >> { %935 = vst [vmem:[%s5597_s29 + $0x600] sm:$0xff] %v934_v32  ;;  %v1077_v31 = vld [vmem:[%s6068_s27 + $0x364] sm:%s6375_s24] (%p735_p2) }
 0x110   : >> { %937 = vst [vmem:[%s5597_s29 + $0x610] sm:$0xff] %v936_v33  ;;  %v1079_v32 = vld [vmem:[%s6068_s27 + $0x380] sm:%s6375_s24] (%p735_p2) }
 0x111   : >> { %939 = vst [vmem:[%s5597_s29 + $0x620] sm:$0xff] %v938_v34  ;;  %v1081_v33 = vld [vmem:[%s6068_s27 + $0x39c] sm:%s6375_s24] (%p735_p2) }
 0x112   : >> { %941 = vst [vmem:[%s5597_s29 + $0x630] sm:$0xff] %v940_v35  ;;  %v1083_v34 = vld [vmem:[%s6068_s27 + $0x3b8] sm:%s6375_s24] (%p735_p2) }
 0x113   : >> { %943 = vst [vmem:[%s5597_s29 + $0x640] sm:$0xff] %v942_v36  ;;  %v1085_v35 = vld [vmem:[%s6068_s27 + $0x3d4] sm:%s6375_s24] (%p735_p2) }
 0x114   : >> { %945 = vst [vmem:[%s5597_s29 + $0x650] sm:$0xff] %v944_v37  ;;  %v1087_v36 = vld [vmem:[%s6068_s27 + $0x3f0] sm:%s6375_s24] (%p735_p2) }
 0x115   : >> { %947 = vst [vmem:[%s5597_s29 + $0x660] sm:$0xff] %v946_v38  ;;  %v1089_v37 = vld [vmem:[%s6068_s27 + $0x40c] sm:%s6375_s24] (%p735_p2) }
 0x116   : >> { %949 = vst [vmem:[%s5597_s29 + $0x670] sm:$0xff] %v948_v39  ;;  %v1091_v38 = vld [vmem:[%s6068_s27 + $0x428] sm:%s6375_s24] (%p735_p2) }
 0x117   : >> { %951 = vst [vmem:[%s5597_s29 + $0x680] sm:$0xff] %v950_v40  ;;  %v1093_v39 = vld [vmem:[%s6068_s27 + $0x444] sm:%s6375_s24] (%p735_p2) }
 0x118   : >> { %953 = vst [vmem:[%s5597_s29 + $0x690] sm:$0xff] %v952_v41  ;;  %v1095_v40 = vld [vmem:[%s6068_s27 + $0x460] sm:%s6375_s24] (%p735_p2) }
 0x119   : >> { %955 = vst [vmem:[%s5597_s29 + $0x6a0] sm:$0xff] %v954_v42  ;;  %v1097_v41 = vld [vmem:[%s6068_s27 + $0x47c] sm:%s6375_s24] (%p735_p2) }
 0x11a   : >> { %957 = vst [vmem:[%s5597_s29 + $0x6b0] sm:$0xff] %v956_v43  ;;  %v1099_v42 = vld [vmem:[%s6068_s27 + $0x498] sm:%s6375_s24] (%p735_p2) }
 0x11b   : >> { %959 = vst [vmem:[%s5597_s29 + $0x6c0] sm:$0xff] %v958_v44  ;;  %v1101_v43 = vld [vmem:[%s6068_s27 + $0x4b4] sm:%s6375_s24] (%p735_p2) }
 0x11c   : >> { %961 = vst [vmem:[%s5597_s29 + $0x6d0] sm:$0xff] %v960_v45  ;;  %v1103_v44 = vld [vmem:[%s6068_s27 + $0x4d0] sm:%s6375_s24] (%p735_p2) }
 0x11d   : >> { %963 = vst [vmem:[%s5597_s29 + $0x6e0] sm:$0xff] %v962_v46  ;;  %v1105_v45 = vld [vmem:[%s6068_s27 + $0x4ec] sm:%s6375_s24] (%p735_p2) }
 0x11e   : >> { %965 = vst [vmem:[%s5597_s29 + $0x6f0] sm:$0xff] %v964_v47  ;;  %v1107_v46 = vld [vmem:[%s6068_s27 + $0x508] sm:%s6375_s24] (%p735_p2) }
 0x11f   : >> { %967 = vst [vmem:[%s5597_s29 + $0x700] sm:$0xff] %v966_v48  ;;  %v1109_v47 = vld [vmem:[%s6068_s27 + $0x524] sm:%s6375_s24] (%p735_p2) }
 0x120   : >> { %969 = vst [vmem:[%s5597_s29 + $0x710] sm:$0xff] %v968_v49  ;;  %v1111_v48 = vld [vmem:[%s6068_s27 + $0x540] sm:%s6375_s24] (%p735_p2) }
 0x121   : >> { %971 = vst [vmem:[%s5597_s29 + $0x720] sm:$0xff] %v970_v50  ;;  %v1113_v49 = vld [vmem:[%s6068_s27 + $0x55c] sm:%s6375_s24] (%p735_p2) }
 0x122   : >> { %973 = vst [vmem:[%s5597_s29 + $0x730] sm:$0xff] %v972_v51  ;;  %v1115_v50 = vld [vmem:[%s6068_s27 + $0x578] sm:%s6375_s24] (%p735_p2) }
 0x123   : >> { %975 = vst [vmem:[%s5597_s29 + $0x740] sm:$0xff] %v974_v52  ;;  %v1117_v51 = vld [vmem:[%s6068_s27 + $0x594] sm:%s6375_s24] (%p735_p2) }
 0x124   : >> { %977 = vst [vmem:[%s5597_s29 + $0x750] sm:$0xff] %v976_v53  ;;  %v1119_v52 = vld [vmem:[%s6068_s27 + $0x5b0] sm:%s6375_s24] (%p735_p2) }
 0x125   : >> { %979 = vst [vmem:[%s5597_s29 + $0x760] sm:$0xff] %v978_v54  ;;  %v1121_v53 = vld [vmem:[%s6068_s27 + $0x5cc] sm:%s6375_s24] (%p735_p2) }
 0x126   : >> { %981 = vst [vmem:[%s5597_s29 + $0x770] sm:$0xff] %v980_v55  ;;  %v1123_v54 = vld [vmem:[%s6068_s27 + $0x5e8] sm:%s6375_s24] (%p735_p2) }
 0x127   : >> { %983 = vst [vmem:[%s5597_s29 + $0x780] sm:$0xff] %v982_v56  ;;  %v1125_v55 = vld [vmem:[%s6068_s27 + $0x604] sm:%s6375_s24] (%p735_p2) }
 0x128   : >> { %985 = vst [vmem:[%s5597_s29 + $0x790] sm:$0xff] %v984_v57  ;;  %v1127_v56 = vld [vmem:[%s6068_s27 + $0x620] sm:%s6375_s24] (%p735_p2) }
 0x129   : >> { %987 = vst [vmem:[%s5597_s29 + $0x7a0] sm:$0xff] %v986_v58  ;;  %v1129_v57 = vld [vmem:[%s6068_s27 + $0x63c] sm:%s6375_s24] (%p735_p2) }
 0x12a   : >> { %989 = vst [vmem:[%s5597_s29 + $0x7b0] sm:$0xff] %v988_v59  ;;  %738 = sbr.rel (!%p735_p2) target bundleno = 174 (0xae), region = 231  ;;  %v1131_v58 = vld [vmem:[%s6068_s27 + $0x658] sm:%s6375_s24] (%p735_p2) }
 0x12b   : >> { %991 = vst [vmem:[%s5597_s29 + $0x7c0] sm:$0xff] %v990_v60  ;;  %v1133_v59 = vld [vmem:[%s6068_s27 + $0x674] sm:%s6375_s24] (%p735_p2) }
 0x12c   : >> { %993 = vst [vmem:[%s5597_s29 + $0x7d0] sm:$0xff] %v992_v61  ;;  %v1135_v60 = vld [vmem:[%s6068_s27 + $0x690] sm:%s6375_s24] (%p735_p2) }
 0x12d   : >> { %995 = vst [vmem:[%s5597_s29 + $0x7e0] sm:$0xff] %v994_v62  ;;  %v1137_v61 = vld [vmem:[%s6068_s27 + $0x6ac] sm:%s6375_s24] (%p735_p2) }
 0x12e   : >> { %997 = vst [vmem:[%s5597_s29 + $0x7f0] sm:$0xff] %v996_v63  ;;  %s8317_s29 = smov %s6117_s19  ;;  %v1139_v62 = vld [vmem:[%s6068_s27 + $0x6c8] sm:%s6375_s24] (%p735_p2) }
 0x12f   : > { %1016 = vst [vmem:[%s6071_s28] sm:%s6375_s24] %v1015_v0  ;;  %v1141_v63 = vld [vmem:[%s6068_s27 + $0x6e4] sm:%s6375_s24] }
 0x130   : > { %1018 = vst [vmem:[%s6071_s28 + $0x10] sm:%s6375_s24] %v1017_v1  ;;  %v1143_v0 = vld [vmem:[%s6068_s27 + $0x700] sm:%s6375_s24] }
 0x131   : > { %1020 = vst [vmem:[%s6071_s28 + $0x20] sm:%s6375_s24] %v1019_v2  ;;  %v1145_v1 = vld [vmem:[%s6068_s27 + $0x71c] sm:%s6375_s24] }
 0x132   : > { %1022 = vst [vmem:[%s6071_s28 + $0x30] sm:%s6375_s24] %v1021_v3  ;;  %v1147_v2 = vld [vmem:[%s6068_s27 + $0x738] sm:%s6375_s24] }
 0x133   : > { %1024 = vst [vmem:[%s6071_s28 + $0x40] sm:%s6375_s24] %v1023_v4  ;;  %v1149_v3 = vld [vmem:[%s6068_s27 + $0x754] sm:%s6375_s24] }
 0x134   : > { %1026 = vst [vmem:[%s6071_s28 + $0x50] sm:%s6375_s24] %v1025_v5  ;;  %v1151_v4 = vld [vmem:[%s6068_s27 + $0x770] sm:%s6375_s24] }
 0x135   : > { %1028 = vst [vmem:[%s6071_s28 + $0x60] sm:%s6375_s24] %v1027_v6  ;;  %v1153_v5 = vld [vmem:[%s6068_s27 + $0x78c] sm:%s6375_s24] }
 0x136   : > { %1030 = vst [vmem:[%s6071_s28 + $0x70] sm:%s6375_s24] %v1029_v7  ;;  %v1155_v6 = vld [vmem:[%s6068_s27 + $0x7a8] sm:%s6375_s24] }
 0x137   : > { %1032 = vst [vmem:[%s6071_s28 + $0x80] sm:%s6375_s24] %v1031_v8  ;;  %v1157_v7 = vld [vmem:[%s6068_s27 + $0x7c4] sm:%s6375_s24] }
 0x138   : > { %1034 = vst [vmem:[%s6071_s28 + $0x90] sm:%s6375_s24] %v1033_v9  ;;  %v1159_v8 = vld [vmem:[%s6068_s27 + $0x7e0] sm:%s6375_s24] }
 0x139   : > { %1036 = vst [vmem:[%s6071_s28 + $0xa0] sm:%s6375_s24] %v1035_v10  ;;  %v1161_v9 = vld [vmem:[%s6068_s27 + $0x7fc] sm:%s6375_s24] }
 0x13a   : > { %1038 = vst [vmem:[%s6071_s28 + $0xb0] sm:%s6375_s24] %v1037_v11  ;;  %v1163_v10 = vld [vmem:[%s6068_s27 + $0x818] sm:%s6375_s24] }
 0x13b   : > { %1040 = vst [vmem:[%s6071_s28 + $0xc0] sm:%s6375_s24] %v1039_v12  ;;  %v1165_v11 = vld [vmem:[%s6068_s27 + $0x834] sm:%s6375_s24] }
 0x13c   : > { %1042 = vst [vmem:[%s6071_s28 + $0xd0] sm:%s6375_s24] %v1041_v13  ;;  %v1167_v12 = vld [vmem:[%s6068_s27 + $0x850] sm:%s6375_s24] }
 0x13d   : > { %1044 = vst [vmem:[%s6071_s28 + $0xe0] sm:%s6375_s24] %v1043_v14  ;;  %v1169_v13 = vld [vmem:[%s6068_s27 + $0x86c] sm:%s6375_s24] }
 0x13e   : > { %1046 = vst [vmem:[%s6071_s28 + $0xf0] sm:%s6375_s24] %v1045_v15  ;;  %v1171_v14 = vld [vmem:[%s6068_s27 + $0x888] sm:%s6375_s24] }
 0x13f   : > { %1048 = vst [vmem:[%s6071_s28 + $0x100] sm:%s6375_s24] %v1047_v16  ;;  %v1173_v15 = vld [vmem:[%s6068_s27 + $0x8a4] sm:%s6375_s24] }
 0x140   : > { %1050 = vst [vmem:[%s6071_s28 + $0x110] sm:%s6375_s24] %v1049_v17  ;;  %v1175_v16 = vld [vmem:[%s6068_s27 + $0x8c0] sm:%s6375_s24] }
 0x141   : > { %1052 = vst [vmem:[%s6071_s28 + $0x120] sm:%s6375_s24] %v1051_v18  ;;  %v1177_v17 = vld [vmem:[%s6068_s27 + $0x8dc] sm:%s6375_s24] }
 0x142   : > { %1054 = vst [vmem:[%s6071_s28 + $0x130] sm:%s6375_s24] %v1053_v19  ;;  %v1179_v18 = vld [vmem:[%s6068_s27 + $0x8f8] sm:%s6375_s24] }
 0x143   : > { %1056 = vst [vmem:[%s6071_s28 + $0x140] sm:%s6375_s24] %v1055_v20  ;;  %v1181_v19 = vld [vmem:[%s6068_s27 + $0x914] sm:%s6375_s24] }
 0x144   : > { %1058 = vst [vmem:[%s6071_s28 + $0x150] sm:%s6375_s24] %v1057_v21  ;;  %v1183_v20 = vld [vmem:[%s6068_s27 + $0x930] sm:%s6375_s24] }
 0x145   : > { %1060 = vst [vmem:[%s6071_s28 + $0x160] sm:%s6375_s24] %v1059_v22  ;;  %v1185_v21 = vld [vmem:[%s6068_s27 + $0x94c] sm:%s6375_s24] }
 0x146   : > { %1062 = vst [vmem:[%s6071_s28 + $0x170] sm:%s6375_s24] %v1061_v23  ;;  %v1187_v22 = vld [vmem:[%s6068_s27 + $0x968] sm:%s6375_s24] }
 0x147   : > { %1064 = vst [vmem:[%s6071_s28 + $0x180] sm:%s6375_s24] %v1063_v24  ;;  %v1189_v23 = vld [vmem:[%s6068_s27 + $0x984] sm:%s6375_s24] }
 0x148   : > { %1066 = vst [vmem:[%s6071_s28 + $0x190] sm:%s6375_s24] %v1065_v25  ;;  %v1191_v24 = vld [vmem:[%s6068_s27 + $0x9a0] sm:%s6375_s24] }
 0x149   : > { %1068 = vst [vmem:[%s6071_s28 + $0x1a0] sm:%s6375_s24] %v1067_v26  ;;  %v1193_v25 = vld [vmem:[%s6068_s27 + $0x9bc] sm:%s6375_s24] }
 0x14a   : > { %1070 = vst [vmem:[%s6071_s28 + $0x1b0] sm:%s6375_s24] %v1069_v27  ;;  %v1195_v26 = vld [vmem:[%s6068_s27 + $0x9d8] sm:%s6375_s24] }
 0x14b   : > { %1072 = vst [vmem:[%s6071_s28 + $0x1c0] sm:%s6375_s24] %v1071_v28  ;;  %v1197_v27 = vld [vmem:[%s6068_s27 + $0x9f4] sm:%s6375_s24] }
 0x14c   : > { %1074 = vst [vmem:[%s6071_s28 + $0x1d0] sm:%s6375_s24] %v1073_v29  ;;  %v1199_v28 = vld [vmem:[%s6068_s27 + $0xa10] sm:%s6375_s24] }
 0x14d   : > { %1076 = vst [vmem:[%s6071_s28 + $0x1e0] sm:%s6375_s24] %v1075_v30  ;;  %v1201_v29 = vld [vmem:[%s6068_s27 + $0xa2c] sm:%s6375_s24] }
 0x14e   : > { %1078 = vst [vmem:[%s6071_s28 + $0x1f0] sm:%s6375_s24] %v1077_v31  ;;  %v1203_v30 = vld [vmem:[%s6068_s27 + $0xa48] sm:%s6375_s24] }
 0x14f   : > { %1080 = vst [vmem:[%s6071_s28 + $0x200] sm:%s6375_s24] %v1079_v32  ;;  %v1205_v31 = vld [vmem:[%s6068_s27 + $0xa64] sm:%s6375_s24] }
 0x150   : > { %1082 = vst [vmem:[%s6071_s28 + $0x210] sm:%s6375_s24] %v1081_v33  ;;  %v1207_v32 = vld [vmem:[%s6068_s27 + $0xa80] sm:%s6375_s24] }
 0x151   : > { %1084 = vst [vmem:[%s6071_s28 + $0x220] sm:%s6375_s24] %v1083_v34  ;;  %v1209_v33 = vld [vmem:[%s6068_s27 + $0xa9c] sm:%s6375_s24] }
 0x152   : > { %1086 = vst [vmem:[%s6071_s28 + $0x230] sm:%s6375_s24] %v1085_v35  ;;  %v1211_v34 = vld [vmem:[%s6068_s27 + $0xab8] sm:%s6375_s24] }
 0x153   : > { %1088 = vst [vmem:[%s6071_s28 + $0x240] sm:%s6375_s24] %v1087_v36  ;;  %v1213_v35 = vld [vmem:[%s6068_s27 + $0xad4] sm:%s6375_s24] }
 0x154   : > { %1090 = vst [vmem:[%s6071_s28 + $0x250] sm:%s6375_s24] %v1089_v37  ;;  %v1215_v36 = vld [vmem:[%s6068_s27 + $0xaf0] sm:%s6375_s24] }
 0x155   : > { %1092 = vst [vmem:[%s6071_s28 + $0x260] sm:%s6375_s24] %v1091_v38  ;;  %v1217_v37 = vld [vmem:[%s6068_s27 + $0xb0c] sm:%s6375_s24] }
 0x156   : > { %1094 = vst [vmem:[%s6071_s28 + $0x270] sm:%s6375_s24] %v1093_v39  ;;  %v1219_v38 = vld [vmem:[%s6068_s27 + $0xb28] sm:%s6375_s24] }
 0x157   : > { %1096 = vst [vmem:[%s6071_s28 + $0x280] sm:%s6375_s24] %v1095_v40  ;;  %v1221_v39 = vld [vmem:[%s6068_s27 + $0xb44] sm:%s6375_s24] }
 0x158   : > { %1098 = vst [vmem:[%s6071_s28 + $0x290] sm:%s6375_s24] %v1097_v41  ;;  %v1223_v40 = vld [vmem:[%s6068_s27 + $0xb60] sm:%s6375_s24] }
 0x159   : > { %1100 = vst [vmem:[%s6071_s28 + $0x2a0] sm:%s6375_s24] %v1099_v42  ;;  %v1225_v41 = vld [vmem:[%s6068_s27 + $0xb7c] sm:%s6375_s24] }
 0x15a   : > { %1102 = vst [vmem:[%s6071_s28 + $0x2b0] sm:%s6375_s24] %v1101_v43  ;;  %v1227_v42 = vld [vmem:[%s6068_s27 + $0xb98] sm:%s6375_s24] }
 0x15b   : > { %1104 = vst [vmem:[%s6071_s28 + $0x2c0] sm:%s6375_s24] %v1103_v44  ;;  %v1229_v43 = vld [vmem:[%s6068_s27 + $0xbb4] sm:%s6375_s24] }
 0x15c   : > { %1106 = vst [vmem:[%s6071_s28 + $0x2d0] sm:%s6375_s24] %v1105_v45  ;;  %v1231_v44 = vld [vmem:[%s6068_s27 + $0xbd0] sm:%s6375_s24] }
 0x15d   : > { %1108 = vst [vmem:[%s6071_s28 + $0x2e0] sm:%s6375_s24] %v1107_v46  ;;  %v1233_v45 = vld [vmem:[%s6068_s27 + $0xbec] sm:%s6375_s24] }
 0x15e   : > { %1110 = vst [vmem:[%s6071_s28 + $0x2f0] sm:%s6375_s24] %v1109_v47  ;;  %v1235_v46 = vld [vmem:[%s6068_s27 + $0xc08] sm:%s6375_s24] }
 0x15f   : > { %1112 = vst [vmem:[%s6071_s28 + $0x300] sm:%s6375_s24] %v1111_v48  ;;  %v1237_v47 = vld [vmem:[%s6068_s27 + $0xc24] sm:%s6375_s24] }
 0x160   : > { %1114 = vst [vmem:[%s6071_s28 + $0x310] sm:%s6375_s24] %v1113_v49  ;;  %v1239_v48 = vld [vmem:[%s6068_s27 + $0xc40] sm:%s6375_s24] }
 0x161   : > { %1116 = vst [vmem:[%s6071_s28 + $0x320] sm:%s6375_s24] %v1115_v50  ;;  %v1241_v49 = vld [vmem:[%s6068_s27 + $0xc5c] sm:%s6375_s24] }
 0x162   : > { %1118 = vst [vmem:[%s6071_s28 + $0x330] sm:%s6375_s24] %v1117_v51  ;;  %v1243_v50 = vld [vmem:[%s6068_s27 + $0xc78] sm:%s6375_s24] }
 0x163   : > { %1120 = vst [vmem:[%s6071_s28 + $0x340] sm:%s6375_s24] %v1119_v52  ;;  %v1245_v51 = vld [vmem:[%s6068_s27 + $0xc94] sm:%s6375_s24] }
 0x164   : > { %1122 = vst [vmem:[%s6071_s28 + $0x350] sm:%s6375_s24] %v1121_v53  ;;  %v1247_v52 = vld [vmem:[%s6068_s27 + $0xcb0] sm:%s6375_s24] }
 0x165   : > { %1124 = vst [vmem:[%s6071_s28 + $0x360] sm:%s6375_s24] %v1123_v54  ;;  %v1249_v53 = vld [vmem:[%s6068_s27 + $0xccc] sm:%s6375_s24] }
 0x166   : > { %1126 = vst [vmem:[%s6071_s28 + $0x370] sm:%s6375_s24] %v1125_v55  ;;  %v1251_v54 = vld [vmem:[%s6068_s27 + $0xce8] sm:%s6375_s24] }
 0x167   : > { %1128 = vst [vmem:[%s6071_s28 + $0x380] sm:%s6375_s24] %v1127_v56  ;;  %v1253_v55 = vld [vmem:[%s6068_s27 + $0xd04] sm:%s6375_s24] }
 0x168   : > { %1130 = vst [vmem:[%s6071_s28 + $0x390] sm:%s6375_s24] %v1129_v57  ;;  %v1255_v56 = vld [vmem:[%s6068_s27 + $0xd20] sm:%s6375_s24] }
 0x169   : > { %1132 = vst [vmem:[%s6071_s28 + $0x3a0] sm:%s6375_s24] %v1131_v58  ;;  %v1257_v57 = vld [vmem:[%s6068_s27 + $0xd3c] sm:%s6375_s24] }
 0x16a   : > { %1134 = vst [vmem:[%s6071_s28 + $0x3b0] sm:%s6375_s24] %v1133_v59  ;;  %v1259_v58 = vld [vmem:[%s6068_s27 + $0xd58] sm:%s6375_s24] }
 0x16b   : > { %1136 = vst [vmem:[%s6071_s28 + $0x3c0] sm:%s6375_s24] %v1135_v60  ;;  %v1261_v59 = vld [vmem:[%s6068_s27 + $0xd74] sm:%s6375_s24] }
 0x16c   : > { %1138 = vst [vmem:[%s6071_s28 + $0x3d0] sm:%s6375_s24] %v1137_v61  ;;  %v1263_v60 = vld [vmem:[%s6068_s27 + $0xd90] sm:%s6375_s24] }
 0x16d   : > { %1140 = vst [vmem:[%s6071_s28 + $0x3e0] sm:%s6375_s24] %v1139_v62  ;;  %v1265_v61 = vld [vmem:[%s6068_s27 + $0xdac] sm:%s6375_s24] }
 0x16e   : > { %1142 = vst [vmem:[%s6071_s28 + $0x3f0] sm:%s6375_s24] %v1141_v63  ;;  %v1267_v62 = vld [vmem:[%s6068_s27 + $0xdc8] sm:%s6375_s24] }
 0x16f   : > { %1144 = vst [vmem:[%s6071_s28 + $0x400] sm:%s6375_s24] %v1143_v0  ;;  %v1269_v63 = vld [vmem:[%s6068_s27 + $0xde4] sm:%s6375_s24] }
 0x170   : > { %1146 = vst [vmem:[%s6071_s28 + $0x410] sm:%s6375_s24] %v1145_v1 }
 0x171   : > { %1148 = vst [vmem:[%s6071_s28 + $0x420] sm:%s6375_s24] %v1147_v2 }
 0x172   : > { %1150 = vst [vmem:[%s6071_s28 + $0x430] sm:%s6375_s24] %v1149_v3 }
 0x173   : > { %1152 = vst [vmem:[%s6071_s28 + $0x440] sm:%s6375_s24] %v1151_v4 }
 0x174   : > { %1154 = vst [vmem:[%s6071_s28 + $0x450] sm:%s6375_s24] %v1153_v5 }
 0x175   : > { %1156 = vst [vmem:[%s6071_s28 + $0x460] sm:%s6375_s24] %v1155_v6 }
 0x176   : > { %1158 = vst [vmem:[%s6071_s28 + $0x470] sm:%s6375_s24] %v1157_v7 }
 0x177   : > { %1160 = vst [vmem:[%s6071_s28 + $0x480] sm:%s6375_s24] %v1159_v8 }
 0x178   : > { %1162 = vst [vmem:[%s6071_s28 + $0x490] sm:%s6375_s24] %v1161_v9 }
 0x179   : > { %1164 = vst [vmem:[%s6071_s28 + $0x4a0] sm:%s6375_s24] %v1163_v10 }
 0x17a   : > { %1166 = vst [vmem:[%s6071_s28 + $0x4b0] sm:%s6375_s24] %v1165_v11 }
 0x17b   : > { %1168 = vst [vmem:[%s6071_s28 + $0x4c0] sm:%s6375_s24] %v1167_v12 }
 0x17c   : > { %1170 = vst [vmem:[%s6071_s28 + $0x4d0] sm:%s6375_s24] %v1169_v13 }
 0x17d   : > { %1172 = vst [vmem:[%s6071_s28 + $0x4e0] sm:%s6375_s24] %v1171_v14 }
 0x17e   : > { %1174 = vst [vmem:[%s6071_s28 + $0x4f0] sm:%s6375_s24] %v1173_v15 }
 0x17f   : > { %1176 = vst [vmem:[%s6071_s28 + $0x500] sm:%s6375_s24] %v1175_v16 }
 0x180   : > { %1178 = vst [vmem:[%s6071_s28 + $0x510] sm:%s6375_s24] %v1177_v17 }
 0x181   : > { %1180 = vst [vmem:[%s6071_s28 + $0x520] sm:%s6375_s24] %v1179_v18 }
 0x182   : > { %1182 = vst [vmem:[%s6071_s28 + $0x530] sm:%s6375_s24] %v1181_v19 }
 0x183   : > { %1184 = vst [vmem:[%s6071_s28 + $0x540] sm:%s6375_s24] %v1183_v20 }
 0x184   : > { %1186 = vst [vmem:[%s6071_s28 + $0x550] sm:%s6375_s24] %v1185_v21 }
 0x185   : > { %1188 = vst [vmem:[%s6071_s28 + $0x560] sm:%s6375_s24] %v1187_v22 }
 0x186   : > { %1190 = vst [vmem:[%s6071_s28 + $0x570] sm:%s6375_s24] %v1189_v23 }
 0x187   : > { %1192 = vst [vmem:[%s6071_s28 + $0x580] sm:%s6375_s24] %v1191_v24 }
 0x188   : > { %1194 = vst [vmem:[%s6071_s28 + $0x590] sm:%s6375_s24] %v1193_v25 }
 0x189   : > { %1196 = vst [vmem:[%s6071_s28 + $0x5a0] sm:%s6375_s24] %v1195_v26 }
 0x18a   : > { %1198 = vst [vmem:[%s6071_s28 + $0x5b0] sm:%s6375_s24] %v1197_v27 }
 0x18b   : > { %1200 = vst [vmem:[%s6071_s28 + $0x5c0] sm:%s6375_s24] %v1199_v28 }
 0x18c   : > { %1202 = vst [vmem:[%s6071_s28 + $0x5d0] sm:%s6375_s24] %v1201_v29 }
 0x18d   : > { %1204 = vst [vmem:[%s6071_s28 + $0x5e0] sm:%s6375_s24] %v1203_v30 }
 0x18e   : > { %1206 = vst [vmem:[%s6071_s28 + $0x5f0] sm:%s6375_s24] %v1205_v31 }
 0x18f   : > { %1208 = vst [vmem:[%s6071_s28 + $0x600] sm:%s6375_s24] %v1207_v32 }
 0x190   : > { %1210 = vst [vmem:[%s6071_s28 + $0x610] sm:%s6375_s24] %v1209_v33 }
 0x191   : > { %1212 = vst [vmem:[%s6071_s28 + $0x620] sm:%s6375_s24] %v1211_v34 }
 0x192   : > { %1214 = vst [vmem:[%s6071_s28 + $0x630] sm:%s6375_s24] %v1213_v35 }
 0x193   : > { %1216 = vst [vmem:[%s6071_s28 + $0x640] sm:%s6375_s24] %v1215_v36 }
 0x194   : > { %1218 = vst [vmem:[%s6071_s28 + $0x650] sm:%s6375_s24] %v1217_v37 }
 0x195   : > { %1220 = vst [vmem:[%s6071_s28 + $0x660] sm:%s6375_s24] %v1219_v38 }
 0x196   : > { %1222 = vst [vmem:[%s6071_s28 + $0x670] sm:%s6375_s24] %v1221_v39 }
 0x197   : > { %1224 = vst [vmem:[%s6071_s28 + $0x680] sm:%s6375_s24] %v1223_v40 }
 0x198   : > { %1226 = vst [vmem:[%s6071_s28 + $0x690] sm:%s6375_s24] %v1225_v41 }
 0x199   : > { %1228 = vst [vmem:[%s6071_s28 + $0x6a0] sm:%s6375_s24] %v1227_v42 }
 0x19a   : > { %1230 = vst [vmem:[%s6071_s28 + $0x6b0] sm:%s6375_s24] %v1229_v43 }
 0x19b   : > { %1232 = vst [vmem:[%s6071_s28 + $0x6c0] sm:%s6375_s24] %v1231_v44 }
 0x19c   : > { %1234 = vst [vmem:[%s6071_s28 + $0x6d0] sm:%s6375_s24] %v1233_v45 }
 0x19d   : > { %1236 = vst [vmem:[%s6071_s28 + $0x6e0] sm:%s6375_s24] %v1235_v46 }
 0x19e   : > { %1238 = vst [vmem:[%s6071_s28 + $0x6f0] sm:%s6375_s24] %v1237_v47 }
 0x19f   : > { %1240 = vst [vmem:[%s6071_s28 + $0x700] sm:%s6375_s24] %v1239_v48 }
 0x1a0   : > { %1242 = vst [vmem:[%s6071_s28 + $0x710] sm:%s6375_s24] %v1241_v49 }
 0x1a1   : > { %1244 = vst [vmem:[%s6071_s28 + $0x720] sm:%s6375_s24] %v1243_v50 }
 0x1a2   : > { %1246 = vst [vmem:[%s6071_s28 + $0x730] sm:%s6375_s24] %v1245_v51 }
 0x1a3   : > { %1248 = vst [vmem:[%s6071_s28 + $0x740] sm:%s6375_s24] %v1247_v52 }
 0x1a4   : > { %1250 = vst [vmem:[%s6071_s28 + $0x750] sm:%s6375_s24] %v1249_v53 }
 0x1a5   : > { %1252 = vst [vmem:[%s6071_s28 + $0x760] sm:%s6375_s24] %v1251_v54 }
 0x1a6   : > { %1254 = vst [vmem:[%s6071_s28 + $0x770] sm:%s6375_s24] %v1253_v55 }
 0x1a7   : > { %1256 = vst [vmem:[%s6071_s28 + $0x780] sm:%s6375_s24] %v1255_v56 }
 0x1a8   : > { %1258 = vst [vmem:[%s6071_s28 + $0x790] sm:%s6375_s24] %v1257_v57 }
 0x1a9   : > { %1260 = vst [vmem:[%s6071_s28 + $0x7a0] sm:%s6375_s24] %v1259_v58 }
 0x1aa   : > { %1262 = vst [vmem:[%s6071_s28 + $0x7b0] sm:%s6375_s24] %v1261_v59 }
 0x1ab   : > { %1264 = vst [vmem:[%s6071_s28 + $0x7c0] sm:%s6375_s24] %v1263_v60 }
 0x1ac   : > { %1266 = vst [vmem:[%s6071_s28 + $0x7d0] sm:%s6375_s24] %v1265_v61 }
 0x1ad   : > { %1268 = vst [vmem:[%s6071_s28 + $0x7e0] sm:%s6375_s24] %v1267_v62 }
 0x1ae   : > { %1270 = vst [vmem:[%s6071_s28 + $0x7f0] sm:%s6375_s24] %v1269_v63 }
 0x1af PF: > { %p3882_p3 = scmp.ge.u32.totalorder %s5750_s5, 8 }
 0x1b0   : > { %s5676_s7 = smov (!%p3882_p3), 1  }
 0x1b1   : > { %179 = sbr.rel (%p3882_p3) target bundleno = 567 (0x237), region = 36  ;;  %s180_s25 = sshll.u32 (!%p3882_p3), %s5676_s7, %s5750_s5 }
 0x1b2   : > { %s6891_s26 = sadd.s32 (!%p3882_p3), 4294967295, %s180_s25 }
 0x1b6   : > { %v190_v0 = vld [vmem:[%s5748_s30] sm:%s6891_s26]  ;;  %v194_v2 = vld [vmem:[%s5748_s30 + $0x38] sm:%s6891_s26] }
 0x1b7   : > { %v192_v1 = vld [vmem:[%s5748_s30 + $0x1c] sm:%s6891_s26]  ;;  %191 = vst [vmem:[%s5752_s6] sm:%s6891_s26] %v190_v0 }
 0x1b8   : > { %193 = vst [vmem:[%s5752_s6 + $0x10] sm:%s6891_s26] %v192_v1  ;;  %v196_v3 = vld [vmem:[%s5748_s30 + $0x54] sm:%s6891_s26] }
 0x1b9   : > { %195 = vst [vmem:[%s5752_s6 + $0x20] sm:%s6891_s26] %v194_v2  ;;  %v198_v4 = vld [vmem:[%s5748_s30 + $0x70] sm:%s6891_s26] }
 0x1ba   : > { %197 = vst [vmem:[%s5752_s6 + $0x30] sm:%s6891_s26] %v196_v3  ;;  %v200_v5 = vld [vmem:[%s5748_s30 + $0x8c] sm:%s6891_s26] }
 0x1bb   : > { %199 = vst [vmem:[%s5752_s6 + $0x40] sm:%s6891_s26] %v198_v4  ;;  %v202_v6 = vld [vmem:[%s5748_s30 + $0xa8] sm:%s6891_s26] }
 0x1bc   : > { %201 = vst [vmem:[%s5752_s6 + $0x50] sm:%s6891_s26] %v200_v5  ;;  %v204_v7 = vld [vmem:[%s5748_s30 + $0xc4] sm:%s6891_s26] }
 0x1bd   : > { %203 = vst [vmem:[%s5752_s6 + $0x60] sm:%s6891_s26] %v202_v6  ;;  %v206_v8 = vld [vmem:[%s5748_s30 + $0xe0] sm:%s6891_s26] }
 0x1be   : > { %205 = vst [vmem:[%s5752_s6 + $0x70] sm:%s6891_s26] %v204_v7  ;;  %v208_v9 = vld [vmem:[%s5748_s30 + $0xfc] sm:%s6891_s26] }
 0x1bf   : > { %207 = vst [vmem:[%s5752_s6 + $0x80] sm:%s6891_s26] %v206_v8  ;;  %v210_v10 = vld [vmem:[%s5748_s30 + $0x118] sm:%s6891_s26] }
 0x1c0   : > { %209 = vst [vmem:[%s5752_s6 + $0x90] sm:%s6891_s26] %v208_v9  ;;  %v212_v11 = vld [vmem:[%s5748_s30 + $0x134] sm:%s6891_s26] }
 0x1c1   : > { %211 = vst [vmem:[%s5752_s6 + $0xa0] sm:%s6891_s26] %v210_v10  ;;  %v214_v12 = vld [vmem:[%s5748_s30 + $0x150] sm:%s6891_s26] }
 0x1c2   : > { %213 = vst [vmem:[%s5752_s6 + $0xb0] sm:%s6891_s26] %v212_v11  ;;  %v216_v13 = vld [vmem:[%s5748_s30 + $0x16c] sm:%s6891_s26] }
 0x1c3   : > { %215 = vst [vmem:[%s5752_s6 + $0xc0] sm:%s6891_s26] %v214_v12  ;;  %v218_v14 = vld [vmem:[%s5748_s30 + $0x188] sm:%s6891_s26] }
 0x1c4   : > { %217 = vst [vmem:[%s5752_s6 + $0xd0] sm:%s6891_s26] %v216_v13  ;;  %v220_v15 = vld [vmem:[%s5748_s30 + $0x1a4] sm:%s6891_s26] }
 0x1c5   : > { %219 = vst [vmem:[%s5752_s6 + $0xe0] sm:%s6891_s26] %v218_v14  ;;  %v222_v16 = vld [vmem:[%s5748_s30 + $0x1c0] sm:%s6891_s26] }
 0x1c6   : > { %221 = vst [vmem:[%s5752_s6 + $0xf0] sm:%s6891_s26] %v220_v15  ;;  %v224_v17 = vld [vmem:[%s5748_s30 + $0x1dc] sm:%s6891_s26] }
 0x1c7   : > { %223 = vst [vmem:[%s5752_s6 + $0x100] sm:%s6891_s26] %v222_v16  ;;  %v226_v18 = vld [vmem:[%s5748_s30 + $0x1f8] sm:%s6891_s26] }
 0x1c8   : > { %225 = vst [vmem:[%s5752_s6 + $0x110] sm:%s6891_s26] %v224_v17  ;;  %v228_v19 = vld [vmem:[%s5748_s30 + $0x214] sm:%s6891_s26] }
 0x1c9   : > { %227 = vst [vmem:[%s5752_s6 + $0x120] sm:%s6891_s26] %v226_v18  ;;  %v230_v20 = vld [vmem:[%s5748_s30 + $0x230] sm:%s6891_s26] }
 0x1ca   : > { %229 = vst [vmem:[%s5752_s6 + $0x130] sm:%s6891_s26] %v228_v19  ;;  %v232_v21 = vld [vmem:[%s5748_s30 + $0x24c] sm:%s6891_s26] }
 0x1cb   : > { %231 = vst [vmem:[%s5752_s6 + $0x140] sm:%s6891_s26] %v230_v20  ;;  %v234_v22 = vld [vmem:[%s5748_s30 + $0x268] sm:%s6891_s26] }
 0x1cc   : > { %233 = vst [vmem:[%s5752_s6 + $0x150] sm:%s6891_s26] %v232_v21  ;;  %v236_v23 = vld [vmem:[%s5748_s30 + $0x284] sm:%s6891_s26] }
 0x1cd   : > { %235 = vst [vmem:[%s5752_s6 + $0x160] sm:%s6891_s26] %v234_v22  ;;  %v238_v24 = vld [vmem:[%s5748_s30 + $0x2a0] sm:%s6891_s26] }
 0x1ce   : > { %237 = vst [vmem:[%s5752_s6 + $0x170] sm:%s6891_s26] %v236_v23  ;;  %v240_v25 = vld [vmem:[%s5748_s30 + $0x2bc] sm:%s6891_s26] }
 0x1cf   : > { %239 = vst [vmem:[%s5752_s6 + $0x180] sm:%s6891_s26] %v238_v24  ;;  %v242_v26 = vld [vmem:[%s5748_s30 + $0x2d8] sm:%s6891_s26] }
 0x1d0   : > { %241 = vst [vmem:[%s5752_s6 + $0x190] sm:%s6891_s26] %v240_v25  ;;  %v244_v27 = vld [vmem:[%s5748_s30 + $0x2f4] sm:%s6891_s26] }
 0x1d1   : > { %243 = vst [vmem:[%s5752_s6 + $0x1a0] sm:%s6891_s26] %v242_v26  ;;  %v246_v28 = vld [vmem:[%s5748_s30 + $0x310] sm:%s6891_s26] }
 0x1d2   : > { %245 = vst [vmem:[%s5752_s6 + $0x1b0] sm:%s6891_s26] %v244_v27  ;;  %v248_v29 = vld [vmem:[%s5748_s30 + $0x32c] sm:%s6891_s26] }
 0x1d3   : > { %247 = vst [vmem:[%s5752_s6 + $0x1c0] sm:%s6891_s26] %v246_v28  ;;  %v250_v30 = vld [vmem:[%s5748_s30 + $0x348] sm:%s6891_s26] }
 0x1d4   : > { %249 = vst [vmem:[%s5752_s6 + $0x1d0] sm:%s6891_s26] %v248_v29  ;;  %v252_v31 = vld [vmem:[%s5748_s30 + $0x364] sm:%s6891_s26] }
 0x1d5   : > { %251 = vst [vmem:[%s5752_s6 + $0x1e0] sm:%s6891_s26] %v250_v30  ;;  %v254_v32 = vld [vmem:[%s5748_s30 + $0x380] sm:%s6891_s26] }
 0x1d6   : > { %253 = vst [vmem:[%s5752_s6 + $0x1f0] sm:%s6891_s26] %v252_v31  ;;  %v256_v33 = vld [vmem:[%s5748_s30 + $0x39c] sm:%s6891_s26] }
 0x1d7   : > { %255 = vst [vmem:[%s5752_s6 + $0x200] sm:%s6891_s26] %v254_v32  ;;  %v258_v34 = vld [vmem:[%s5748_s30 + $0x3b8] sm:%s6891_s26] }
 0x1d8   : > { %257 = vst [vmem:[%s5752_s6 + $0x210] sm:%s6891_s26] %v256_v33  ;;  %v260_v35 = vld [vmem:[%s5748_s30 + $0x3d4] sm:%s6891_s26] }
 0x1d9   : > { %259 = vst [vmem:[%s5752_s6 + $0x220] sm:%s6891_s26] %v258_v34  ;;  %v262_v36 = vld [vmem:[%s5748_s30 + $0x3f0] sm:%s6891_s26] }
 0x1da   : > { %261 = vst [vmem:[%s5752_s6 + $0x230] sm:%s6891_s26] %v260_v35  ;;  %v264_v37 = vld [vmem:[%s5748_s30 + $0x40c] sm:%s6891_s26] }
 0x1db   : > { %263 = vst [vmem:[%s5752_s6 + $0x240] sm:%s6891_s26] %v262_v36  ;;  %v266_v38 = vld [vmem:[%s5748_s30 + $0x428] sm:%s6891_s26] }
 0x1dc   : > { %265 = vst [vmem:[%s5752_s6 + $0x250] sm:%s6891_s26] %v264_v37  ;;  %v268_v39 = vld [vmem:[%s5748_s30 + $0x444] sm:%s6891_s26] }
 0x1dd   : > { %267 = vst [vmem:[%s5752_s6 + $0x260] sm:%s6891_s26] %v266_v38  ;;  %v270_v40 = vld [vmem:[%s5748_s30 + $0x460] sm:%s6891_s26] }
 0x1de   : > { %269 = vst [vmem:[%s5752_s6 + $0x270] sm:%s6891_s26] %v268_v39  ;;  %v272_v41 = vld [vmem:[%s5748_s30 + $0x47c] sm:%s6891_s26] }
 0x1df   : > { %271 = vst [vmem:[%s5752_s6 + $0x280] sm:%s6891_s26] %v270_v40  ;;  %v274_v42 = vld [vmem:[%s5748_s30 + $0x498] sm:%s6891_s26] }
 0x1e0   : > { %273 = vst [vmem:[%s5752_s6 + $0x290] sm:%s6891_s26] %v272_v41  ;;  %v276_v43 = vld [vmem:[%s5748_s30 + $0x4b4] sm:%s6891_s26] }
 0x1e1   : > { %275 = vst [vmem:[%s5752_s6 + $0x2a0] sm:%s6891_s26] %v274_v42  ;;  %v278_v44 = vld [vmem:[%s5748_s30 + $0x4d0] sm:%s6891_s26] }
 0x1e2   : > { %277 = vst [vmem:[%s5752_s6 + $0x2b0] sm:%s6891_s26] %v276_v43  ;;  %v280_v45 = vld [vmem:[%s5748_s30 + $0x4ec] sm:%s6891_s26] }
 0x1e3   : > { %279 = vst [vmem:[%s5752_s6 + $0x2c0] sm:%s6891_s26] %v278_v44  ;;  %v282_v46 = vld [vmem:[%s5748_s30 + $0x508] sm:%s6891_s26] }
 0x1e4   : > { %281 = vst [vmem:[%s5752_s6 + $0x2d0] sm:%s6891_s26] %v280_v45  ;;  %v284_v47 = vld [vmem:[%s5748_s30 + $0x524] sm:%s6891_s26] }
 0x1e5   : > { %283 = vst [vmem:[%s5752_s6 + $0x2e0] sm:%s6891_s26] %v282_v46  ;;  %v286_v48 = vld [vmem:[%s5748_s30 + $0x540] sm:%s6891_s26] }
 0x1e6   : > { %285 = vst [vmem:[%s5752_s6 + $0x2f0] sm:%s6891_s26] %v284_v47  ;;  %v288_v49 = vld [vmem:[%s5748_s30 + $0x55c] sm:%s6891_s26] }
 0x1e7   : > { %287 = vst [vmem:[%s5752_s6 + $0x300] sm:%s6891_s26] %v286_v48  ;;  %v290_v50 = vld [vmem:[%s5748_s30 + $0x578] sm:%s6891_s26] }
 0x1e8   : > { %289 = vst [vmem:[%s5752_s6 + $0x310] sm:%s6891_s26] %v288_v49  ;;  %v292_v51 = vld [vmem:[%s5748_s30 + $0x594] sm:%s6891_s26] }
 0x1e9   : > { %291 = vst [vmem:[%s5752_s6 + $0x320] sm:%s6891_s26] %v290_v50  ;;  %v294_v52 = vld [vmem:[%s5748_s30 + $0x5b0] sm:%s6891_s26] }
 0x1ea   : > { %293 = vst [vmem:[%s5752_s6 + $0x330] sm:%s6891_s26] %v292_v51  ;;  %v296_v53 = vld [vmem:[%s5748_s30 + $0x5cc] sm:%s6891_s26] }
 0x1eb   : > { %295 = vst [vmem:[%s5752_s6 + $0x340] sm:%s6891_s26] %v294_v52  ;;  %v298_v54 = vld [vmem:[%s5748_s30 + $0x5e8] sm:%s6891_s26] }
 0x1ec   : > { %297 = vst [vmem:[%s5752_s6 + $0x350] sm:%s6891_s26] %v296_v53  ;;  %v300_v55 = vld [vmem:[%s5748_s30 + $0x604] sm:%s6891_s26] }
 0x1ed   : > { %299 = vst [vmem:[%s5752_s6 + $0x360] sm:%s6891_s26] %v298_v54  ;;  %v302_v56 = vld [vmem:[%s5748_s30 + $0x620] sm:%s6891_s26] }
 0x1ee   : > { %301 = vst [vmem:[%s5752_s6 + $0x370] sm:%s6891_s26] %v300_v55  ;;  %v304_v57 = vld [vmem:[%s5748_s30 + $0x63c] sm:%s6891_s26] }
 0x1ef   : > { %303 = vst [vmem:[%s5752_s6 + $0x380] sm:%s6891_s26] %v302_v56  ;;  %v306_v58 = vld [vmem:[%s5748_s30 + $0x658] sm:%s6891_s26] }
 0x1f0   : > { %305 = vst [vmem:[%s5752_s6 + $0x390] sm:%s6891_s26] %v304_v57  ;;  %v308_v59 = vld [vmem:[%s5748_s30 + $0x674] sm:%s6891_s26] }
 0x1f1   : > { %307 = vst [vmem:[%s5752_s6 + $0x3a0] sm:%s6891_s26] %v306_v58  ;;  %v310_v60 = vld [vmem:[%s5748_s30 + $0x690] sm:%s6891_s26] }
 0x1f2   : > { %309 = vst [vmem:[%s5752_s6 + $0x3b0] sm:%s6891_s26] %v308_v59  ;;  %v312_v61 = vld [vmem:[%s5748_s30 + $0x6ac] sm:%s6891_s26] }
 0x1f3   : > { %311 = vst [vmem:[%s5752_s6 + $0x3c0] sm:%s6891_s26] %v310_v60  ;;  %v314_v62 = vld [vmem:[%s5748_s30 + $0x6c8] sm:%s6891_s26] }
 0x1f4   : > { %313 = vst [vmem:[%s5752_s6 + $0x3d0] sm:%s6891_s26] %v312_v61  ;;  %v316_v63 = vld [vmem:[%s5748_s30 + $0x6e4] sm:%s6891_s26] }
 0x1f5   : > { %315 = vst [vmem:[%s5752_s6 + $0x3e0] sm:%s6891_s26] %v314_v62  ;;  %v318_v0 = vld [vmem:[%s5748_s30 + $0x700] sm:%s6891_s26] }
 0x1f6   : > { %317 = vst [vmem:[%s5752_s6 + $0x3f0] sm:%s6891_s26] %v316_v63  ;;  %v320_v1 = vld [vmem:[%s5748_s30 + $0x71c] sm:%s6891_s26] }
 0x1f7   : > { %319 = vst [vmem:[%s5752_s6 + $0x400] sm:%s6891_s26] %v318_v0  ;;  %v322_v2 = vld [vmem:[%s5748_s30 + $0x738] sm:%s6891_s26] }
 0x1f8   : > { %321 = vst [vmem:[%s5752_s6 + $0x410] sm:%s6891_s26] %v320_v1  ;;  %v324_v3 = vld [vmem:[%s5748_s30 + $0x754] sm:%s6891_s26] }
 0x1f9   : > { %323 = vst [vmem:[%s5752_s6 + $0x420] sm:%s6891_s26] %v322_v2  ;;  %v326_v4 = vld [vmem:[%s5748_s30 + $0x770] sm:%s6891_s26] }
 0x1fa   : > { %325 = vst [vmem:[%s5752_s6 + $0x430] sm:%s6891_s26] %v324_v3  ;;  %v328_v5 = vld [vmem:[%s5748_s30 + $0x78c] sm:%s6891_s26] }
 0x1fb   : > { %327 = vst [vmem:[%s5752_s6 + $0x440] sm:%s6891_s26] %v326_v4  ;;  %v330_v6 = vld [vmem:[%s5748_s30 + $0x7a8] sm:%s6891_s26] }
 0x1fc   : > { %329 = vst [vmem:[%s5752_s6 + $0x450] sm:%s6891_s26] %v328_v5  ;;  %v332_v7 = vld [vmem:[%s5748_s30 + $0x7c4] sm:%s6891_s26] }
 0x1fd   : > { %331 = vst [vmem:[%s5752_s6 + $0x460] sm:%s6891_s26] %v330_v6  ;;  %v334_v8 = vld [vmem:[%s5748_s30 + $0x7e0] sm:%s6891_s26] }
 0x1fe   : > { %333 = vst [vmem:[%s5752_s6 + $0x470] sm:%s6891_s26] %v332_v7  ;;  %v336_v9 = vld [vmem:[%s5748_s30 + $0x7fc] sm:%s6891_s26] }
 0x1ff   : > { %335 = vst [vmem:[%s5752_s6 + $0x480] sm:%s6891_s26] %v334_v8  ;;  %v338_v10 = vld [vmem:[%s5748_s30 + $0x818] sm:%s6891_s26] }
 0x200   : > { %337 = vst [vmem:[%s5752_s6 + $0x490] sm:%s6891_s26] %v336_v9  ;;  %v340_v11 = vld [vmem:[%s5748_s30 + $0x834] sm:%s6891_s26] }
 0x201   : > { %339 = vst [vmem:[%s5752_s6 + $0x4a0] sm:%s6891_s26] %v338_v10  ;;  %v342_v12 = vld [vmem:[%s5748_s30 + $0x850] sm:%s6891_s26] }
 0x202   : > { %341 = vst [vmem:[%s5752_s6 + $0x4b0] sm:%s6891_s26] %v340_v11  ;;  %v344_v13 = vld [vmem:[%s5748_s30 + $0x86c] sm:%s6891_s26] }
 0x203   : > { %343 = vst [vmem:[%s5752_s6 + $0x4c0] sm:%s6891_s26] %v342_v12  ;;  %v346_v14 = vld [vmem:[%s5748_s30 + $0x888] sm:%s6891_s26] }
 0x204   : > { %345 = vst [vmem:[%s5752_s6 + $0x4d0] sm:%s6891_s26] %v344_v13  ;;  %v348_v15 = vld [vmem:[%s5748_s30 + $0x8a4] sm:%s6891_s26] }
 0x205   : > { %347 = vst [vmem:[%s5752_s6 + $0x4e0] sm:%s6891_s26] %v346_v14  ;;  %v350_v16 = vld [vmem:[%s5748_s30 + $0x8c0] sm:%s6891_s26] }
 0x206   : > { %349 = vst [vmem:[%s5752_s6 + $0x4f0] sm:%s6891_s26] %v348_v15  ;;  %v352_v17 = vld [vmem:[%s5748_s30 + $0x8dc] sm:%s6891_s26] }
 0x207   : > { %351 = vst [vmem:[%s5752_s6 + $0x500] sm:%s6891_s26] %v350_v16  ;;  %v354_v18 = vld [vmem:[%s5748_s30 + $0x8f8] sm:%s6891_s26] }
 0x208   : > { %353 = vst [vmem:[%s5752_s6 + $0x510] sm:%s6891_s26] %v352_v17  ;;  %v356_v19 = vld [vmem:[%s5748_s30 + $0x914] sm:%s6891_s26] }
 0x209   : > { %355 = vst [vmem:[%s5752_s6 + $0x520] sm:%s6891_s26] %v354_v18  ;;  %v358_v20 = vld [vmem:[%s5748_s30 + $0x930] sm:%s6891_s26] }
 0x20a   : > { %357 = vst [vmem:[%s5752_s6 + $0x530] sm:%s6891_s26] %v356_v19  ;;  %v360_v21 = vld [vmem:[%s5748_s30 + $0x94c] sm:%s6891_s26] }
 0x20b   : > { %359 = vst [vmem:[%s5752_s6 + $0x540] sm:%s6891_s26] %v358_v20  ;;  %v362_v22 = vld [vmem:[%s5748_s30 + $0x968] sm:%s6891_s26] }
 0x20c   : > { %361 = vst [vmem:[%s5752_s6 + $0x550] sm:%s6891_s26] %v360_v21  ;;  %v364_v23 = vld [vmem:[%s5748_s30 + $0x984] sm:%s6891_s26] }
 0x20d   : > { %363 = vst [vmem:[%s5752_s6 + $0x560] sm:%s6891_s26] %v362_v22  ;;  %v366_v24 = vld [vmem:[%s5748_s30 + $0x9a0] sm:%s6891_s26] }
 0x20e   : > { %365 = vst [vmem:[%s5752_s6 + $0x570] sm:%s6891_s26] %v364_v23  ;;  %v368_v25 = vld [vmem:[%s5748_s30 + $0x9bc] sm:%s6891_s26] }
 0x20f   : > { %367 = vst [vmem:[%s5752_s6 + $0x580] sm:%s6891_s26] %v366_v24  ;;  %v370_v26 = vld [vmem:[%s5748_s30 + $0x9d8] sm:%s6891_s26] }
 0x210   : > { %369 = vst [vmem:[%s5752_s6 + $0x590] sm:%s6891_s26] %v368_v25  ;;  %v372_v27 = vld [vmem:[%s5748_s30 + $0x9f4] sm:%s6891_s26] }
 0x211   : > { %371 = vst [vmem:[%s5752_s6 + $0x5a0] sm:%s6891_s26] %v370_v26  ;;  %v374_v28 = vld [vmem:[%s5748_s30 + $0xa10] sm:%s6891_s26] }
 0x212   : > { %373 = vst [vmem:[%s5752_s6 + $0x5b0] sm:%s6891_s26] %v372_v27  ;;  %v376_v29 = vld [vmem:[%s5748_s30 + $0xa2c] sm:%s6891_s26] }
 0x213   : > { %375 = vst [vmem:[%s5752_s6 + $0x5c0] sm:%s6891_s26] %v374_v28  ;;  %v378_v30 = vld [vmem:[%s5748_s30 + $0xa48] sm:%s6891_s26] }
 0x214   : > { %377 = vst [vmem:[%s5752_s6 + $0x5d0] sm:%s6891_s26] %v376_v29  ;;  %v380_v31 = vld [vmem:[%s5748_s30 + $0xa64] sm:%s6891_s26] }
 0x215   : > { %379 = vst [vmem:[%s5752_s6 + $0x5e0] sm:%s6891_s26] %v378_v30  ;;  %v382_v32 = vld [vmem:[%s5748_s30 + $0xa80] sm:%s6891_s26] }
 0x216   : > { %381 = vst [vmem:[%s5752_s6 + $0x5f0] sm:%s6891_s26] %v380_v31  ;;  %v384_v33 = vld [vmem:[%s5748_s30 + $0xa9c] sm:%s6891_s26] }
 0x217   : > { %383 = vst [vmem:[%s5752_s6 + $0x600] sm:%s6891_s26] %v382_v32  ;;  %v386_v34 = vld [vmem:[%s5748_s30 + $0xab8] sm:%s6891_s26] }
 0x218   : > { %385 = vst [vmem:[%s5752_s6 + $0x610] sm:%s6891_s26] %v384_v33  ;;  %v388_v35 = vld [vmem:[%s5748_s30 + $0xad4] sm:%s6891_s26] }
 0x219   : > { %387 = vst [vmem:[%s5752_s6 + $0x620] sm:%s6891_s26] %v386_v34  ;;  %v390_v36 = vld [vmem:[%s5748_s30 + $0xaf0] sm:%s6891_s26] }
 0x21a   : > { %389 = vst [vmem:[%s5752_s6 + $0x630] sm:%s6891_s26] %v388_v35  ;;  %v392_v37 = vld [vmem:[%s5748_s30 + $0xb0c] sm:%s6891_s26] }
 0x21b   : > { %391 = vst [vmem:[%s5752_s6 + $0x640] sm:%s6891_s26] %v390_v36  ;;  %v394_v38 = vld [vmem:[%s5748_s30 + $0xb28] sm:%s6891_s26] }
 0x21c   : > { %393 = vst [vmem:[%s5752_s6 + $0x650] sm:%s6891_s26] %v392_v37  ;;  %v396_v39 = vld [vmem:[%s5748_s30 + $0xb44] sm:%s6891_s26] }
 0x21d   : > { %395 = vst [vmem:[%s5752_s6 + $0x660] sm:%s6891_s26] %v394_v38  ;;  %v398_v40 = vld [vmem:[%s5748_s30 + $0xb60] sm:%s6891_s26] }
 0x21e   : > { %397 = vst [vmem:[%s5752_s6 + $0x670] sm:%s6891_s26] %v396_v39  ;;  %v400_v41 = vld [vmem:[%s5748_s30 + $0xb7c] sm:%s6891_s26] }
 0x21f   : > { %399 = vst [vmem:[%s5752_s6 + $0x680] sm:%s6891_s26] %v398_v40  ;;  %v402_v42 = vld [vmem:[%s5748_s30 + $0xb98] sm:%s6891_s26] }
 0x220   : > { %401 = vst [vmem:[%s5752_s6 + $0x690] sm:%s6891_s26] %v400_v41  ;;  %v404_v43 = vld [vmem:[%s5748_s30 + $0xbb4] sm:%s6891_s26] }
 0x221   : > { %403 = vst [vmem:[%s5752_s6 + $0x6a0] sm:%s6891_s26] %v402_v42  ;;  %v406_v44 = vld [vmem:[%s5748_s30 + $0xbd0] sm:%s6891_s26] }
 0x222   : > { %405 = vst [vmem:[%s5752_s6 + $0x6b0] sm:%s6891_s26] %v404_v43  ;;  %v408_v45 = vld [vmem:[%s5748_s30 + $0xbec] sm:%s6891_s26] }
 0x223   : > { %407 = vst [vmem:[%s5752_s6 + $0x6c0] sm:%s6891_s26] %v406_v44  ;;  %v410_v46 = vld [vmem:[%s5748_s30 + $0xc08] sm:%s6891_s26] }
 0x224   : > { %409 = vst [vmem:[%s5752_s6 + $0x6d0] sm:%s6891_s26] %v408_v45  ;;  %v412_v47 = vld [vmem:[%s5748_s30 + $0xc24] sm:%s6891_s26] }
 0x225   : > { %411 = vst [vmem:[%s5752_s6 + $0x6e0] sm:%s6891_s26] %v410_v46  ;;  %v414_v48 = vld [vmem:[%s5748_s30 + $0xc40] sm:%s6891_s26] }
 0x226   : > { %413 = vst [vmem:[%s5752_s6 + $0x6f0] sm:%s6891_s26] %v412_v47  ;;  %v416_v49 = vld [vmem:[%s5748_s30 + $0xc5c] sm:%s6891_s26] }
 0x227   : > { %415 = vst [vmem:[%s5752_s6 + $0x700] sm:%s6891_s26] %v414_v48  ;;  %v418_v50 = vld [vmem:[%s5748_s30 + $0xc78] sm:%s6891_s26] }
 0x228   : > { %417 = vst [vmem:[%s5752_s6 + $0x710] sm:%s6891_s26] %v416_v49  ;;  %v420_v51 = vld [vmem:[%s5748_s30 + $0xc94] sm:%s6891_s26] }
 0x229   : > { %419 = vst [vmem:[%s5752_s6 + $0x720] sm:%s6891_s26] %v418_v50  ;;  %v422_v52 = vld [vmem:[%s5748_s30 + $0xcb0] sm:%s6891_s26] }
 0x22a   : > { %421 = vst [vmem:[%s5752_s6 + $0x730] sm:%s6891_s26] %v420_v51  ;;  %v424_v53 = vld [vmem:[%s5748_s30 + $0xccc] sm:%s6891_s26] }
 0x22b   : > { %423 = vst [vmem:[%s5752_s6 + $0x740] sm:%s6891_s26] %v422_v52  ;;  %v426_v54 = vld [vmem:[%s5748_s30 + $0xce8] sm:%s6891_s26] }
 0x22c   : > { %425 = vst [vmem:[%s5752_s6 + $0x750] sm:%s6891_s26] %v424_v53  ;;  %v428_v55 = vld [vmem:[%s5748_s30 + $0xd04] sm:%s6891_s26] }
 0x22d   : > { %427 = vst [vmem:[%s5752_s6 + $0x760] sm:%s6891_s26] %v426_v54  ;;  %v430_v56 = vld [vmem:[%s5748_s30 + $0xd20] sm:%s6891_s26] }
 0x22e   : > { %429 = vst [vmem:[%s5752_s6 + $0x770] sm:%s6891_s26] %v428_v55  ;;  %v432_v57 = vld [vmem:[%s5748_s30 + $0xd3c] sm:%s6891_s26] }
 0x22f   : > { %431 = vst [vmem:[%s5752_s6 + $0x780] sm:%s6891_s26] %v430_v56  ;;  %v434_v58 = vld [vmem:[%s5748_s30 + $0xd58] sm:%s6891_s26] }
 0x230   : > { %433 = vst [vmem:[%s5752_s6 + $0x790] sm:%s6891_s26] %v432_v57  ;;  %v436_v59 = vld [vmem:[%s5748_s30 + $0xd74] sm:%s6891_s26] }
 0x231   : > { %435 = vst [vmem:[%s5752_s6 + $0x7a0] sm:%s6891_s26] %v434_v58  ;;  %v438_v60 = vld [vmem:[%s5748_s30 + $0xd90] sm:%s6891_s26] }
 0x232   : > { %437 = vst [vmem:[%s5752_s6 + $0x7b0] sm:%s6891_s26] %v436_v59  ;;  %v440_v61 = vld [vmem:[%s5748_s30 + $0xdac] sm:%s6891_s26] }
 0x233   : > { %439 = vst [vmem:[%s5752_s6 + $0x7c0] sm:%s6891_s26] %v438_v60  ;;  %v442_v62 = vld [vmem:[%s5748_s30 + $0xdc8] sm:%s6891_s26] }
 0x234   : > { %441 = vst [vmem:[%s5752_s6 + $0x7d0] sm:%s6891_s26] %v440_v61  ;;  %v444_v63 = vld [vmem:[%s5748_s30 + $0xde4] sm:%s6891_s26] }
 0x235   : > { %443 = vst [vmem:[%s5752_s6 + $0x7e0] sm:%s6891_s26] %v442_v62 }
 0x236   : > { %445 = vst [vmem:[%s5752_s6 + $0x7f0] sm:%s6891_s26] %v444_v63 }
 0x237 PF: > { %p3884_p4 = scmp.ge.s32.totalorder %s5577_s16, 1  ;;  %p1287_p5 = scmp.lt.s32.totalorder %s5577_s16, 3 }
 0x239   : > { %p1288_p7 = pnand %p3884_p4, %p1287_p5 }
 0x23a   : > { %s1294_s5 = sand.u32 (!%p1288_p7), 1, %s5561_s12   ;;  %s7779_s8 = sshll.u32 (!%p1288_p7), %s5569_s14, 2 }
 0x23b   : > { %1291 = sbr.rel (%p1288_p7) target bundleno = 1128 (0x468), region = 80  ;;  %s3885_s27 = sshll.u32 (!%p1288_p7), %s1294_s5, 11 }
 0x23c   : > { %s7410_s28 = scalar_lea.vmem (!%p1288_p7), [#allocation2], %s3885_s27  ;;  %p1342_p8 = scmp.lt.s32.totalorder (!%p1288_p7), %s7779_s8, 6 }
 0x23d   : > { %s3886_s19 = sshll.u32 (!%p1288_p7), %s1294_s5, 3 }
 0x23e   : > { %s8002_s20 = scalar_lea.vmem (!%p1288_p7), [#allocation3], %s3886_s19  }
 0x240   : > { %v4002_v0 = vld [vmem:[%s7410_s28 + $0xe0] sm:$0xf]  ;;  %v4974_v1 = vld [vmem:[%s7410_s28 + $0xec] sm:$0xf0]  ;;  %s7805_s9 = scalar_select %p1342_p8, %s7779_s8, 6  ;;  %vm3354_vm0 = vcmask 1041408  }
 0x241   : > { %v4130_v2 = vld [vmem:[%s7410_s28 + $0x1e0] sm:$0xf]  ;;  %v4003_v3 = vor.u32 %v4974_v1, %v4002_v0  ;;  %v5006_v4 = vld [vmem:[%s7410_s28 + $0x1ec] sm:$0xf0]  ;;  %vm3356_vm1 = vcmask 1045508   ;;  %vm3358_vm2 = vcmask 1043456  }
 0x242   : > { %v4258_v5 = vld [vmem:[%s7410_s28 + $0x2e0] sm:$0xf]  ;;  %v5038_v6 = vld [vmem:[%s7410_s28 + $0x2ec] sm:$0xf0]  ;;  %v4131_v7 = vor.u32 %v5006_v4, %v4130_v2  ;;  %s1344_s18 = scalar_lea.vmem %s8307_s2, %s7805_s9  ;;  %s3370_s12 = ssub.s32 (%p5734_p6), 7, %s7779_s8 }
 0x243   : > { %v4259_v8 = vor.u32 %v5038_v6, %v4258_v5  ;;  %v4386_v9 = vld [vmem:[%s7410_s28 + $0x3e0] sm:$0xf]  ;;  %v5070_v10 = vld [vmem:[%s7410_s28 + $0x3ec] sm:$0xf0]  ;;  %2931 = vmatpush.bf16.msra.mxu0 %v4003_v3  ;;  %s5200_s23 = sshll.u32 (%p5734_p6), %s5569_s14, 3  ;;  %p3371_p9 = scmp.lt.s32.totalorder (%p5734_p6), %s3370_s12, 4 }
 0x244   : > { %v3986_v11 = vld [vmem:[%s7410_s28 + $0xc0] sm:$0xf]  ;;  %v4387_v12 = vor.u32 %v5070_v10, %v4386_v9  ;;  %v4970_v13 = vld [vmem:[%s7410_s28 + $0xcc] sm:$0xf0]  ;;  %2944 = vmatpush.bf16.msra.mxu1 %v4131_v7  ;;  %s8012_s25 = scalar_lea.vmem (%p5734_p6), %s8308_s3, %s5200_s23  }
 0x245   : > { %v4114_v14 = vld [vmem:[%s7410_s28 + $0x1c0] sm:$0xf]  ;;  %v5002_v15 = vld [vmem:[%s7410_s28 + $0x1cc] sm:$0xf0]  ;;  %2957 = vmatpush.bf16.msra.mxu2 %v4259_v8  ;;  %v3987_v16 = vor.u32 %v4970_v13, %v3986_v11 }
 0x246   : > { %v4115_v17 = vor.u32 %v5002_v15, %v4114_v14  ;;  %v4242_v18 = vld [vmem:[%s7410_s28 + $0x2c0] sm:$0xf]  ;;  %v5034_v19 = vld [vmem:[%s7410_s28 + $0x2cc] sm:$0xf0]  ;;  %2970 = vmatpush.bf16.msra.mxu3 %v4387_v12 }
 0x247   : > { %v4370_v20 = vld [vmem:[%s7410_s28 + $0x3c0] sm:$0xf]  ;;  %v4243_v21 = vor.u32 %v5034_v19, %v4242_v18  ;;  %v5066_v22 = vld [vmem:[%s7410_s28 + $0x3cc] sm:$0xf0]  ;;  %2932 = vmatpush.bf16.msra.mxu0 %v3987_v16 }
 0x248   : > { %v3970_v23 = vld [vmem:[%s7410_s28 + $0xa0] sm:$0xf]  ;;  %v4966_v24 = vld [vmem:[%s7410_s28 + $0xac] sm:$0xf0]  ;;  %v4371_v25 = vor.u32 %v5066_v22, %v4370_v20  ;;  %2945 = vmatpush.bf16.msra.mxu1 %v4115_v17 }
 0x249   : > { %v4098_v26 = vld [vmem:[%s7410_s28 + $0x1a0] sm:$0xf]  ;;  %v4998_v27 = vld [vmem:[%s7410_s28 + $0x1ac] sm:$0xf0]  ;;  %v3971_v29 = vor.u32 %v4966_v24, %v3970_v23  ;;  %2958 = vmatpush.bf16.msra.mxu2 %v4243_v21 }
 0x24a   : > { %v4226_v28 = vld [vmem:[%s7410_s28 + $0x2a0] sm:$0xf]  ;;  %v5030_v30 = vld [vmem:[%s7410_s28 + $0x2ac] sm:$0xf0]  ;;  %v4099_v33 = vor.u32 %v4998_v27, %v4098_v26  ;;  %2971 = vmatpush.bf16.msra.mxu3 %v4371_v25 }
 0x24b   : > { %v4354_v31 = vld [vmem:[%s7410_s28 + $0x3a0] sm:$0xf]  ;;  %v5062_v32 = vld [vmem:[%s7410_s28 + $0x3ac] sm:$0xf0]  ;;  %v4227_v34 = vor.u32 %v5030_v30, %v4226_v28  ;;  %2933 = vmatpush.bf16.msra.mxu0 %v3971_v29 }
 0x24c   : > { %v3954_v35 = vld [vmem:[%s7410_s28 + $0x80] sm:$0xf]  ;;  %v4962_v36 = vld [vmem:[%s7410_s28 + $0x8c] sm:$0xf0]  ;;  %v4355_v38 = vor.u32 %v5062_v32, %v4354_v31  ;;  %2946 = vmatpush.bf16.msra.mxu1 %v4099_v33 }
 0x24d   : > { %v4082_v37 = vld [vmem:[%s7410_s28 + $0x180] sm:$0xf]  ;;  %v4994_v39 = vld [vmem:[%s7410_s28 + $0x18c] sm:$0xf0]  ;;  %v3955_v44 = vor.u32 %v4962_v36, %v3954_v35  ;;  %2959 = vmatpush.bf16.msra.mxu2 %v4227_v34 }
 0x24e   : > { %v4210_v40 = vld [vmem:[%s7410_s28 + $0x280] sm:$0xf]  ;;  %v5026_v41 = vld [vmem:[%s7410_s28 + $0x28c] sm:$0xf0]  ;;  %v4083_v45 = vor.u32 %v4994_v39, %v4082_v37  ;;  %2972 = vmatpush.bf16.msra.mxu3 %v4355_v38 }
 0x24f   : > { %v4338_v42 = vld [vmem:[%s7410_s28 + $0x380] sm:$0xf]  ;;  %v5058_v43 = vld [vmem:[%s7410_s28 + $0x38c] sm:$0xf0]  ;;  %v4211_v46 = vor.u32 %v5026_v41, %v4210_v40  ;;  %2934 = vmatpush.bf16.msra.mxu0 %v3955_v44 }
 0x250   : > { %v3938_v47 = vld [vmem:[%s7410_s28 + $0x60] sm:$0xf]  ;;  %v4958_v48 = vld [vmem:[%s7410_s28 + $0x6c] sm:$0xf0]  ;;  %v4339_v50 = vor.u32 %v5058_v43, %v4338_v42  ;;  %2947 = vmatpush.bf16.msra.mxu1 %v4083_v45 }
 0x251   : > { %v4066_v49 = vld [vmem:[%s7410_s28 + $0x160] sm:$0xf]  ;;  %v4990_v51 = vld [vmem:[%s7410_s28 + $0x16c] sm:$0xf0]  ;;  %v3939_v56 = vor.u32 %v4958_v48, %v3938_v47  ;;  %2960 = vmatpush.bf16.msra.mxu2 %v4211_v46 }
 0x252   : > { %v4194_v52 = vld [vmem:[%s7410_s28 + $0x260] sm:$0xf]  ;;  %v5022_v53 = vld [vmem:[%s7410_s28 + $0x26c] sm:$0xf0]  ;;  %v4067_v57 = vor.u32 %v4990_v51, %v4066_v49  ;;  %2973 = vmatpush.bf16.msra.mxu3 %v4339_v50 }
 0x253   : > { %v4322_v54 = vld [vmem:[%s7410_s28 + $0x360] sm:$0xf]  ;;  %v5054_v55 = vld [vmem:[%s7410_s28 + $0x36c] sm:$0xf0]  ;;  %v4195_v58 = vor.u32 %v5022_v53, %v4194_v52  ;;  %2935 = vmatpush.bf16.msra.mxu0 %v3939_v56 }
 0x254   : > { %v3922_v59 = vld [vmem:[%s7410_s28 + $0x40] sm:$0xf]  ;;  %v4954_v60 = vld [vmem:[%s7410_s28 + $0x4c] sm:$0xf0]  ;;  %v4323_v62 = vor.u32 %v5054_v55, %v4322_v54  ;;  %2948 = vmatpush.bf16.msra.mxu1 %v4067_v57 }
 0x255   : > { %v4050_v61 = vld [vmem:[%s7410_s28 + $0x140] sm:$0xf]  ;;  %v4986_v63 = vld [vmem:[%s7410_s28 + $0x14c] sm:$0xf0]  ;;  %v3923_v4 = vor.u32 %v4954_v60, %v3922_v59  ;;  %2961 = vmatpush.bf16.msra.mxu2 %v4195_v58  ;;  %v1354_v59 = vld [vmem:[%s8305_s0] sm:$0xff] }
 0x256   : > { %v4178_v0 = vld [vmem:[%s7410_s28 + $0x240] sm:$0xf]  ;;  %v5018_v1 = vld [vmem:[%s7410_s28 + $0x24c] sm:$0xf0]  ;;  %v4051_v5 = vor.u32 %v4986_v63, %v4050_v61  ;;  %2974 = vmatpush.bf16.msra.mxu3 %v4323_v62  ;;  %1358 = vst [vmem:[#allocation1] ss:$4 sm:$0xff] %v1354_v59 }
 0x257   : > { %v4306_v2 = vld [vmem:[%s7410_s28 + $0x340] sm:$0xf]  ;;  %v5050_v3 = vld [vmem:[%s7410_s28 + $0x34c] sm:$0xf0]  ;;  %v4179_v6 = vor.u32 %v5018_v1, %v4178_v0  ;;  %2936 = vmatpush.bf16.msra.mxu0 %v3923_v4 }
 0x258   : > { %v3906_v7 = vld [vmem:[%s7410_s28 + $0x20] sm:$0xf]  ;;  %v4950_v8 = vld [vmem:[%s7410_s28 + $0x2c] sm:$0xf0]  ;;  %v4307_v10 = vor.u32 %v5050_v3, %v4306_v2  ;;  %2949 = vmatpush.bf16.msra.mxu1 %v4051_v5 }
 0x259   : > { %v4034_v9 = vld [vmem:[%s7410_s28 + $0x120] sm:$0xf]  ;;  %v4982_v11 = vld [vmem:[%s7410_s28 + $0x12c] sm:$0xf0]  ;;  %v3907_v16 = vor.u32 %v4950_v8, %v3906_v7  ;;  %2962 = vmatpush.bf16.msra.mxu2 %v4179_v6 }
 0x25a   : > { %v4162_v12 = vld [vmem:[%s7410_s28 + $0x220] sm:$0xf]  ;;  %v5014_v13 = vld [vmem:[%s7410_s28 + $0x22c] sm:$0xf0]  ;;  %v4035_v19 = vor.u32 %v4982_v11, %v4034_v9  ;;  %2975 = vmatpush.bf16.msra.mxu3 %v4307_v10 }
 0x25b   : > { %v4290_v14 = vld [vmem:[%s7410_s28 + $0x320] sm:$0xf]  ;;  %v5046_v15 = vld [vmem:[%s7410_s28 + $0x32c] sm:$0xf0]  ;;  %v4163_v20 = vor.u32 %v5014_v13, %v4162_v12  ;;  %2937 = vmatpush.bf16.msra.mxu0 %v3907_v16 }
 0x25c   : > { %v3890_v17 = vld [vmem:[%s7410_s28] sm:$0xf]  ;;  %v4946_v18 = vld [vmem:[%s7410_s28 + $0xc] sm:$0xf0]  ;;  %v4291_v24 = vor.u32 %v5046_v15, %v4290_v14  ;;  %2950 = vmatpush.bf16.msra.mxu1 %v4035_v19 }
 0x25d   : > { %v4018_v21 = vld [vmem:[%s7410_s28 + $0x100] sm:$0xf]  ;;  %v4978_v22 = vld [vmem:[%s7410_s28 + $0x10c] sm:$0xf0]  ;;  %v3891_v31 = vor.u32 %v4946_v18, %v3890_v17  ;;  %2963 = vmatpush.bf16.msra.mxu2 %v4163_v20 }
 0x25e   : > { %v4146_v23 = vld [vmem:[%s7410_s28 + $0x200] sm:$0xf]  ;;  %v5010_v25 = vld [vmem:[%s7410_s28 + $0x20c] sm:$0xf0]  ;;  %v4019_v35 = vor.u32 %v4978_v22, %v4018_v21  ;;  %2976 = vmatpush.bf16.msra.mxu3 %v4291_v24 }
 0x25f   : > { %v4274_v26 = vld [vmem:[%s7410_s28 + $0x300] sm:$0xf]  ;;  %v5042_v27 = vld [vmem:[%s7410_s28 + $0x30c] sm:$0xf0]  ;;  %v4147_v36 = vor.u32 %v5010_v25, %v4146_v23  ;;  %2938 = vmatpush.bf16.msra.mxu0 %v3891_v31 }
 0x260   : > { %v4514_v28 = vld [vmem:[%s7410_s28 + $0x4e0] sm:$0xf]  ;;  %v5102_v29 = vld [vmem:[%s7410_s28 + $0x4ec] sm:$0xf0]  ;;  %v4275_v39 = vor.u32 %v5042_v27, %v4274_v26  ;;  %2951 = vmatpush.bf16.msra.mxu1 %v4019_v35 }
 0x261   : > { %v4642_v30 = vld [vmem:[%s7410_s28 + $0x5e0] sm:$0xf]  ;;  %v5134_v32 = vld [vmem:[%s7410_s28 + $0x5ec] sm:$0xf0]  ;;  %v4515_v40 = vor.u32 %v5102_v29, %v4514_v28  ;;  %2964 = vmatpush.bf16.msra.mxu2 %v4147_v36 }
 0x262   : > { %v4770_v33 = vld [vmem:[%s7410_s28 + $0x6e0] sm:$0xf]  ;;  %v5166_v34 = vld [vmem:[%s7410_s28 + $0x6ec] sm:$0xf0]  ;;  %v4643_v41 = vor.u32 %v5134_v32, %v4642_v30  ;;  %2977 = vmatpush.bf16.msra.mxu3 %v4275_v39 }
 0x263   : > { %v4898_v37 = vld [vmem:[%s7410_s28 + $0x7e0] sm:$0xf]  ;;  %v5198_v38 = vld [vmem:[%s7410_s28 + $0x7ec] sm:$0xf0]  ;;  %v4771_v42 = vor.u32 %v5166_v34, %v4770_v33  ;;  %2983 = vmatpush.bf16.msrb.mxu0 %v4515_v40 }
 0x264   : > { %v4498_v43 = vld [vmem:[%s7410_s28 + $0x4c0] sm:$0xf]  ;;  %v5098_v44 = vld [vmem:[%s7410_s28 + $0x4cc] sm:$0xf0]  ;;  %v4899_v46 = vor.u32 %v5198_v38, %v4898_v37  ;;  %2996 = vmatpush.bf16.msrb.mxu1 %v4643_v41 }
 0x265   : > { %v4626_v45 = vld [vmem:[%s7410_s28 + $0x5c0] sm:$0xf]  ;;  %v5130_v47 = vld [vmem:[%s7410_s28 + $0x5cc] sm:$0xf0]  ;;  %v4499_v52 = vor.u32 %v5098_v44, %v4498_v43  ;;  %3009 = vmatpush.bf16.msrb.mxu2 %v4771_v42 }
 0x266   : > { %v4754_v48 = vld [vmem:[%s7410_s28 + $0x6c0] sm:$0xf]  ;;  %v5162_v49 = vld [vmem:[%s7410_s28 + $0x6cc] sm:$0xf0]  ;;  %v4627_v55 = vor.u32 %v5130_v47, %v4626_v45  ;;  %3022 = vmatpush.bf16.msrb.mxu3 %v4899_v46 }
 0x267   : > { %v4882_v50 = vld [vmem:[%s7410_s28 + $0x7c0] sm:$0xf]  ;;  %v5194_v51 = vld [vmem:[%s7410_s28 + $0x7cc] sm:$0xf0]  ;;  %v4755_v56 = vor.u32 %v5162_v49, %v4754_v48  ;;  %2984 = vmatpush.bf16.msrb.mxu0 %v4499_v52 }
 0x268   : > { %v4482_v53 = vld [vmem:[%s7410_s28 + $0x4a0] sm:$0xf]  ;;  %v5094_v54 = vld [vmem:[%s7410_s28 + $0x4ac] sm:$0xf0]  ;;  %v4883_v60 = vor.u32 %v5194_v51, %v4882_v50  ;;  %2997 = vmatpush.bf16.msrb.mxu1 %v4627_v55 }
 0x269   : > { %v4610_v57 = vld [vmem:[%s7410_s28 + $0x5a0] sm:$0xf]  ;;  %v5126_v58 = vld [vmem:[%s7410_s28 + $0x5ac] sm:$0xf0]  ;;  %v4483_v1 = vor.u32 %v5094_v54, %v4482_v53  ;;  %3010 = vmatpush.bf16.msrb.mxu2 %v4755_v56 }
 0x26a   : > { %v4738_v61 = vld [vmem:[%s7410_s28 + $0x6a0] sm:$0xf]  ;;  %v5158_v62 = vld [vmem:[%s7410_s28 + $0x6ac] sm:$0xf0]  ;;  %v4611_v3 = vor.u32 %v5126_v58, %v4610_v57  ;;  %3023 = vmatpush.bf16.msrb.mxu3 %v4883_v60 }
 0x26b   : > { %v4866_v63 = vld [vmem:[%s7410_s28 + $0x7a0] sm:$0xf]  ;;  %v5190_v0 = vld [vmem:[%s7410_s28 + $0x7ac] sm:$0xf0]  ;;  %v4739_v4 = vor.u32 %v5158_v62, %v4738_v61  ;;  %2985 = vmatpush.bf16.msrb.mxu0 %v4483_v1 }
 0x26c   : > { %v4466_v2 = vld [vmem:[%s7410_s28 + $0x480] sm:$0xf]  ;;  %v5090_v5 = vld [vmem:[%s7410_s28 + $0x48c] sm:$0xf0]  ;;  %v4867_v8 = vor.u32 %v5190_v0, %v4866_v63  ;;  %2998 = vmatpush.bf16.msrb.mxu1 %v4611_v3 }
 0x26d   : > { %v4594_v6 = vld [vmem:[%s7410_s28 + $0x580] sm:$0xf]  ;;  %v5122_v7 = vld [vmem:[%s7410_s28 + $0x58c] sm:$0xf0]  ;;  %v4467_v15 = vor.u32 %v5090_v5, %v4466_v2  ;;  %3011 = vmatpush.bf16.msrb.mxu2 %v4739_v4 }
 0x26e   : > { %v4722_v9 = vld [vmem:[%s7410_s28 + $0x680] sm:$0xf]  ;;  %v5154_v10 = vld [vmem:[%s7410_s28 + $0x68c] sm:$0xf0]  ;;  %v4595_v20 = vor.u32 %v5122_v7, %v4594_v6  ;;  %3024 = vmatpush.bf16.msrb.mxu3 %v4867_v8  ;;  %v4972_v6 = vld [vmem:[%s7410_s28 + $0xe4] sm:$0xf] }
 0x26f   : > { %v4850_v11 = vld [vmem:[%s7410_s28 + $0x780] sm:$0xf]  ;;  %v5186_v12 = vld [vmem:[%s7410_s28 + $0x78c] sm:$0xf0]  ;;  %v4723_v21 = vor.u32 %v5154_v10, %v4722_v9  ;;  %2986 = vmatpush.bf16.msrb.mxu0 %v4467_v15  ;;  %v4004_v7 = vld [vmem:[%s7410_s28 + $0xf0] sm:$0xf0] }
 0x270   : > { %v4450_v13 = vld [vmem:[%s7410_s28 + $0x460] sm:$0xf]  ;;  %v5086_v14 = vld [vmem:[%s7410_s28 + $0x46c] sm:$0xf0]  ;;  %v4851_v24 = vor.u32 %v5186_v12, %v4850_v11  ;;  %2999 = vmatpush.bf16.msrb.mxu1 %v4595_v20  ;;  %v5004_v8 = vld [vmem:[%s7410_s28 + $0x1e4] sm:$0xf] }
 0x271   : > { %v4578_v16 = vld [vmem:[%s7410_s28 + $0x560] sm:$0xf]  ;;  %v5118_v17 = vld [vmem:[%s7410_s28 + $0x56c] sm:$0xf0]  ;;  %v4451_v33 = vor.u32 %v5086_v14, %v4450_v13  ;;  %3012 = vmatpush.bf16.msrb.mxu2 %v4723_v21  ;;  %v4132_v9 = vld [vmem:[%s7410_s28 + $0x1f0] sm:$0xf0]  ;;  %v4007_v21 = vor.u32 %v4972_v6, %v4004_v7 }
 0x272   : > { %v4706_v18 = vld [vmem:[%s7410_s28 + $0x660] sm:$0xf]  ;;  %v5150_v19 = vld [vmem:[%s7410_s28 + $0x66c] sm:$0xf0]  ;;  %v4579_v34 = vor.u32 %v5118_v17, %v4578_v16  ;;  %3025 = vmatpush.bf16.msrb.mxu3 %v4851_v24  ;;  %v5036_v10 = vld [vmem:[%s7410_s28 + $0x2e4] sm:$0xf]  ;;  %v4135_v24 = vor.u32 %v5004_v8, %v4132_v9 }
 0x273   : > { %v1363_v22 = vld.sshfl [vmem:[#allocation1 + $0x10] sm:$0xff pattern:$0x73625140]  ;;  %v1361_v23 = vld.sshfl [vmem:[#allocation1] sm:$0xff pattern:$0x73625140]  ;;  %v4707_v35 = vor.u32 %v5150_v19, %v4706_v18  ;;  %2987 = vmatpush.bf16.msrb.mxu0 %v4451_v33 }
 0x274   : > { %v7517_v25 = vpack.c.bf16 %v1363_v22, %v1363_v22  ;;  %v7519_v26 = vpack.c.bf16 %v1361_v23, %v1361_v23  ;;  %v1364_v27 = vld.sshfl [vmem:[#allocation1 + $0x18] sm:$0xff pattern:$0x73625140]  ;;  %v1362_v28 = vld.sshfl [vmem:[#allocation1 + $0x8] sm:$0xff pattern:$0x73625140]  ;;  %3000 = vmatpush.bf16.msrb.mxu1 %v4579_v34 }
 0x275   : > { %v4834_v29 = vld [vmem:[%s7410_s28 + $0x760] sm:$0xf]  ;;  %v5182_v30 = vld [vmem:[%s7410_s28 + $0x76c] sm:$0xf0]  ;;  %v7523_v31 = vpack.c.bf16 %v1364_v27, %v1364_v27  ;;  %v7525_v32 = vpack.c.bf16 %v1362_v28, %v1362_v28  ;;  %3013 = vmatpush.bf16.msrb.mxu2 %v4707_v35  ;;  %v4260_v12 = vld [vmem:[%s7410_s28 + $0x2f0] sm:$0xf0] }
 0x276   : > { %2965 = vmatmul.bf16.vlgmr.msra.gmra.mxu2 %v7517_v25  ;;  %v4434_v36 = vld [vmem:[%s7410_s28 + $0x440] sm:$0xf]  ;;  %v5082_v37 = vld [vmem:[%s7410_s28 + $0x44c] sm:$0xf0]  ;;  %v4835_v39 = vor.u32 %v5182_v30, %v4834_v29  ;;  %2939 = vmatmul.bf16.vlgmr.msra.gmra.mxu0 %v7519_v26  ;;  %v5068_v13 = vld [vmem:[%s7410_s28 + $0x3e4] sm:$0xf]  ;;  %v4263_v27 = vor.u32 %v5036_v10, %v4260_v12 }
 0x277   : > { %v4562_v38 = vld [vmem:[%s7410_s28 + $0x540] sm:$0xf]  ;;  %v5114_v40 = vld [vmem:[%s7410_s28 + $0x54c] sm:$0xf0]  ;;  %2978 = vmatmul.bf16.vlgmr.msra.gmra.mxu3 %v7523_v31  ;;  %2952 = vmatmul.bf16.vlgmr.msra.gmra.mxu1 %v7525_v32  ;;  %v4435_v45 = vor.u32 %v5082_v37, %v4434_v36  ;;  %v4388_v14 = vld [vmem:[%s7410_s28 + $0x3f0] sm:$0xf0] }
 0x278   : > { %v4690_v41 = vld [vmem:[%s7410_s28 + $0x640] sm:$0xf]  ;;  %v5146_v42 = vld [vmem:[%s7410_s28 + $0x64c] sm:$0xf0]  ;;  %v4563_v48 = vor.u32 %v5114_v40, %v4562_v38  ;;  %3026 = vmatpush.bf16.msrb.mxu3 %v4835_v39  ;;  %v4968_v17 = vld [vmem:[%s7410_s28 + $0xc4] sm:$0xf]  ;;  %v4391_v30 = vor.u32 %v5068_v13, %v4388_v14 }
 0x279   : > { %v4818_v43 = vld [vmem:[%s7410_s28 + $0x740] sm:$0xf]  ;;  %v5178_v44 = vld [vmem:[%s7410_s28 + $0x74c] sm:$0xf0]  ;;  %v4691_v49 = vor.u32 %v5146_v42, %v4690_v41  ;;  %2988 = vmatpush.bf16.msrb.mxu0 %v4435_v45  ;;  %v3988_v18 = vld [vmem:[%s7410_s28 + $0xd0] sm:$0xf0] }
 0x27a   : > { %v4418_v46 = vld [vmem:[%s7410_s28 + $0x420] sm:$0xf]  ;;  %v5078_v47 = vld [vmem:[%s7410_s28 + $0x42c] sm:$0xf0]  ;;  %v4819_v53 = vor.u32 %v5178_v44, %v4818_v43  ;;  %3001 = vmatpush.bf16.msrb.mxu1 %v4563_v48  ;;  %v5000_v28 = vld [vmem:[%s7410_s28 + $0x1c4] sm:$0xf]  ;;  %v3991_v41 = vor.u32 %v4968_v17, %v3988_v18 }
 0x27b   : > { %v4546_v50 = vld [vmem:[%s7410_s28 + $0x520] sm:$0xf]  ;;  %v5110_v51 = vld [vmem:[%s7410_s28 + $0x52c] sm:$0xf0]  ;;  %v4419_v59 = vor.u32 %v5078_v47, %v4418_v46  ;;  %3014 = vmatpush.bf16.msrb.mxu2 %v4691_v49  ;;  %v4116_v33 = vld [vmem:[%s7410_s28 + $0x1d0] sm:$0xf0] }
 0x27c   : > { %v1355_v52 = vld [vmem:[%s8305_s0 + $0x8] sm:$0xff]  ;;  %v5142_v55 = vld [vmem:[%s7410_s28 + $0x62c] sm:$0xf0]  ;;  %v4547_v63 = vor.u32 %v5110_v51, %v4546_v50  ;;  %3027 = vmatpush.bf16.msrb.mxu3 %v4819_v53  ;;  %v4244_v35 = vld [vmem:[%s7410_s28 + $0x2d0] sm:$0xf0]  ;;  %v4119_v43 = vor.u32 %v5000_v28, %v4116_v33 }
 0x27d   : > { %v4674_v54 = vld [vmem:[%s7410_s28 + $0x620] sm:$0xf]  ;;  %1360 = vst [vmem:[#allocation1 + $0x20] ss:$4 sm:$0xff] %v1355_v52  ;;  %v5174_v57 = vld [vmem:[%s7410_s28 + $0x72c] sm:$0xf0]  ;;  %2989 = vmatpush.bf16.msrb.mxu0 %v4419_v59 }
 0x27e   : > { %v4802_v56 = vld [vmem:[%s7410_s28 + $0x720] sm:$0xf]  ;;  %v5074_v60 = vld [vmem:[%s7410_s28 + $0x40c] sm:$0xf0]  ;;  %v4675_v0 = vor.u32 %v5142_v55, %v4674_v54  ;;  %3002 = vmatpush.bf16.msrb.mxu1 %v4547_v63  ;;  %v5032_v34 = vld [vmem:[%s7410_s28 + $0x2c4] sm:$0xf] }
 0x27f   : > { %v4402_v58 = vld [vmem:[%s7410_s28 + $0x400] sm:$0xf]  ;;  %v5106_v62 = vld [vmem:[%s7410_s28 + $0x50c] sm:$0xf0]  ;;  %v4803_v4 = vor.u32 %v5174_v57, %v4802_v56  ;;  %v5064_v37 = vld [vmem:[%s7410_s28 + $0x3c4] sm:$0xf]  ;;  %v4247_v44 = vor.u32 %v5032_v34, %v4244_v35 }
 0x280   : > { %v4530_v61 = vld [vmem:[%s7410_s28 + $0x500] sm:$0xf]  ;;  %v5138_v2 = vld [vmem:[%s7410_s28 + $0x60c] sm:$0xf0]  ;;  %v4403_v11 = vor.u32 %v5074_v60, %v4402_v58  ;;  %3015 = vmatpush.bf16.msrb.mxu2 %v4675_v0  ;;  %v4372_v38 = vld [vmem:[%s7410_s28 + $0x3d0] sm:$0xf0] }
 0x281   : > { %v4658_v1 = vld [vmem:[%s7410_s28 + $0x600] sm:$0xf]  ;;  %v5170_v5 = vld [vmem:[%s7410_s28 + $0x70c] sm:$0xf0]  ;;  %v4531_v15 = vor.u32 %v5106_v62, %v4530_v61  ;;  %3028 = vmatpush.bf16.msrb.mxu3 %v4803_v4  ;;  %v4964_v45 = vld [vmem:[%s7410_s28 + $0xa4] sm:$0xf]  ;;  %v4375_v48 = vor.u32 %v5064_v37, %v4372_v38 }
 0x282   : > { %v4786_v3 = vld [vmem:[%s7410_s28 + $0x700] sm:$0xf]  ;;  %v4659_v16 = vor.u32 %v5138_v2, %v4658_v1  ;;  %2990 = vmatpush.bf16.msrb.mxu0 %v4403_v11  ;;  %v3972_v46 = vld [vmem:[%s7410_s28 + $0xb0] sm:$0xf0]  ;;  %v4996_v47 = vld [vmem:[%s7410_s28 + $0x1a4] sm:$0xf] }
 0x283   : > { %v4787_v20 = vor.u32 %v5170_v5, %v4786_v3  ;;  %3003 = vmatpush.bf16.msrb.mxu1 %v4531_v15  ;;  %v4100_v49 = vld [vmem:[%s7410_s28 + $0x1b0] sm:$0xf0]  ;;  %v5028_v50 = vld [vmem:[%s7410_s28 + $0x2a4] sm:$0xf]  ;;  %v3975_v54 = vor.u32 %v4964_v45, %v3972_v46 }
 0x284   : > { %v1367_v19 = vld.sshfl [vmem:[#allocation1 + $0x30] sm:$0xff pattern:$0x73625140]  ;;  %v1365_v22 = vld.sshfl [vmem:[#allocation1 + $0x20] sm:$0xff pattern:$0x73625140]  ;;  %3016 = vmatpush.bf16.msrb.mxu2 %v4659_v16  ;;  %v4103_v55 = vor.u32 %v4996_v47, %v4100_v49 }
 0x285   : > { %v1368_v23 = vld.sshfl [vmem:[#allocation1 + $0x38] sm:$0xff pattern:$0x73625140]  ;;  %v1366_v29 = vld.sshfl [vmem:[#allocation1 + $0x28] sm:$0xff pattern:$0x73625140]  ;;  %v7572_v36 = vpack.c.bf16 %v1367_v19, %v1367_v19  ;;  %v7576_v39 = vpack.c.bf16 %v1365_v22, %v1365_v22  ;;  %3029 = vmatpush.bf16.msrb.mxu3 %v4787_v20 }
 0x286   : > { %v7578_v40 = vpack.c.bf16 %v1368_v23, %v1368_v23  ;;  %3035 = vmatpush.bf16.msra.mxu0 %v4007_v21  ;;  %v7580_v42 = vpack.c.bf16 %v1366_v29, %v1366_v29  ;;  %v4228_v51 = vld [vmem:[%s7410_s28 + $0x2b0] sm:$0xf0]  ;;  %v5060_v52 = vld [vmem:[%s7410_s28 + $0x3a4] sm:$0xf] }
 0x287   : > { %3048 = vmatpush.bf16.msra.mxu1 %v4135_v24  ;;  %3017 = vmatmul.bf16.vlgmr.msrb.gmra.mxu2 %v7572_v36  ;;  %v4356_v53 = vld [vmem:[%s7410_s28 + $0x3b0] sm:$0xf0]  ;;  %v4231_v56 = vor.u32 %v5028_v50, %v4228_v51  ;;  %v4960_v57 = vld [vmem:[%s7410_s28 + $0x84] sm:$0xf] }
 0x288   : > { %3061 = vmatpush.bf16.msra.mxu2 %v4263_v27  ;;  %2991 = vmatmul.bf16.vlgmr.msrb.gmra.mxu0 %v7576_v39  ;;  %v3956_v58 = vld [vmem:[%s7410_s28 + $0x90] sm:$0xf0]  ;;  %v4992_v59 = vld [vmem:[%s7410_s28 + $0x184] sm:$0xf]  ;;  %v4359_v60 = vor.u32 %v5060_v52, %v4356_v53 }
 0x289   : > { %3074 = vmatpush.bf16.msra.mxu3 %v4391_v30  ;;  %3004 = vmatmul.bf16.vlgmr.msrb.gmra.mxu1 %v7580_v42  ;;  %v4084_v61 = vld [vmem:[%s7410_s28 + $0x190] sm:$0xf0]  ;;  %v5024_v62 = vld [vmem:[%s7410_s28 + $0x284] sm:$0xf]  ;;  %v3959_v2 = vor.u32 %v4960_v57, %v3956_v58 }
 0x28a   : > { %3030 = vmatmul.bf16.vlgmr.msrb.gmra.mxu3 %v7578_v40  ;;  %3036 = vmatpush.bf16.msra.mxu0 %v3991_v41  ;;  %v4212_v63 = vld [vmem:[%s7410_s28 + $0x290] sm:$0xf0]  ;;  %v5056_v0 = vld [vmem:[%s7410_s28 + $0x384] sm:$0xf]  ;;  %v4087_v3 = vor.u32 %v4992_v59, %v4084_v61 }
 0x28b   : > { %3049 = vmatpush.bf16.msra.mxu1 %v4119_v43  ;;  %v4340_v1 = vld [vmem:[%s7410_s28 + $0x390] sm:$0xf0]  ;;  %v4215_v4 = vor.u32 %v5024_v62, %v4212_v63  ;;  %v4956_v5 = vld [vmem:[%s7410_s28 + $0x64] sm:$0xf] }
 0x28c   : > { %3062 = vmatpush.bf16.msra.mxu2 %v4247_v44  ;;  %v3940_v6 = vld [vmem:[%s7410_s28 + $0x70] sm:$0xf0]  ;;  %v4988_v7 = vld [vmem:[%s7410_s28 + $0x164] sm:$0xf]  ;;  %v4343_v8 = vor.u32 %v5056_v0, %v4340_v1 }
 0x28d   : > { %3075 = vmatpush.bf16.msra.mxu3 %v4375_v48  ;;  %v4068_v9 = vld [vmem:[%s7410_s28 + $0x170] sm:$0xf0]  ;;  %v5020_v10 = vld [vmem:[%s7410_s28 + $0x264] sm:$0xf]  ;;  %v3943_v14 = vor.u32 %v4956_v5, %v3940_v6 }
 0x28e   : > { %3037 = vmatpush.bf16.msra.mxu0 %v3975_v54  ;;  %v4196_v11 = vld [vmem:[%s7410_s28 + $0x270] sm:$0xf0]  ;;  %v5052_v12 = vld [vmem:[%s7410_s28 + $0x364] sm:$0xf]  ;;  %v4071_v15 = vor.u32 %v4988_v7, %v4068_v9 }
 0x28f   : > { %3050 = vmatpush.bf16.msra.mxu1 %v4103_v55  ;;  %v4324_v13 = vld [vmem:[%s7410_s28 + $0x370] sm:$0xf0]  ;;  %v4199_v16 = vor.u32 %v5020_v10, %v4196_v11  ;;  %v4952_v17 = vld [vmem:[%s7410_s28 + $0x44] sm:$0xf] }
 0x290   : > { %3063 = vmatpush.bf16.msra.mxu2 %v4231_v56  ;;  %v3924_v18 = vld [vmem:[%s7410_s28 + $0x50] sm:$0xf0]  ;;  %v4984_v19 = vld [vmem:[%s7410_s28 + $0x144] sm:$0xf]  ;;  %v4327_v20 = vor.u32 %v5052_v12, %v4324_v13 }
 0x291   : > { %3076 = vmatpush.bf16.msra.mxu3 %v4359_v60  ;;  %v4052_v21 = vld [vmem:[%s7410_s28 + $0x150] sm:$0xf0]  ;;  %v5016_v22 = vld [vmem:[%s7410_s28 + $0x244] sm:$0xf]  ;;  %v3927_v28 = vor.u32 %v4952_v17, %v3924_v18 }
 0x292   : > { %3038 = vmatpush.bf16.msra.mxu0 %v3959_v2  ;;  %v4180_v23 = vld [vmem:[%s7410_s28 + $0x250] sm:$0xf0]  ;;  %v5048_v24 = vld [vmem:[%s7410_s28 + $0x344] sm:$0xf]  ;;  %v4055_v29 = vor.u32 %v4984_v19, %v4052_v21 }
 0x293   : > { %3051 = vmatpush.bf16.msra.mxu1 %v4087_v3  ;;  %v4308_v27 = vld [vmem:[%s7410_s28 + $0x350] sm:$0xf0]  ;;  %v4183_v30 = vor.u32 %v5016_v22, %v4180_v23  ;;  %v4948_v33 = vld [vmem:[%s7410_s28 + $0x24] sm:$0xf] }
 0x294   : > { %3064 = vmatpush.bf16.msra.mxu2 %v4215_v4  ;;  %v3908_v34 = vld [vmem:[%s7410_s28 + $0x30] sm:$0xf0]  ;;  %v4980_v35 = vld [vmem:[%s7410_s28 + $0x124] sm:$0xf]  ;;  %v4311_v37 = vor.u32 %v5048_v24, %v4308_v27 }
 0x295   : > { %3077 = vmatpush.bf16.msra.mxu3 %v4343_v8  ;;  %v4036_v38 = vld [vmem:[%s7410_s28 + $0x130] sm:$0xf0]  ;;  %v5012_v41 = vld [vmem:[%s7410_s28 + $0x224] sm:$0xf]  ;;  %v3911_v46 = vor.u32 %v4948_v33, %v3908_v34 }
 0x296   : > { %3039 = vmatpush.bf16.msra.mxu0 %v3943_v14  ;;  %v4164_v43 = vld [vmem:[%s7410_s28 + $0x230] sm:$0xf0]  ;;  %v5044_v44 = vld [vmem:[%s7410_s28 + $0x324] sm:$0xf]  ;;  %v4039_v49 = vor.u32 %v4980_v35, %v4036_v38 }
 0x297   : > { %3052 = vmatpush.bf16.msra.mxu1 %v4071_v15  ;;  %v4292_v45 = vld [vmem:[%s7410_s28 + $0x330] sm:$0xf0]  ;;  %v4944_v47 = vld [vmem:[%s7410_s28 + $0x4] sm:$0xf]  ;;  %v4167_v50 = vor.u32 %v5012_v41, %v4164_v43 }
 0x298   : > { %3065 = vmatpush.bf16.msra.mxu2 %v4199_v16  ;;  %v3892_v48 = vld [vmem:[%s7410_s28 + $0x10] sm:$0xf0]  ;;  %v4976_v51 = vld [vmem:[%s7410_s28 + $0x104] sm:$0xf]  ;;  %v4295_v54 = vor.u32 %v5044_v44, %v4292_v45 }
 0x299   : > { %3078 = vmatpush.bf16.msra.mxu3 %v4327_v20  ;;  %v4020_v52 = vld [vmem:[%s7410_s28 + $0x110] sm:$0xf0]  ;;  %v5008_v53 = vld [vmem:[%s7410_s28 + $0x204] sm:$0xf]  ;;  %v3895_v61 = vor.u32 %v4944_v47, %v3892_v48 }
 0x29a   : > { %3040 = vmatpush.bf16.msra.mxu0 %v3927_v28  ;;  %v4148_v55 = vld [vmem:[%s7410_s28 + $0x210] sm:$0xf0]  ;;  %v5040_v56 = vld [vmem:[%s7410_s28 + $0x304] sm:$0xf]  ;;  %v4023_v1 = vor.u32 %v4976_v51, %v4020_v52 }
 0x29b   : > { %3053 = vmatpush.bf16.msra.mxu1 %v4055_v29  ;;  %v4276_v57 = vld [vmem:[%s7410_s28 + $0x310] sm:$0xf0]  ;;  %v5100_v58 = vld [vmem:[%s7410_s28 + $0x4e4] sm:$0xf]  ;;  %v4151_v2 = vor.u32 %v5008_v53, %v4148_v55 }
 0x29c   : > { %3066 = vmatpush.bf16.msra.mxu2 %v4183_v30  ;;  %v4516_v59 = vld [vmem:[%s7410_s28 + $0x4f0] sm:$0xf0]  ;;  %v5132_v60 = vld [vmem:[%s7410_s28 + $0x5e4] sm:$0xf]  ;;  %v4279_v5 = vor.u32 %v5040_v56, %v4276_v57 }
 0x29d   : > { %3079 = vmatpush.bf16.msra.mxu3 %v4311_v37  ;;  %v4644_v62 = vld [vmem:[%s7410_s28 + $0x5f0] sm:$0xf0]  ;;  %v5164_v63 = vld [vmem:[%s7410_s28 + $0x6e4] sm:$0xf]  ;;  %v4519_v6 = vor.u32 %v5100_v58, %v4516_v59 }
 0x29e   : > { %3041 = vmatpush.bf16.msra.mxu0 %v3911_v46  ;;  %v4772_v0 = vld [vmem:[%s7410_s28 + $0x6f0] sm:$0xf0]  ;;  %v5196_v3 = vld [vmem:[%s7410_s28 + $0x7e4] sm:$0xf]  ;;  %v4647_v7 = vor.u32 %v5132_v60, %v4644_v62 }
 0x29f   : > { %3054 = vmatpush.bf16.msra.mxu1 %v4039_v49  ;;  %v4900_v4 = vld [vmem:[%s7410_s28 + $0x7f0] sm:$0xf0]  ;;  %v4775_v8 = vor.u32 %v5164_v63, %v4772_v0  ;;  %v5096_v9 = vld [vmem:[%s7410_s28 + $0x4c4] sm:$0xf] }
 0x2a0   : > { %3067 = vmatpush.bf16.msra.mxu2 %v4167_v50  ;;  %v4500_v10 = vld [vmem:[%s7410_s28 + $0x4d0] sm:$0xf0]  ;;  %v5128_v11 = vld [vmem:[%s7410_s28 + $0x5c4] sm:$0xf]  ;;  %v4903_v12 = vor.u32 %v5196_v3, %v4900_v4 }
 0x2a1   : > { %3080 = vmatpush.bf16.msra.mxu3 %v4295_v54  ;;  %v4628_v13 = vld [vmem:[%s7410_s28 + $0x5d0] sm:$0xf0]  ;;  %v5160_v14 = vld [vmem:[%s7410_s28 + $0x6c4] sm:$0xf]  ;;  %v4503_v18 = vor.u32 %v5096_v9, %v4500_v10 }
 0x2a2   : > { %3042 = vmatpush.bf16.msra.mxu0 %v3895_v61  ;;  %v4756_v15 = vld [vmem:[%s7410_s28 + $0x6d0] sm:$0xf0]  ;;  %v5192_v16 = vld [vmem:[%s7410_s28 + $0x7c4] sm:$0xf]  ;;  %v4631_v19 = vor.u32 %v5128_v11, %v4628_v13 }
 0x2a3   : > { %3055 = vmatpush.bf16.msra.mxu1 %v4023_v1  ;;  %v4884_v17 = vld [vmem:[%s7410_s28 + $0x7d0] sm:$0xf0]  ;;  %v4759_v20 = vor.u32 %v5160_v14, %v4756_v15  ;;  %v5092_v21 = vld [vmem:[%s7410_s28 + $0x4a4] sm:$0xf] }
 0x2a4   : > { %3068 = vmatpush.bf16.msra.mxu2 %v4151_v2  ;;  %v4484_v22 = vld [vmem:[%s7410_s28 + $0x4b0] sm:$0xf0]  ;;  %v5124_v23 = vld [vmem:[%s7410_s28 + $0x5a4] sm:$0xf]  ;;  %v4887_v24 = vor.u32 %v5192_v16, %v4884_v17 }
 0x2a5   : > { %3081 = vmatpush.bf16.msra.mxu3 %v4279_v5  ;;  %v4612_v27 = vld [vmem:[%s7410_s28 + $0x5b0] sm:$0xf0]  ;;  %v5156_v28 = vld [vmem:[%s7410_s28 + $0x6a4] sm:$0xf]  ;;  %3043 = vmatmul.bf16.vlgmr.msra.gmra.mxu0 %v7519_v26  ;;  %v4487_v34 = vor.u32 %v5092_v21, %v4484_v22 }
 0x2a6   : > { %3087 = vmatpush.bf16.msrb.mxu0 %v4519_v6  ;;  %v4740_v29 = vld [vmem:[%s7410_s28 + $0x6b0] sm:$0xf0]  ;;  %v5188_v30 = vld [vmem:[%s7410_s28 + $0x7a4] sm:$0xf]  ;;  %3056 = vmatmul.bf16.vlgmr.msra.gmra.mxu1 %v7525_v32  ;;  %v4615_v35 = vor.u32 %v5124_v23, %v4612_v27 }
 0x2a7   : > { %3100 = vmatpush.bf16.msrb.mxu1 %v4647_v7  ;;  %3069 = vmatmul.bf16.vlgmr.msra.gmra.mxu2 %v7517_v25  ;;  %v4868_v33 = vld [vmem:[%s7410_s28 + $0x7b0] sm:$0xf0]  ;;  %v4743_v37 = vor.u32 %v5156_v28, %v4740_v29  ;;  %v5088_v38 = vld [vmem:[%s7410_s28 + $0x484] sm:$0xf] }
 0x2a8   : > { %3113 = vmatpush.bf16.msrb.mxu2 %v4775_v8  ;;  %3082 = vmatmul.bf16.vlgmr.msra.gmra.mxu3 %v7523_v31  ;;  %v4468_v41 = vld [vmem:[%s7410_s28 + $0x490] sm:$0xf0]  ;;  %v5120_v43 = vld [vmem:[%s7410_s28 + $0x584] sm:$0xf]  ;;  %v4871_v44 = vor.u32 %v5188_v30, %v4868_v33 }
 0x2a9   : > { %3126 = vmatpush.bf16.msrb.mxu3 %v4903_v12  ;;  %v4596_v45 = vld [vmem:[%s7410_s28 + $0x590] sm:$0xf0]  ;;  %v5152_v46 = vld [vmem:[%s7410_s28 + $0x684] sm:$0xf]  ;;  %v4471_v50 = vor.u32 %v5088_v38, %v4468_v41  ;;  %v4010_v41 = vld [vmem:[%s7410_s28 + $0xe8] sm:$0xf] }
 0x2aa   : > { %3088 = vmatpush.bf16.msrb.mxu0 %v4503_v18  ;;  %v4724_v47 = vld [vmem:[%s7410_s28 + $0x690] sm:$0xf0]  ;;  %v5184_v48 = vld [vmem:[%s7410_s28 + $0x784] sm:$0xf]  ;;  %v4599_v51 = vor.u32 %v5120_v43, %v4596_v45  ;;  %v4975_v43 = vld [vmem:[%s7410_s28 + $0xf4] sm:$0xf0] }
 0x2ab   : > { %3101 = vmatpush.bf16.msrb.mxu1 %v4631_v19  ;;  %v4852_v49 = vld [vmem:[%s7410_s28 + $0x790] sm:$0xf0]  ;;  %v4727_v52 = vor.u32 %v5152_v46, %v4724_v47  ;;  %v5084_v53 = vld [vmem:[%s7410_s28 + $0x464] sm:$0xf]  ;;  %v5007_v46 = vld [vmem:[%s7410_s28 + $0x1f4] sm:$0xf0] }
 0x2ac   : > { %3114 = vmatpush.bf16.msrb.mxu2 %v4759_v20  ;;  %v4452_v54 = vld [vmem:[%s7410_s28 + $0x470] sm:$0xf0]  ;;  %v5116_v55 = vld [vmem:[%s7410_s28 + $0x564] sm:$0xf]  ;;  %v4855_v56 = vor.u32 %v5184_v48, %v4852_v49  ;;  %v4266_v47 = vld [vmem:[%s7410_s28 + $0x2e8] sm:$0xf] }
 0x2ad   : > { %3127 = vmatpush.bf16.msrb.mxu3 %v4887_v24  ;;  %v4580_v57 = vld [vmem:[%s7410_s28 + $0x570] sm:$0xf0]  ;;  %v5148_v58 = vld [vmem:[%s7410_s28 + $0x664] sm:$0xf]  ;;  %v4455_v62 = vor.u32 %v5084_v53, %v4452_v54  ;;  %v5039_v48 = vld [vmem:[%s7410_s28 + $0x2f4] sm:$0xf0]  ;;  %v4011_v54 = vor.u32 %v4975_v43, %v4010_v41 }
 0x2ae   : > { %3089 = vmatpush.bf16.msrb.mxu0 %v4487_v34  ;;  %v4708_v59 = vld [vmem:[%s7410_s28 + $0x670] sm:$0xf0]  ;;  %v5180_v60 = vld [vmem:[%s7410_s28 + $0x764] sm:$0xf]  ;;  %v4583_v63 = vor.u32 %v5116_v55, %v4580_v57  ;;  %v3994_v57 = vld [vmem:[%s7410_s28 + $0xc8] sm:$0xf] }
 0x2af   : > { %3102 = vmatpush.bf16.msrb.mxu1 %v4615_v35  ;;  %v4836_v61 = vld [vmem:[%s7410_s28 + $0x770] sm:$0xf0]  ;;  %v4711_v0 = vor.u32 %v5148_v58, %v4708_v59  ;;  %v5080_v1 = vld [vmem:[%s7410_s28 + $0x444] sm:$0xf]  ;;  %v4971_v58 = vld [vmem:[%s7410_s28 + $0xd4] sm:$0xf0] }
 0x2b0   : > { %3115 = vmatpush.bf16.msrb.mxu2 %v4743_v37  ;;  %v4436_v2 = vld [vmem:[%s7410_s28 + $0x450] sm:$0xf0]  ;;  %v5112_v3 = vld [vmem:[%s7410_s28 + $0x544] sm:$0xf]  ;;  %v4839_v4 = vor.u32 %v5180_v60, %v4836_v61  ;;  %v4122_v59 = vld [vmem:[%s7410_s28 + $0x1c8] sm:$0xf] }
 0x2b1   : > { %3128 = vmatpush.bf16.msrb.mxu3 %v4871_v44  ;;  %v4564_v5 = vld [vmem:[%s7410_s28 + $0x550] sm:$0xf0]  ;;  %v5144_v6 = vld [vmem:[%s7410_s28 + $0x644] sm:$0xf]  ;;  %v4439_v10 = vor.u32 %v5080_v1, %v4436_v2  ;;  %v4138_v44 = vld [vmem:[%s7410_s28 + $0x1e8] sm:$0xf]  ;;  %v3995_v2 = vor.u32 %v4971_v58, %v3994_v57 }
 0x2b2   : > { %3090 = vmatpush.bf16.msrb.mxu0 %v4471_v50  ;;  %v4692_v7 = vld [vmem:[%s7410_s28 + $0x650] sm:$0xf0]  ;;  %v5176_v8 = vld [vmem:[%s7410_s28 + $0x744] sm:$0xf]  ;;  %v4567_v11 = vor.u32 %v5112_v3, %v4564_v5  ;;  %v4139_v55 = vor.u32 %v5007_v46, %v4138_v44  ;;  %v5003_v61 = vld [vmem:[%s7410_s28 + $0x1d4] sm:$0xf0] }
 0x2b3   : > { %3103 = vmatpush.bf16.msrb.mxu1 %v4599_v51  ;;  %v4820_v9 = vld [vmem:[%s7410_s28 + $0x750] sm:$0xf0]  ;;  %v4695_v12 = vor.u32 %v5144_v6, %v4692_v7  ;;  %v5076_v13 = vld [vmem:[%s7410_s28 + $0x424] sm:$0xf]  ;;  %v4394_v51 = vld [vmem:[%s7410_s28 + $0x3e8] sm:$0xf]  ;;  %v4123_v3 = vor.u32 %v5003_v61, %v4122_v59 }
 0x2b4   : > { %3116 = vmatpush.bf16.msrb.mxu2 %v4727_v52  ;;  %v4420_v14 = vld [vmem:[%s7410_s28 + $0x430] sm:$0xf0]  ;;  %v5108_v15 = vld [vmem:[%s7410_s28 + $0x524] sm:$0xf]  ;;  %v4823_v16 = vor.u32 %v5176_v8, %v4820_v9  ;;  %v5071_v52 = vld [vmem:[%s7410_s28 + $0x3f4] sm:$0xf0] }
 0x2b5   : > { %3129 = vmatpush.bf16.msrb.mxu3 %v4855_v56  ;;  %v4548_v17 = vld [vmem:[%s7410_s28 + $0x530] sm:$0xf0]  ;;  %v5140_v18 = vld [vmem:[%s7410_s28 + $0x624] sm:$0xf]  ;;  %v4423_v22 = vor.u32 %v5076_v13, %v4420_v14  ;;  %v4267_v56 = vor.u32 %v5039_v48, %v4266_v47  ;;  %v4395_v60 = vor.u32 %v5071_v52, %v4394_v51  ;;  %v5067_v1 = vld [vmem:[%s7410_s28 + $0x3d4] sm:$0xf0] }
 0x2b6   : > { %3091 = vmatpush.bf16.msrb.mxu0 %v4455_v62  ;;  %v4676_v19 = vld [vmem:[%s7410_s28 + $0x630] sm:$0xf0]  ;;  %v5172_v20 = vld [vmem:[%s7410_s28 + $0x724] sm:$0xf]  ;;  %v4551_v27 = vor.u32 %v5108_v15, %v4548_v17  ;;  %v4250_v62 = vld [vmem:[%s7410_s28 + $0x2c8] sm:$0xf] }
 0x2b7   : > { %3104 = vmatpush.bf16.msrb.mxu1 %v4583_v63  ;;  %v4804_v21 = vld [vmem:[%s7410_s28 + $0x730] sm:$0xf0]  ;;  %v5072_v23 = vld [vmem:[%s7410_s28 + $0x404] sm:$0xf]  ;;  %v4679_v28 = vor.u32 %v5140_v18, %v4676_v19  ;;  %v5035_v63 = vld [vmem:[%s7410_s28 + $0x2d4] sm:$0xf0] }
 0x2b8   : > { %3117 = vmatpush.bf16.msrb.mxu2 %v4711_v0  ;;  %v4404_v24 = vld [vmem:[%s7410_s28 + $0x410] sm:$0xf0]  ;;  %v5104_v29 = vld [vmem:[%s7410_s28 + $0x504] sm:$0xf]  ;;  %v4807_v34 = vor.u32 %v5172_v20, %v4804_v21  ;;  %v4378_v0 = vld [vmem:[%s7410_s28 + $0x3c8] sm:$0xf] }
 0x2b9   : > { %3130 = vmatpush.bf16.msrb.mxu3 %v4839_v4  ;;  %v4532_v30 = vld [vmem:[%s7410_s28 + $0x510] sm:$0xf0]  ;;  %v5136_v33 = vld [vmem:[%s7410_s28 + $0x604] sm:$0xf]  ;;  %v4407_v45 = vor.u32 %v5072_v23, %v4404_v24  ;;  %v4251_v4 = vor.u32 %v5035_v63, %v4250_v62  ;;  %v3978_v5 = vld [vmem:[%s7410_s28 + $0xa8] sm:$0xf]  ;;  %v4379_v8 = vor.u32 %v5067_v1, %v4378_v0 }
 0x2ba   : > { %3092 = vmatpush.bf16.msrb.mxu0 %v4439_v10  ;;  %v4660_v35 = vld [vmem:[%s7410_s28 + $0x610] sm:$0xf0]  ;;  %v5168_v37 = vld [vmem:[%s7410_s28 + $0x704] sm:$0xf]  ;;  %v4535_v49 = vor.u32 %v5104_v29, %v4532_v30  ;;  %v4967_v6 = vld [vmem:[%s7410_s28 + $0xb4] sm:$0xf0] }
 0x2bb   : > { %3105 = vmatpush.bf16.msrb.mxu1 %v4567_v11  ;;  %v4788_v38 = vld [vmem:[%s7410_s28 + $0x710] sm:$0xf0]  ;;  %v4663_v50 = vor.u32 %v5136_v33, %v4660_v35  ;;  %v4106_v7 = vld [vmem:[%s7410_s28 + $0x1a8] sm:$0xf]  ;;  %v4999_v9 = vld [vmem:[%s7410_s28 + $0x1b4] sm:$0xf0]  ;;  %v3979_v14 = vor.u32 %v4967_v6, %v3978_v5 }
 0x2bc   : > { %3118 = vmatpush.bf16.msrb.mxu2 %v4695_v12  ;;  %v4791_v53 = vor.u32 %v5168_v37, %v4788_v38  ;;  %v4234_v10 = vld [vmem:[%s7410_s28 + $0x2a8] sm:$0xf]  ;;  %v5031_v11 = vld [vmem:[%s7410_s28 + $0x2b4] sm:$0xf0]  ;;  %v4107_v15 = vor.u32 %v4999_v9, %v4106_v7 }
 0x2bd   : > { %3131 = vmatpush.bf16.msrb.mxu3 %v4823_v16  ;;  %v4362_v12 = vld [vmem:[%s7410_s28 + $0x3a8] sm:$0xf]  ;;  %v5063_v13 = vld [vmem:[%s7410_s28 + $0x3b4] sm:$0xf0]  ;;  %v4235_v16 = vor.u32 %v5031_v11, %v4234_v10 }
 0x2be   : > { %3093 = vmatpush.bf16.msrb.mxu0 %v4423_v22  ;;  %v3962_v17 = vld [vmem:[%s7410_s28 + $0x88] sm:$0xf]  ;;  %v4963_v18 = vld [vmem:[%s7410_s28 + $0x94] sm:$0xf0]  ;;  %v4363_v20 = vor.u32 %v5063_v13, %v4362_v12 }
 0x2bf   : > { %3106 = vmatpush.bf16.msrb.mxu1 %v4551_v27  ;;  %v4090_v19 = vld [vmem:[%s7410_s28 + $0x188] sm:$0xf]  ;;  %v4995_v21 = vld [vmem:[%s7410_s28 + $0x194] sm:$0xf0] }
 0x2c0   : > { %3119 = vmatpush.bf16.msrb.mxu2 %v4679_v28  ;;  %v4218_v22 = vld [vmem:[%s7410_s28 + $0x288] sm:$0xf]  ;;  %v5027_v23 = vld [vmem:[%s7410_s28 + $0x294] sm:$0xf0]  ;;  %v3963_v28 = vor.u32 %v4963_v18, %v3962_v17  ;;  %v4091_v29 = vor.u32 %v4995_v21, %v4090_v19 }
 0x2c1   : > { %3132 = vmatpush.bf16.msrb.mxu3 %v4807_v34  ;;  %v4346_v24 = vld [vmem:[%s7410_s28 + $0x388] sm:$0xf]  ;;  %v5059_v27 = vld [vmem:[%s7410_s28 + $0x394] sm:$0xf0]  ;;  %v4219_v30 = vor.u32 %v5027_v23, %v4218_v22 }
 0x2c2   : > { %3094 = vmatpush.bf16.msrb.mxu0 %v4407_v45  ;;  %v3946_v33 = vld [vmem:[%s7410_s28 + $0x68] sm:$0xf]  ;;  %v4959_v34 = vld [vmem:[%s7410_s28 + $0x74] sm:$0xf0]  ;;  %v4347_v37 = vor.u32 %v5059_v27, %v4346_v24 }
 0x2c3   : > { %3107 = vmatpush.bf16.msrb.mxu1 %v4535_v49  ;;  %v4074_v35 = vld [vmem:[%s7410_s28 + $0x168] sm:$0xf]  ;;  %v4991_v38 = vld [vmem:[%s7410_s28 + $0x174] sm:$0xf0]  ;;  %v3947_v46 = vor.u32 %v4959_v34, %v3946_v33 }
 0x2c4   : > { %3120 = vmatpush.bf16.msrb.mxu2 %v4663_v50  ;;  %v4202_v41 = vld [vmem:[%s7410_s28 + $0x268] sm:$0xf]  ;;  %v5023_v43 = vld [vmem:[%s7410_s28 + $0x274] sm:$0xf0]  ;;  %v4075_v47 = vor.u32 %v4991_v38, %v4074_v35 }
 0x2c5   : > { %3133 = vmatpush.bf16.msrb.mxu3 %v4791_v53  ;;  %3095 = vmatmul.bf16.vlgmr.msrb.gmra.mxu0 %v7576_v39  ;;  %v4330_v44 = vld [vmem:[%s7410_s28 + $0x368] sm:$0xf]  ;;  %v5055_v45 = vld [vmem:[%s7410_s28 + $0x374] sm:$0xf0]  ;;  %v4203_v48 = vor.u32 %v5023_v43, %v4202_v41 }
 0x2c6   : > { %3139 = vmatpush.bf16.msra.mxu0 %v4011_v54  ;;  %3108 = vmatmul.bf16.vlgmr.msrb.gmra.mxu1 %v7580_v42  ;;  %v3930_v49 = vld [vmem:[%s7410_s28 + $0x48] sm:$0xf]  ;;  %v4955_v50 = vld [vmem:[%s7410_s28 + $0x54] sm:$0xf0]  ;;  %v4331_v52 = vor.u32 %v5055_v45, %v4330_v44 }
 0x2c7   : > { %3152 = vmatpush.bf16.msra.mxu1 %v4139_v55  ;;  %3121 = vmatmul.bf16.vlgmr.msrb.gmra.mxu2 %v7572_v36  ;;  %v4058_v51 = vld [vmem:[%s7410_s28 + $0x148] sm:$0xf]  ;;  %v4987_v53 = vld [vmem:[%s7410_s28 + $0x154] sm:$0xf0]  ;;  %v3931_v58 = vor.u32 %v4955_v50, %v3930_v49 }
 0x2c8   : > { %3165 = vmatpush.bf16.msra.mxu2 %v4267_v56  ;;  %3134 = vmatmul.bf16.vlgmr.msrb.gmra.mxu3 %v7578_v40  ;;  %v4186_v54 = vld [vmem:[%s7410_s28 + $0x248] sm:$0xf]  ;;  %v5019_v55 = vld [vmem:[%s7410_s28 + $0x254] sm:$0xf0]  ;;  %v4059_v59 = vor.u32 %v4987_v53, %v4058_v51 }
 0x2c9   : > { %3178 = vmatpush.bf16.msra.mxu3 %v4395_v60  ;;  %v4314_v56 = vld [vmem:[%s7410_s28 + $0x348] sm:$0xf]  ;;  %v5051_v57 = vld [vmem:[%s7410_s28 + $0x354] sm:$0xf0]  ;;  %v4187_v60 = vor.u32 %v5019_v55, %v4186_v54 }
 0x2ca   : > { %3140 = vmatpush.bf16.msra.mxu0 %v3995_v2  ;;  %v3914_v61 = vld [vmem:[%s7410_s28 + $0x28] sm:$0xf]  ;;  %v4951_v62 = vld [vmem:[%s7410_s28 + $0x34] sm:$0xf0]  ;;  %v4315_v0 = vor.u32 %v5051_v57, %v4314_v56 }
 0x2cb   : > { %3153 = vmatpush.bf16.msra.mxu1 %v4123_v3  ;;  %v4042_v63 = vld [vmem:[%s7410_s28 + $0x128] sm:$0xf]  ;;  %v4983_v1 = vld [vmem:[%s7410_s28 + $0x134] sm:$0xf0]  ;;  %v3915_v6 = vor.u32 %v4951_v62, %v3914_v61 }
 0x2cc   : > { %3166 = vmatpush.bf16.msra.mxu2 %v4251_v4  ;;  %v4170_v2 = vld [vmem:[%s7410_s28 + $0x228] sm:$0xf]  ;;  %v5015_v3 = vld [vmem:[%s7410_s28 + $0x234] sm:$0xf0]  ;;  %v4043_v9 = vor.u32 %v4983_v1, %v4042_v63 }
 0x2cd   : > { %3179 = vmatpush.bf16.msra.mxu3 %v4379_v8  ;;  %v4298_v4 = vld [vmem:[%s7410_s28 + $0x328] sm:$0xf]  ;;  %v5047_v5 = vld [vmem:[%s7410_s28 + $0x334] sm:$0xf0]  ;;  %v4171_v10 = vor.u32 %v5015_v3, %v4170_v2 }
 0x2ce   : > { %3141 = vmatpush.bf16.msra.mxu0 %v3979_v14  ;;  %v3898_v7 = vld [vmem:[%s7410_s28 + $0x8] sm:$0xf]  ;;  %v4947_v8 = vld [vmem:[%s7410_s28 + $0x14] sm:$0xf0]  ;;  %v4299_v14 = vor.u32 %v5047_v5, %v4298_v4 }
 0x2cf   : > { %3154 = vmatpush.bf16.msra.mxu1 %v4107_v15  ;;  %v4026_v11 = vld [vmem:[%s7410_s28 + $0x108] sm:$0xf]  ;;  %v4979_v12 = vld [vmem:[%s7410_s28 + $0x114] sm:$0xf0]  ;;  %v3899_v21 = vor.u32 %v4947_v8, %v3898_v7 }
 0x2d0   : > { %3167 = vmatpush.bf16.msra.mxu2 %v4235_v16  ;;  %v4154_v13 = vld [vmem:[%s7410_s28 + $0x208] sm:$0xf]  ;;  %v5011_v15 = vld [vmem:[%s7410_s28 + $0x214] sm:$0xf0]  ;;  %v4027_v27 = vor.u32 %v4979_v12, %v4026_v11 }
 0x2d1   : > { %3180 = vmatpush.bf16.msra.mxu3 %v4363_v20  ;;  %v4282_v16 = vld [vmem:[%s7410_s28 + $0x308] sm:$0xf]  ;;  %v5043_v17 = vld [vmem:[%s7410_s28 + $0x314] sm:$0xf0] }
 0x2d2   : > { %3142 = vmatpush.bf16.msra.mxu0 %v3963_v28  ;;  %v4522_v18 = vld [vmem:[%s7410_s28 + $0x4e8] sm:$0xf]  ;;  %v5103_v19 = vld [vmem:[%s7410_s28 + $0x4f4] sm:$0xf0]  ;;  %v4155_v28 = vor.u32 %v5011_v15, %v4154_v13  ;;  %v4283_v33 = vor.u32 %v5043_v17, %v4282_v16 }
 0x2d3   : > { %3155 = vmatpush.bf16.msra.mxu1 %v4091_v29  ;;  %v4650_v20 = vld [vmem:[%s7410_s28 + $0x5e8] sm:$0xf]  ;;  %v5135_v22 = vld [vmem:[%s7410_s28 + $0x5f4] sm:$0xf0]  ;;  %v4523_v34 = vor.u32 %v5103_v19, %v4522_v18 }
 0x2d4   : > { %3168 = vmatpush.bf16.msra.mxu2 %v4219_v30  ;;  %v4778_v23 = vld [vmem:[%s7410_s28 + $0x6e8] sm:$0xf]  ;;  %v5167_v24 = vld [vmem:[%s7410_s28 + $0x6f4] sm:$0xf0]  ;;  %v4651_v35 = vor.u32 %v5135_v22, %v4650_v20 }
 0x2d5   : > { %3181 = vmatpush.bf16.msra.mxu3 %v4347_v37  ;;  %v4906_v29 = vld [vmem:[%s7410_s28 + $0x7e8] sm:$0xf]  ;;  %v5199_v30 = vld [vmem:[%s7410_s28 + $0x7f4] sm:$0xf0]  ;;  %v4779_v37 = vor.u32 %v5167_v24, %v4778_v23 }
 0x2d6   : > { %3143 = vmatpush.bf16.msra.mxu0 %v3947_v46  ;;  %v4506_v38 = vld [vmem:[%s7410_s28 + $0x4c8] sm:$0xf]  ;;  %v5099_v41 = vld [vmem:[%s7410_s28 + $0x4d4] sm:$0xf0]  ;;  %v4907_v44 = vor.u32 %v5199_v30, %v4906_v29 }
 0x2d7   : > { %3156 = vmatpush.bf16.msra.mxu1 %v4075_v47  ;;  %v4634_v43 = vld [vmem:[%s7410_s28 + $0x5c8] sm:$0xf]  ;;  %v5131_v45 = vld [vmem:[%s7410_s28 + $0x5d4] sm:$0xf0]  ;;  %v4507_v50 = vor.u32 %v5099_v41, %v4506_v38 }
 0x2d8   : > { %3169 = vmatpush.bf16.msra.mxu2 %v4203_v48  ;;  %v4762_v46 = vld [vmem:[%s7410_s28 + $0x6c8] sm:$0xf]  ;;  %v5163_v47 = vld [vmem:[%s7410_s28 + $0x6d4] sm:$0xf0]  ;;  %v4635_v51 = vor.u32 %v5131_v45, %v4634_v43 }
 0x2d9   : > { %3182 = vmatpush.bf16.msra.mxu3 %v4331_v52  ;;  %v4890_v48 = vld [vmem:[%s7410_s28 + $0x7c8] sm:$0xf]  ;;  %v5195_v49 = vld [vmem:[%s7410_s28 + $0x7d4] sm:$0xf0]  ;;  %v4763_v52 = vor.u32 %v5163_v47, %v4762_v46 }
 0x2da   : > { %3144 = vmatpush.bf16.msra.mxu0 %v3931_v58  ;;  %v4490_v53 = vld [vmem:[%s7410_s28 + $0x4a8] sm:$0xf]  ;;  %v5095_v54 = vld [vmem:[%s7410_s28 + $0x4b4] sm:$0xf0]  ;;  %v4891_v56 = vor.u32 %v5195_v49, %v4890_v48 }
 0x2db   : > { %3157 = vmatpush.bf16.msra.mxu1 %v4059_v59  ;;  %v4618_v55 = vld [vmem:[%s7410_s28 + $0x5a8] sm:$0xf]  ;;  %v5127_v57 = vld [vmem:[%s7410_s28 + $0x5b4] sm:$0xf0]  ;;  %v4491_v62 = vor.u32 %v5095_v54, %v4490_v53 }
 0x2dc   : > { %3170 = vmatpush.bf16.msra.mxu2 %v4187_v60  ;;  %v4746_v58 = vld [vmem:[%s7410_s28 + $0x6a8] sm:$0xf]  ;;  %v5159_v59 = vld [vmem:[%s7410_s28 + $0x6b4] sm:$0xf0]  ;;  %v4619_v63 = vor.u32 %v5127_v57, %v4618_v55 }
 0x2dd   : > { %3183 = vmatpush.bf16.msra.mxu3 %v4315_v0  ;;  %v4874_v60 = vld [vmem:[%s7410_s28 + $0x7a8] sm:$0xf]  ;;  %v5191_v61 = vld [vmem:[%s7410_s28 + $0x7b4] sm:$0xf0]  ;;  %v4747_v0 = vor.u32 %v5159_v59, %v4746_v58 }
 0x2de   : > { %3145 = vmatpush.bf16.msra.mxu0 %v3915_v6  ;;  %v4474_v1 = vld [vmem:[%s7410_s28 + $0x488] sm:$0xf]  ;;  %v5091_v2 = vld [vmem:[%s7410_s28 + $0x494] sm:$0xf0]  ;;  %v4875_v4 = vor.u32 %v5191_v61, %v4874_v60 }
 0x2df   : > { %3158 = vmatpush.bf16.msra.mxu1 %v4043_v9  ;;  %v4602_v3 = vld [vmem:[%s7410_s28 + $0x588] sm:$0xf]  ;;  %v5123_v5 = vld [vmem:[%s7410_s28 + $0x594] sm:$0xf0] }
 0x2e0   : > { %3171 = vmatpush.bf16.msra.mxu2 %v4171_v10  ;;  %v4730_v6 = vld [vmem:[%s7410_s28 + $0x688] sm:$0xf]  ;;  %v5155_v7 = vld [vmem:[%s7410_s28 + $0x694] sm:$0xf0]  ;;  %v4475_v10 = vor.u32 %v5091_v2, %v4474_v1  ;;  %v4603_v11 = vor.u32 %v5123_v5, %v4602_v3 }
 0x2e1   : > { %3184 = vmatpush.bf16.msra.mxu3 %v4299_v14  ;;  %v4858_v8 = vld [vmem:[%s7410_s28 + $0x788] sm:$0xf]  ;;  %v5187_v9 = vld [vmem:[%s7410_s28 + $0x794] sm:$0xf0]  ;;  %v4731_v12 = vor.u32 %v5155_v7, %v4730_v6 }
 0x2e2   : > { %3146 = vmatpush.bf16.msra.mxu0 %v3899_v21  ;;  %v4458_v13 = vld [vmem:[%s7410_s28 + $0x468] sm:$0xf]  ;;  %v5087_v14 = vld [vmem:[%s7410_s28 + $0x474] sm:$0xf0]  ;;  %v4859_v16 = vor.u32 %v5187_v9, %v4858_v8  ;;  %v4973_v8 = vld [vmem:[%s7410_s28 + $0xec] sm:$0xf] }
 0x2e3   : > { %3159 = vmatpush.bf16.msra.mxu1 %v4027_v27  ;;  %v4586_v15 = vld [vmem:[%s7410_s28 + $0x568] sm:$0xf]  ;;  %v5119_v17 = vld [vmem:[%s7410_s28 + $0x574] sm:$0xf0]  ;;  %v4459_v22 = vor.u32 %v5087_v14, %v4458_v13  ;;  %v4012_v9 = vld [vmem:[%s7410_s28 + $0xf8] sm:$0xf0] }
 0x2e4   : > { %3172 = vmatpush.bf16.msra.mxu2 %v4155_v28  ;;  %v4714_v18 = vld [vmem:[%s7410_s28 + $0x668] sm:$0xf]  ;;  %v5151_v19 = vld [vmem:[%s7410_s28 + $0x674] sm:$0xf0]  ;;  %v4587_v24 = vor.u32 %v5119_v17, %v4586_v15  ;;  %v4140_v13 = vld [vmem:[%s7410_s28 + $0x1f8] sm:$0xf0] }
 0x2e5   : > { %3185 = vmatpush.bf16.msra.mxu3 %v4283_v33  ;;  %3147 = vmatmul.bf16.vlgmr.msra.gmra.mxu0 %v7519_v26  ;;  %v4842_v20 = vld [vmem:[%s7410_s28 + $0x768] sm:$0xf]  ;;  %v5183_v21 = vld [vmem:[%s7410_s28 + $0x774] sm:$0xf0]  ;;  %v4715_v27 = vor.u32 %v5151_v19, %v4714_v18  ;;  %v5037_v14 = vld [vmem:[%s7410_s28 + $0x2ec] sm:$0xf] }
 0x2e6   : > { %3191 = vmatpush.bf16.msrb.mxu0 %v4523_v34  ;;  %3160 = vmatmul.bf16.vlgmr.msra.gmra.mxu1 %v7525_v32  ;;  %v4442_v23 = vld [vmem:[%s7410_s28 + $0x448] sm:$0xf]  ;;  %v5083_v28 = vld [vmem:[%s7410_s28 + $0x454] sm:$0xf0]  ;;  %v4843_v33 = vor.u32 %v5183_v21, %v4842_v20  ;;  %v4268_v15 = vld [vmem:[%s7410_s28 + $0x2f8] sm:$0xf0] }
 0x2e7   : > { %3204 = vmatpush.bf16.msrb.mxu1 %v4651_v35  ;;  %3173 = vmatmul.bf16.vlgmr.msra.gmra.mxu2 %v7517_v25  ;;  %v4570_v29 = vld [vmem:[%s7410_s28 + $0x548] sm:$0xf]  ;;  %v7830_v30 = vld [vmem:[%s1344_s18] sm:$0xf]  ;;  %v4443_v43 = vor.u32 %v5083_v28, %v4442_v23  ;;  %v5069_v19 = vld [vmem:[%s7410_s28 + $0x3ec] sm:$0xf] }
 0x2e8   : > { %3217 = vmatpush.bf16.msrb.mxu2 %v4779_v37  ;;  %3186 = vmatmul.bf16.vlgmr.msra.gmra.mxu3 %v7523_v31  ;;  %v5115_v34 = vld [vmem:[%s7410_s28 + $0x554] sm:$0xf0]  ;;  %v4698_v35 = vld [vmem:[%s7410_s28 + $0x648] sm:$0xf]  ;;  %v4396_v20 = vld [vmem:[%s7410_s28 + $0x3f8] sm:$0xf0] }
 0x2e9   : > { %3230 = vmatpush.bf16.msrb.mxu3 %v4907_v44  ;;  %v5147_v37 = vld [vmem:[%s7410_s28 + $0x654] sm:$0xf0]  ;;  %v4826_v38 = vld [vmem:[%s7410_s28 + $0x748] sm:$0xf]  ;;  %v1643_v44 = vperm.slane %v7830_v30, 0  ;;  %v4571_v45 = vor.u32 %v5115_v34, %v4570_v29 }
 0x2ea   : > { %3192 = vmatpush.bf16.msrb.mxu0 %v4507_v50  ;;  %v5179_v41 = vld [vmem:[%s7410_s28 + $0x754] sm:$0xf0]  ;;  %v4699_v46 = vor.u32 %v5147_v37, %v4698_v35  ;;  %v4426_v47 = vld [vmem:[%s7410_s28 + $0x428] sm:$0xf]  ;;  %v4969_v28 = vld [vmem:[%s7410_s28 + $0xcc] sm:$0xf]  ;;  %v4399_v37 = vor.u32 %v5069_v19, %v4396_v20 }
 0x2eb   : > { %3205 = vmatpush.bf16.msrb.mxu1 %v4635_v51  ;;  %v5079_v48 = vld [vmem:[%s7410_s28 + $0x434] sm:$0xf0]  ;;  %v4554_v49 = vld [vmem:[%s7410_s28 + $0x528] sm:$0xf]  ;;  %v4827_v50 = vor.u32 %v5179_v41, %v4826_v38  ;;  %v3996_v29 = vld [vmem:[%s7410_s28 + $0xd8] sm:$0xf0] }
 0x2ec   : > { %3218 = vmatpush.bf16.msrb.mxu2 %v4763_v52  ;;  %v5111_v51 = vld [vmem:[%s7410_s28 + $0x534] sm:$0xf0]  ;;  %v4682_v52 = vld [vmem:[%s7410_s28 + $0x628] sm:$0xf]  ;;  %v4427_v57 = vor.u32 %v5079_v48, %v4426_v47  ;;  %v4124_v38 = vld [vmem:[%s7410_s28 + $0x1d8] sm:$0xf0]  ;;  %v3999_v47 = vor.u32 %v4969_v28, %v3996_v29 }
 0x2ed   : > { %3231 = vmatpush.bf16.msrb.mxu3 %v4891_v56  ;;  %v5143_v53 = vld [vmem:[%s7410_s28 + $0x634] sm:$0xf0]  ;;  %v4810_v54 = vld [vmem:[%s7410_s28 + $0x728] sm:$0xf]  ;;  %v5033_v41 = vld [vmem:[%s7410_s28 + $0x2cc] sm:$0xf] }
 0x2ee   : > { %3193 = vmatpush.bf16.msrb.mxu0 %v4491_v62  ;;  %v5175_v55 = vld [vmem:[%s7410_s28 + $0x734] sm:$0xf0]  ;;  %v4410_v58 = vld [vmem:[%s7410_s28 + $0x408] sm:$0xf]  ;;  %v4555_v62 = vor.u32 %v5111_v51, %v4554_v49  ;;  %v3980_v51 = vld [vmem:[%s7410_s28 + $0xb8] sm:$0xf0] }
 0x2ef   : > { %3206 = vmatpush.bf16.msrb.mxu1 %v4619_v63  ;;  %v5075_v59 = vld [vmem:[%s7410_s28 + $0x414] sm:$0xf0]  ;;  %v4683_v63 = vor.u32 %v5143_v53, %v4682_v52  ;;  %v4666_v2 = vld [vmem:[%s7410_s28 + $0x608] sm:$0xf]  ;;  %v4811_v3 = vor.u32 %v5175_v55, %v4810_v54  ;;  %v4997_v52 = vld [vmem:[%s7410_s28 + $0x1ac] sm:$0xf] }
 0x2f0   : > { %3219 = vmatpush.bf16.msrb.mxu2 %v4747_v0  ;;  %v4538_v0 = vld [vmem:[%s7410_s28 + $0x508] sm:$0xf]  ;;  %v5107_v1 = vld [vmem:[%s7410_s28 + $0x514] sm:$0xf0]  ;;  %v4108_v55 = vld [vmem:[%s7410_s28 + $0x1b8] sm:$0xf0] }
 0x2f1   : > { %3232 = vmatpush.bf16.msrb.mxu3 %v4875_v4  ;;  %v5139_v4 = vld [vmem:[%s7410_s28 + $0x614] sm:$0xf0]  ;;  %v4794_v5 = vld [vmem:[%s7410_s28 + $0x708] sm:$0xf]  ;;  %v4539_v17 = vor.u32 %v5107_v1, %v4538_v0  ;;  %v4961_v0 = vld [vmem:[%s7410_s28 + $0x8c] sm:$0xf] }
 0x2f2   : > { %3194 = vmatpush.bf16.msrb.mxu0 %v4475_v10  ;;  %v5171_v6 = vld [vmem:[%s7410_s28 + $0x714] sm:$0xf0]  ;;  %v5005_v10 = vld [vmem:[%s7410_s28 + $0x1ec] sm:$0xf]  ;;  %v4667_v18 = vor.u32 %v5139_v4, %v4666_v2  ;;  %v3964_v1 = vld [vmem:[%s7410_s28 + $0x98] sm:$0xf0] }
 0x2f3   : > { %3207 = vmatpush.bf16.msrb.mxu1 %v4603_v11  ;;  %v2940_v56 = vpop.f32.mrf.mxu0  ;;  %v4795_v21 = vor.u32 %v5171_v6, %v4794_v5  ;;  %v4993_v2 = vld [vmem:[%s7410_s28 + $0x18c] sm:$0xf]  ;;  %v4092_v4 = vld [vmem:[%s7410_s28 + $0x198] sm:$0xf0] }
 0x2f4   : > { %3220 = vmatpush.bf16.msrb.mxu2 %v4731_v12  ;;  %v2941_v60 = vadd.f32 %v2940_v56, %v1643_v44  ;;  %v2953_v61 = vpop.f32.mrf.mxu1  ;;  %v4411_v12 = vor.u32 %v5075_v59, %v4410_v58  ;;  %v5029_v56 = vld [vmem:[%s7410_s28 + $0x2ac] sm:$0xf]  ;;  %v4364_v59 = vld [vmem:[%s7410_s28 + $0x3b8] sm:$0xf0] }
 0x2f5   : > { %3233 = vmatpush.bf16.msrb.mxu3 %v4859_v16  ;;  %v5061_v58 = vld [vmem:[%s7410_s28 + $0x3ac] sm:$0xf]  ;;  %v4220_v6 = vld [vmem:[%s7410_s28 + $0x298] sm:$0xf0] }
 0x2f6   : > { %3195 = vmatpush.bf16.msrb.mxu0 %v4459_v22  ;;  %v2954_v7 = vadd.f32 %v2953_v61, %v2941_v60  ;;  %v4015_v22 = vor.u32 %v4973_v8, %v4012_v9  ;;  %v5025_v5 = vld [vmem:[%s7410_s28 + $0x28c] sm:$0xf]  ;;  %v4348_v8 = vld [vmem:[%s7410_s28 + $0x398] sm:$0xf0]  ;;  %v3967_v9 = vor.u32 %v4961_v0, %v3964_v1 }
 0x2f7   : > { %3208 = vmatpush.bf16.msrb.mxu1 %v4587_v24  ;;  %v4143_v24 = vor.u32 %v5005_v10, %v4140_v13  ;;  %v4957_v13 = vld [vmem:[%s7410_s28 + $0x6c] sm:$0xf]  ;;  %v4076_v19 = vld [vmem:[%s7410_s28 + $0x178] sm:$0xf0] }
 0x2f8   : > { %3221 = vmatpush.bf16.msrb.mxu2 %v4715_v27  ;;  %v4271_v27 = vor.u32 %v5037_v14, %v4268_v15  ;;  %v3948_v14 = vld [vmem:[%s7410_s28 + $0x78] sm:$0xf0]  ;;  %v4989_v15 = vld [vmem:[%s7410_s28 + $0x16c] sm:$0xf] }
 0x2f9   : > { %3234 = vmatpush.bf16.msrb.mxu3 %v4843_v33  ;;  %v2966_v11 = vpop.f32.mrf.mxu2  ;;  %v5001_v33 = vld [vmem:[%s7410_s28 + $0x1cc] sm:$0xf]  ;;  %v4079_v28 = vor.u32 %v4989_v15, %v4076_v19  ;;  %v4524_v15 = vld [vmem:[%s7410_s28 + $0x4f8] sm:$0xf0] }
 0x2fa   : > { %3196 = vmatpush.bf16.msrb.mxu0 %v4443_v43  ;;  %v2967_v16 = vadd.f32 %v2966_v11, %v2954_v7  ;;  %v2979_v23 = vpop.f32.mrf.mxu3  ;;  %v4252_v43 = vld [vmem:[%s7410_s28 + $0x2d8] sm:$0xf0]  ;;  %v4127_v48 = vor.u32 %v5001_v33, %v4124_v38  ;;  %v5057_v7 = vld [vmem:[%s7410_s28 + $0x38c] sm:$0xf]  ;;  %v4095_v11 = vor.u32 %v4993_v2, %v4092_v4 }
 0x2fb   : > { %3209 = vmatpush.bf16.msrb.mxu1 %v4571_v45  ;;  %v2942_v35 = vpop.f32.mrf.mxu0  ;;  %v5065_v45 = vld [vmem:[%s7410_s28 + $0x3cc] sm:$0xf]  ;;  %v4255_v49 = vor.u32 %v5033_v41, %v4252_v43  ;;  %v4060_v41 = vld [vmem:[%s7410_s28 + $0x158] sm:$0xf0] }
 0x2fc   : > { %3222 = vmatpush.bf16.msrb.mxu2 %v4699_v46  ;;  %v2980_v34 = vadd.f32 %v2979_v23, %v2967_v16  ;;  %v2955_v44 = vpop.f32.mrf.mxu1  ;;  %v4380_v46 = vld [vmem:[%s7410_s28 + $0x3d8] sm:$0xf0]  ;;  %v5021_v20 = vld [vmem:[%s7410_s28 + $0x26c] sm:$0xf] }
 0x2fd   : > { %3235 = vmatpush.bf16.msrb.mxu3 %v4827_v50  ;;  %v4965_v50 = vld [vmem:[%s7410_s28 + $0xac] sm:$0xf]  ;;  %v4383_v54 = vor.u32 %v5065_v45, %v4380_v46  ;;  %v4332_v23 = vld [vmem:[%s7410_s28 + $0x378] sm:$0xf0] }
 0x2fe   : > { %3197 = vmatpush.bf16.msrb.mxu0 %v4427_v57  ;;  %v4236_v57 = vld [vmem:[%s7410_s28 + $0x2b8] sm:$0xf0]  ;;  %v3983_v60 = vor.u32 %v4965_v50, %v3980_v51  ;;  %v4953_v33 = vld [vmem:[%s7410_s28 + $0x4c] sm:$0xf] }
 0x2ff   : > { %3210 = vmatpush.bf16.msrb.mxu1 %v4555_v62  ;;  %v4111_v62 = vor.u32 %v4997_v52, %v4108_v55  ;;  %v4985_v35 = vld [vmem:[%s7410_s28 + $0x14c] sm:$0xf]  ;;  %v4188_v44 = vld [vmem:[%s7410_s28 + $0x258] sm:$0xf0] }
 0x300   : > { %3223 = vmatpush.bf16.msrb.mxu2 %v4683_v63  ;;  %v4239_v63 = vor.u32 %v5029_v56, %v4236_v57  ;;  %v5017_v43 = vld [vmem:[%s7410_s28 + $0x24c] sm:$0xf]  ;;  %v4063_v52 = vor.u32 %v4985_v35, %v4060_v41  ;;  %v3916_v55 = vld [vmem:[%s7410_s28 + $0x38] sm:$0xf0] }
 0x301   : > { %3236 = vmatpush.bf16.msrb.mxu3 %v4811_v3  ;;  %v2968_v53 = vpop.f32.mrf.mxu2  ;;  %v4367_v3 = vor.u32 %v5061_v58, %v4364_v59  ;;  %v4981_v56 = vld [vmem:[%s7410_s28 + $0x12c] sm:$0xf]  ;;  %v4044_v59 = vld [vmem:[%s7410_s28 + $0x138] sm:$0xf0] }
 0x302   : > { %3198 = vmatpush.bf16.msrb.mxu0 %v4411_v12  ;;  %v2981_v61 = vpop.f32.mrf.mxu3  ;;  %v4223_v12 = vor.u32 %v5025_v5, %v4220_v6  ;;  %v4191_v53 = vor.u32 %v5017_v43, %v4188_v44  ;;  %v4945_v1 = vld [vmem:[%s7410_s28 + $0xc] sm:$0xf]  ;;  %v3900_v2 = vld [vmem:[%s7410_s28 + $0x18] sm:$0xf0] }
 0x303   : > { %3211 = vmatpush.bf16.msrb.mxu1 %v4539_v17  ;;  %v4172_v61 = vld [vmem:[%s7410_s28 + $0x238] sm:$0xf0]  ;;  %v4977_v5 = vld [vmem:[%s7410_s28 + $0x10c] sm:$0xf] }
 0x304   : > { %3224 = vmatpush.bf16.msrb.mxu2 %v4667_v18  ;;  %v4351_v18 = vor.u32 %v5057_v7, %v4348_v8  ;;  %v4028_v6 = vld [vmem:[%s7410_s28 + $0x118] sm:$0xf0]  ;;  %v5009_v7 = vld [vmem:[%s7410_s28 + $0x20c] sm:$0xf] }
 0x305   : > { %3237 = vmatpush.bf16.msrb.mxu3 %v4795_v21  ;;  %3199 = vmatmul.bf16.vlgmr.msrb.gmra.mxu0 %v7576_v39  ;;  %v2992_v10 = vpop.f32.mrf.mxu0  ;;  %v4204_v21 = vld [vmem:[%s7410_s28 + $0x278] sm:$0xf0]  ;;  %v5165_v19 = vld [vmem:[%s7410_s28 + $0x6ec] sm:$0xf] }
 0x306   : > { %3243 = vmatpush.bf16.msra.mxu0 %v4015_v22  ;;  %3212 = vmatmul.bf16.vlgmr.msrb.gmra.mxu1 %v7580_v42  ;;  %v2993_v16 = vadd.f32 %v2992_v10, %v2980_v34  ;;  %v3005_v17 = vpop.f32.mrf.mxu1  ;;  %v5053_v22 = vld [vmem:[%s7410_s28 + $0x36c] sm:$0xf]  ;;  %v4207_v29 = vor.u32 %v5021_v20, %v4204_v21  ;;  %v3932_v34 = vld [vmem:[%s7410_s28 + $0x58] sm:$0xf0]  ;;  %v4031_v21 = vor.u32 %v4977_v5, %v4028_v6 }
 0x307   : > { %3256 = vmatpush.bf16.msra.mxu1 %v4143_v24  ;;  %3225 = vmatmul.bf16.vlgmr.msrb.gmra.mxu2 %v7572_v36  ;;  %v4335_v38 = vor.u32 %v5053_v22, %v4332_v23  ;;  %v4156_v10 = vld [vmem:[%s7410_s28 + $0x218] sm:$0xf0]  ;;  %v5197_v23 = vld [vmem:[%s7410_s28 + $0x7ec] sm:$0xf] }
 0x308   : > { %3269 = vmatpush.bf16.msra.mxu2 %v4271_v27  ;;  %3238 = vmatmul.bf16.vlgmr.msrb.gmra.mxu3 %v7578_v40  ;;  %v3006_v24 = vadd.f32 %v3005_v17, %v2993_v16  ;;  %v3951_v27 = vor.u32 %v4957_v13, %v3948_v14  ;;  %v5101_v14 = vld [vmem:[%s7410_s28 + $0x4ec] sm:$0xf]  ;;  %v3903_v17 = vor.u32 %v4945_v1, %v3900_v2  ;;  %v4780_v20 = vld [vmem:[%s7410_s28 + $0x6f8] sm:$0xf0] }
 0x309   : > { %3282 = vmatpush.bf16.msra.mxu3 %v4399_v37  ;;  %v5133_v16 = vld [vmem:[%s7410_s28 + $0x5ec] sm:$0xf]  ;;  %v4159_v22 = vor.u32 %v5009_v7, %v4156_v10  ;;  %v4508_v35 = vld [vmem:[%s7410_s28 + $0x4d8] sm:$0xf0] }
 0x30a   : > { %3244 = vmatpush.bf16.msra.mxu0 %v3999_v47  ;;  %v3018_v37 = vpop.f32.mrf.mxu2  ;;  %v5049_v47 = vld [vmem:[%s7410_s28 + $0x34c] sm:$0xf]  ;;  %v4636_v41 = vld [vmem:[%s7410_s28 + $0x5d8] sm:$0xf0] }
 0x30b   : > { %3257 = vmatpush.bf16.msra.mxu1 %v4127_v48  ;;  %v3019_v45 = vadd.f32 %v3018_v37, %v3006_v24  ;;  %v4316_v48 = vld [vmem:[%s7410_s28 + $0x358] sm:$0xf0]  ;;  %v5129_v37 = vld [vmem:[%s7410_s28 + $0x5cc] sm:$0xf] }
 0x30c   : > { %3270 = vmatpush.bf16.msra.mxu2 %v4255_v49  ;;  %v3935_v49 = vor.u32 %v4953_v33, %v3932_v34  ;;  %v4319_v58 = vor.u32 %v5049_v47, %v4316_v48  ;;  %v4908_v24 = vld [vmem:[%s7410_s28 + $0x7f8] sm:$0xf0]  ;;  %v4783_v33 = vor.u32 %v5165_v19, %v4780_v20  ;;  %v5097_v34 = vld [vmem:[%s7410_s28 + $0x4cc] sm:$0xf]  ;;  %v4639_v48 = vor.u32 %v5129_v37, %v4636_v41 }
 0x30d   : > { %3283 = vmatpush.bf16.msra.mxu3 %v4383_v54  ;;  %v3031_v46 = vpop.f32.mrf.mxu3  ;;  %v2994_v51 = vpop.f32.mrf.mxu0  ;;  %v4949_v54 = vld [vmem:[%s7410_s28 + $0x2c] sm:$0xf]  ;;  %v4764_v44 = vld [vmem:[%s7410_s28 + $0x6d8] sm:$0xf0]  ;;  %v4511_v47 = vor.u32 %v5097_v34, %v4508_v35 }
 0x30e   : > { %3245 = vmatpush.bf16.msra.mxu0 %v3983_v60  ;;  %v7906_v50 = vadd.f32 %v3031_v46, %v3019_v45  ;;  %v3007_v57 = vpop.f32.mrf.mxu1  ;;  %v5013_v60 = vld [vmem:[%s7410_s28 + $0x22c] sm:$0xf]  ;;  %v3919_v0 = vor.u32 %v4949_v54, %v3916_v55  ;;  %v4892_v46 = vld [vmem:[%s7410_s28 + $0x7d8] sm:$0xf0] }
 0x30f   : > { %3258 = vmatpush.bf16.msra.mxu1 %v4111_v62  ;;  %v5045_v62 = vld [vmem:[%s7410_s28 + $0x32c] sm:$0xf]  ;;  %v4175_v4 = vor.u32 %v5013_v60, %v4172_v61  ;;  %v4620_v55 = vld [vmem:[%s7410_s28 + $0x5b8] sm:$0xf0] }
 0x310   : > { %3271 = vmatpush.bf16.msra.mxu2 %v4239_v63  ;;  %v4300_v63 = vld [vmem:[%s7410_s28 + $0x338] sm:$0xf0]  ;;  %v5161_v43 = vld [vmem:[%s7410_s28 + $0x6cc] sm:$0xf] }
 0x311   : > { %3284 = vmatpush.bf16.msra.mxu3 %v4367_v3  ;;  %v4047_v3 = vor.u32 %v4981_v56, %v4044_v59  ;;  %v5193_v45 = vld [vmem:[%s7410_s28 + $0x7cc] sm:$0xf]  ;;  %v4748_v57 = vld [vmem:[%s7410_s28 + $0x6b8] sm:$0xf0] }
 0x312   : > { %3246 = vmatpush.bf16.msra.mxu0 %v3967_v9  ;;  %v3020_v8 = vpop.f32.mrf.mxu2  ;;  %v4303_v9 = vor.u32 %v5045_v62, %v4300_v63  ;;  %v5093_v51 = vld [vmem:[%s7410_s28 + $0x4ac] sm:$0xf]  ;;  %v4895_v54 = vor.u32 %v5193_v45, %v4892_v46  ;;  %v4876_v59 = vld [vmem:[%s7410_s28 + $0x7b8] sm:$0xf0] }
 0x313   : > { %3259 = vmatpush.bf16.msra.mxu1 %v4095_v11  ;;  %v5041_v11 = vld [vmem:[%s7410_s28 + $0x30c] sm:$0xf]  ;;  %v4476_v63 = vld [vmem:[%s7410_s28 + $0x498] sm:$0xf0] }
 0x314   : > { %3272 = vmatpush.bf16.msra.mxu2 %v4223_v12  ;;  %v4284_v12 = vld [vmem:[%s7410_s28 + $0x318] sm:$0xf0]  ;;  %v5157_v56 = vld [vmem:[%s7410_s28 + $0x6ac] sm:$0xf] }
 0x315   : > { %3285 = vmatpush.bf16.msra.mxu3 %v4351_v18  ;;  %v3033_v13 = vpop.f32.mrf.mxu3  ;;  %v4652_v18 = vld [vmem:[%s7410_s28 + $0x5f8] sm:$0xf0]  ;;  %v4751_v62 = vor.u32 %v5157_v56, %v4748_v57  ;;  %v5153_v2 = vld [vmem:[%s7410_s28 + $0x68c] sm:$0xf] }
 0x316   : > { %3247 = vmatpush.bf16.msra.mxu0 %v3951_v27  ;;  %v4287_v27 = vor.u32 %v5041_v11, %v4284_v12  ;;  %v4604_v1 = vld [vmem:[%s7410_s28 + $0x598] sm:$0xf0]  ;;  %v5117_v11 = vld [vmem:[%s7410_s28 + $0x56c] sm:$0xf] }
 0x317   : > { %3260 = vmatpush.bf16.msra.mxu1 %v4079_v28  ;;  %v4527_v28 = vor.u32 %v5101_v14, %v4524_v15  ;;  %v4460_v10 = vld [vmem:[%s7410_s28 + $0x478] sm:$0xf0]  ;;  %v5145_v35 = vld [vmem:[%s7410_s28 + $0x64c] sm:$0xf] }
 0x318   : > { %3273 = vmatpush.bf16.msra.mxu2 %v4207_v29  ;;  %v4655_v29 = vor.u32 %v5133_v16, %v4652_v18  ;;  %v4588_v15 = vld [vmem:[%s7410_s28 + $0x578] sm:$0xf0]  ;;  %v5149_v16 = vld [vmem:[%s7410_s28 + $0x66c] sm:$0xf] }
 0x319   : > { %3286 = vmatpush.bf16.msra.mxu3 %v4335_v38  ;;  %v4911_v38 = vor.u32 %v5197_v23, %v4908_v24  ;;  %v5181_v18 = vld [vmem:[%s7410_s28 + $0x76c] sm:$0xf]  ;;  %v4844_v19 = vld [vmem:[%s7410_s28 + $0x778] sm:$0xf0] }
 0x31a   : > { %3248 = vmatpush.bf16.msra.mxu0 %v3935_v49  ;;  %v4767_v49 = vor.u32 %v5161_v43, %v4764_v44  ;;  %v5081_v24 = vld [vmem:[%s7410_s28 + $0x44c] sm:$0xf]  ;;  %v4572_v34 = vld [vmem:[%s7410_s28 + $0x558] sm:$0xf0] }
 0x31b   : > { %3261 = vmatpush.bf16.msra.mxu1 %v4063_v52  ;;  %v4492_v52 = vld [vmem:[%s7410_s28 + $0x4b8] sm:$0xf0]  ;;  %v5177_v43 = vld [vmem:[%s7410_s28 + $0x74c] sm:$0xf] }
 0x31c   : > { %3274 = vmatpush.bf16.msra.mxu2 %v4191_v53  ;;  %v5125_v53 = vld [vmem:[%s7410_s28 + $0x5ac] sm:$0xf]  ;;  %v4495_v60 = vor.u32 %v5093_v51, %v4492_v52  ;;  %v4700_v37 = vld [vmem:[%s7410_s28 + $0x658] sm:$0xf0] }
 0x31d   : > { %3287 = vmatpush.bf16.msra.mxu3 %v4319_v58  ;;  %v5189_v58 = vld [vmem:[%s7410_s28 + $0x7ac] sm:$0xf]  ;;  %v4623_v61 = vor.u32 %v5125_v53, %v4620_v55  ;;  %v4828_v44 = vld [vmem:[%s7410_s28 + $0x758] sm:$0xf0] }
 0x31e   : > { %3249 = vmatpush.bf16.msra.mxu0 %v3919_v0  ;;  %v1644_v0 = vperm.slane %v7830_v30, 1  ;;  %v5077_v51 = vld [vmem:[%s7410_s28 + $0x42c] sm:$0xf]  ;;  %v4428_v52 = vld [vmem:[%s7410_s28 + $0x438] sm:$0xf0]  ;;  %v4831_v55 = vor.u32 %v5177_v43, %v4828_v44 }
 0x31f   : > { %3262 = vmatpush.bf16.msra.mxu1 %v4047_v3  ;;  %v4732_v3 = vld [vmem:[%s7410_s28 + $0x698] sm:$0xf0]  ;;  %v5109_v53 = vld [vmem:[%s7410_s28 + $0x52c] sm:$0xf] }
 0x320   : > { %3275 = vmatpush.bf16.msra.mxu2 %v4175_v4  ;;  %v5185_v4 = vld [vmem:[%s7410_s28 + $0x78c] sm:$0xf]  ;;  %v4735_v8 = vor.u32 %v5153_v2, %v4732_v3  ;;  %v4556_v56 = vld [vmem:[%s7410_s28 + $0x538] sm:$0xf0] }
 0x321   : > { %3288 = vmatpush.bf16.msra.mxu3 %v4303_v9  ;;  %v5085_v9 = vld [vmem:[%s7410_s28 + $0x46c] sm:$0xf]  ;;  %v4540_v2 = vld [vmem:[%s7410_s28 + $0x518] sm:$0xf0] }
 0x322   : > { %3250 = vmatpush.bf16.msra.mxu0 %v3903_v17  ;;  %v3044_v6 = vpop.f32.mrf.mxu0  ;;  %v4716_v17 = vld [vmem:[%s7410_s28 + $0x678] sm:$0xf0]  ;;  %v5141_v57 = vld [vmem:[%s7410_s28 + $0x62c] sm:$0xf] }
 0x323   : > { %3263 = vmatpush.bf16.msra.mxu1 %v4031_v21  ;;  %v3045_v12 = vadd.f32 %v3044_v6, %v1644_v0  ;;  %v3057_v13 = vpop.f32.mrf.mxu1  ;;  %v4463_v21 = vor.u32 %v5085_v9, %v4460_v10  ;;  %v4719_v23 = vor.u32 %v5149_v16, %v4716_v17  ;;  %v5105_v0 = vld [vmem:[%s7410_s28 + $0x50c] sm:$0xf]  ;;  %v4796_v6 = vld [vmem:[%s7410_s28 + $0x718] sm:$0xf0] }
 0x324   : > { %3276 = vmatpush.bf16.msra.mxu2 %v4159_v22  ;;  %v4591_v22 = vor.u32 %v5117_v11, %v4588_v15  ;;  %v5137_v3 = vld [vmem:[%s7410_s28 + $0x60c] sm:$0xf] }
 0x325   : > { %3289 = vmatpush.bf16.msra.mxu3 %v4287_v27  ;;  %3251 = vmatmul.bf16.vlgmr.msra.gmra.mxu0 %v7519_v26  ;;  %v4879_v26 = vor.u32 %v5189_v58, %v4876_v59  ;;  %v3058_v20 = vadd.f32 %v3057_v13, %v3045_v12  ;;  %v4444_v27 = vld [vmem:[%s7410_s28 + $0x458] sm:$0xf0]  ;;  %v5173_v59 = vld [vmem:[%s7410_s28 + $0x72c] sm:$0xf] }
 0x326   : > { %3295 = vmatpush.bf16.msrb.mxu0 %v4527_v28  ;;  %3264 = vmatmul.bf16.vlgmr.msra.gmra.mxu1 %v7525_v32  ;;  %v4860_v32 = vld [vmem:[%s7410_s28 + $0x798] sm:$0xf0]  ;;  %v5113_v28 = vld [vmem:[%s7410_s28 + $0x54c] sm:$0xf]  ;;  %v4447_v45 = vor.u32 %v5081_v24, %v4444_v27 }
 0x327   : > { %3308 = vmatpush.bf16.msrb.mxu1 %v4655_v29  ;;  %3277 = vmatmul.bf16.vlgmr.msra.gmra.mxu2 %v7517_v25  ;;  %v5089_v25 = vld [vmem:[%s7410_s28 + $0x48c] sm:$0xf]  ;;  %v4863_v14 = vor.u32 %v5185_v4, %v4860_v32  ;;  %v4684_v58 = vld [vmem:[%s7410_s28 + $0x638] sm:$0xf0] }
 0x328   : > { %3321 = vmatpush.bf16.msrb.mxu2 %v4783_v33  ;;  %3290 = vmatmul.bf16.vlgmr.msra.gmra.mxu3 %v7523_v31  ;;  %v5121_v31 = vld [vmem:[%s7410_s28 + $0x58c] sm:$0xf]  ;;  %v4479_v5 = vor.u32 %v5089_v25, %v4476_v63  ;;  %v4847_v33 = vor.u32 %v5181_v18, %v4844_v19  ;;  %v4431_v25 = vor.u32 %v5077_v51, %v4428_v52  ;;  %v4668_v4 = vld [vmem:[%s7410_s28 + $0x618] sm:$0xf0] }
 0x329   : > { %3334 = vmatpush.bf16.msrb.mxu3 %v4911_v38  ;;  %v4607_v7 = vor.u32 %v5121_v31, %v4604_v1  ;;  %v5073_v63 = vld [vmem:[%s7410_s28 + $0x40c] sm:$0xf]  ;;  %v4412_v31 = vld [vmem:[%s7410_s28 + $0x418] sm:$0xf0]  ;;  %v4671_v9 = vor.u32 %v5137_v3, %v4668_v4 }
 0x32a   : > { %3296 = vmatpush.bf16.msrb.mxu0 %v4511_v47  ;;  %v3070_v29 = vpop.f32.mrf.mxu2  ;;  %v3046_v47 = vpop.f32.mrf.mxu0 }
 0x32b   : > { %3309 = vmatpush.bf16.msrb.mxu1 %v4639_v48  ;;  %v3071_v38 = vadd.f32 %v3070_v29, %v3058_v20  ;;  %v3083_v41 = vpop.f32.mrf.mxu3  ;;  %v4575_v48 = vor.u32 %v5113_v28, %v4572_v34 }
 0x32c   : > { %3322 = vmatpush.bf16.msrb.mxu2 %v4767_v49  ;;  %v4703_v49 = vor.u32 %v5145_v35, %v4700_v37 }
 0x32d   : > { %3335 = vmatpush.bf16.msrb.mxu3 %v4895_v54  ;;  %v3084_v46 = vadd.f32 %v3083_v41, %v3071_v38  ;;  %v3059_v54 = vpop.f32.mrf.mxu1 }
 0x32e   : > { %3297 = vmatpush.bf16.msrb.mxu0 %v4495_v60  ;;  %v4812_v60 = vld [vmem:[%s7410_s28 + $0x738] sm:$0xf0] }
 0x32f   : > { %3310 = vmatpush.bf16.msrb.mxu1 %v4623_v61  ;;  %v4559_v61 = vor.u32 %v5109_v53, %v4556_v56  ;;  %v4815_v1 = vor.u32 %v5173_v59, %v4812_v60 }
 0x330   : > { %3323 = vmatpush.bf16.msrb.mxu2 %v4751_v62  ;;  %v4687_v62 = vor.u32 %v5141_v57, %v4684_v58  ;;  %v1646_v57 = vperm.slane %v7830_v30, 3 }
 0x331   : > { %3336 = vmatpush.bf16.msrb.mxu3 %v4879_v26 }
 0x332   : > { %3298 = vmatpush.bf16.msrb.mxu0 %v4479_v5  ;;  %v3072_v26 = vpop.f32.mrf.mxu2  ;;  %v5169_v5 = vld [vmem:[%s7410_s28 + $0x70c] sm:$0xf] }
 0x333   : > { %3311 = vmatpush.bf16.msrb.mxu1 %v4607_v7  ;;  %v3085_v32 = vpop.f32.mrf.mxu3  ;;  %v4415_v7 = vor.u32 %v5073_v63, %v4412_v31  ;;  %v4799_v10 = vor.u32 %v5169_v5, %v4796_v6 }
 0x334   : > { %3324 = vmatpush.bf16.msrb.mxu2 %v4735_v8  ;;  %v4543_v8 = vor.u32 %v5105_v0, %v4540_v2 }
 0x335   : > { %3337 = vmatpush.bf16.msrb.mxu3 %v4863_v14 }
 0x336   : > { %3299 = vmatpush.bf16.msrb.mxu0 %v4463_v21 }
 0x337   : > { %3312 = vmatpush.bf16.msrb.mxu1 %v4591_v22 }
 0x338   : > { %3325 = vmatpush.bf16.msrb.mxu2 %v4719_v23 }
 0x339   : > { %3338 = vmatpush.bf16.msrb.mxu3 %v4847_v33 }
 0x33a   : > { %3300 = vmatpush.bf16.msrb.mxu0 %v4447_v45 }
 0x33b   : > { %3313 = vmatpush.bf16.msrb.mxu1 %v4575_v48 }
 0x33c   : > { %3326 = vmatpush.bf16.msrb.mxu2 %v4703_v49 }
 0x33d   : > { %3339 = vmatpush.bf16.msrb.mxu3 %v4831_v55 }
 0x33e   : > { %3301 = vmatpush.bf16.msrb.mxu0 %v4431_v25 }
 0x33f   : > { %3314 = vmatpush.bf16.msrb.mxu1 %v4559_v61 }
 0x340   : > { %3327 = vmatpush.bf16.msrb.mxu2 %v4687_v62 }
 0x341   : > { %3340 = vmatpush.bf16.msrb.mxu3 %v4815_v1 }
 0x342   : > { %3302 = vmatpush.bf16.msrb.mxu0 %v4415_v7  ;;  %v3096_v11 = vpop.f32.mrf.mxu0 }
 0x343   : > { %3315 = vmatpush.bf16.msrb.mxu1 %v4543_v8  ;;  %v3097_v12 = vadd.f32 %v3096_v11, %v3084_v46  ;;  %v3109_v13 = vpop.f32.mrf.mxu1 }
 0x344   : > { %3328 = vmatpush.bf16.msrb.mxu2 %v4671_v9 }
 0x345   : > { %3341 = vmatpush.bf16.msrb.mxu3 %v4799_v10  ;;  %3303 = vmatmul.bf16.vlgmr.msrb.gmra.mxu0 %v7576_v39  ;;  %v3110_v14 = vadd.f32 %v3109_v13, %v3097_v12 }
 0x346   : > { %3316 = vmatmul.bf16.vlgmr.msrb.gmra.mxu1 %v7580_v42 }
 0x347   : > { %3329 = vmatmul.bf16.vlgmr.msrb.gmra.mxu2 %v7572_v36  ;;  %v1645_v36 = vperm.slane %v7830_v30, 2 }
 0x348   : > { %3342 = vmatmul.bf16.vlgmr.msrb.gmra.mxu3 %v7578_v40 }
 0x34a   : > { %v3122_v15 = vpop.f32.mrf.mxu2  ;;  %v3098_v19 = vpop.f32.mrf.mxu0 }
 0x34b   : > { %v3123_v16 = vadd.f32 %v3122_v15, %v3110_v14  ;;  %v3135_v17 = vpop.f32.mrf.mxu3  ;;  %v3111_v20 = vpop.f32.mrf.mxu1 }
 0x34d   : > { %v3136_v18 = vadd.f32 %v3135_v17, %v3123_v16 }
 0x34f   : > { %v3351_v21 = vrot.slane %v3136_v18, 6 }
 0x351   : > { %v3355_v39 = vsel %vm3354_vm0, %v7906_v50, %v3351_v21 }
 0x352   : > { %v3124_v22 = vpop.f32.mrf.mxu2 }
 0x353   : > { %v3137_v42 = vpop.f32.mrf.mxu3 }
 0x362   : > { %v3148_v23 = vpop.f32.mrf.mxu0 }
 0x363   : > { %v3149_v40 = vadd.f32 %v3148_v23, %v1645_v36  ;;  %v3161_v24 = vpop.f32.mrf.mxu1 }
 0x365   : > { %v3162_v27 = vadd.f32 %v3161_v24, %v3149_v40 }
 0x36a   : > { %v3174_v28 = vpop.f32.mrf.mxu2  ;;  %v3150_v35 = vpop.f32.mrf.mxu0 }
 0x36b   : > { %v3175_v29 = vadd.f32 %v3174_v28, %v3162_v27  ;;  %v3187_v33 = vpop.f32.mrf.mxu3  ;;  %v3163_v37 = vpop.f32.mrf.mxu1 }
 0x36d   : > { %v3188_v34 = vadd.f32 %v3187_v33, %v3175_v29 }
 0x372   : > { %v3176_v38 = vpop.f32.mrf.mxu2 }
 0x373   : > { %v3189_v41 = vpop.f32.mrf.mxu3 }
 0x382   : > { %v3200_v43 = vpop.f32.mrf.mxu0 }
 0x383   : > { %v3213_v44 = vpop.f32.mrf.mxu1  ;;  %v3201_v61 = vadd.f32 %v3200_v43, %v3188_v34 }
 0x385   : > { %v3214_v63 = vadd.f32 %v3213_v44, %v3201_v61 }
 0x38a   : > { %v3226_v45 = vpop.f32.mrf.mxu2  ;;  %v3202_v46 = vpop.f32.mrf.mxu0 }
 0x38b   : > { %v3239_v50 = vpop.f32.mrf.mxu3  ;;  %v3215_v47 = vpop.f32.mrf.mxu1  ;;  %v3227_v2 = vadd.f32 %v3226_v45, %v3214_v63 }
 0x38d   : > { %v3240_v32 = vadd.f32 %v3239_v50, %v3227_v2 }
 0x38f   : > { %v3352_v9 = vrot.slane %v3240_v32, 4 }
 0x392   : > { %v3228_v48 = vpop.f32.mrf.mxu2 }
 0x393   : > { %v3241_v49 = vpop.f32.mrf.mxu3 }
 0x3a2   : > { %v3252_v51 = vpop.f32.mrf.mxu0 }
 0x3a3   : > { %v3265_v52 = vpop.f32.mrf.mxu1  ;;  %v3253_v60 = vadd.f32 %v3252_v51, %v1646_v57 }
 0x3a5   : > { %v3266_v25 = vadd.f32 %v3265_v52, %v3253_v60 }
 0x3aa   : > { %v3278_v53 = vpop.f32.mrf.mxu2  ;;  %v3254_v55 = vpop.f32.mrf.mxu0 }
 0x3ab   : > { %v3291_v54 = vpop.f32.mrf.mxu3  ;;  %v3267_v56 = vpop.f32.mrf.mxu1  ;;  %v3279_v62 = vadd.f32 %v3278_v53, %v3266_v25 }
 0x3ad   : > { %v3292_v31 = vadd.f32 %v3291_v54, %v3279_v62 }
 0x3b2   : > { %v3280_v58 = vpop.f32.mrf.mxu2 }
 0x3b3   : > { %v3293_v59 = vpop.f32.mrf.mxu3 }
 0x3c2   : > { %v3304_v0 = vpop.f32.mrf.mxu0 }
 0x3c3   : > { %v3317_v26 = vpop.f32.mrf.mxu1  ;;  %v3305_v1 = vadd.f32 %v3304_v0, %v3292_v31 }
 0x3c5   : > { %v3318_v3 = vadd.f32 %v3317_v26, %v3305_v1 }
 0x3ca   : > { %v3330_v4 = vpop.f32.mrf.mxu2  ;;  %v3306_v7 = vpop.f32.mrf.mxu0 }
 0x3cb   : > { %v3331_v5 = vadd.f32 %v3330_v4, %v3318_v3  ;;  %v3343_v6 = vpop.f32.mrf.mxu3  ;;  %v3319_v30 = vpop.f32.mrf.mxu1 }
 0x3cd   : > { %v3344_v8 = vadd.f32 %v3343_v6, %v3331_v5 }
 0x3cf   : > { %v3353_v10 = vrot.slane %v3344_v8, 2  ;;  %3368 = sbr.rel (!%p5734_p6) target bundleno = 1128 (0x468), region = 88 }
 0x3d1   : > { %v3357_v11 = vsel %vm3356_vm1, %v3352_v9, %v3353_v10 }
 0x3d2   : > { %v3359_v12 = vsel %vm3358_vm2, %v3355_v39, %v3357_v11  ;;  %v3332_v13 = vpop.f32.mrf.mxu2 }
 0x3d3   : > { %3361 = vst [vmem:[%s8002_s20] sm:$0xff] %v3359_v12  ;;  %v3345_v14 = vpop.f32.mrf.mxu3 }
 0x3d4   : > { %s8343_s12 = smov (!%p3371_p9, %s3370_s12), 4 }
 0x3d5   : > { %s8014_s26 = sshll.u32 %s8343_s12, 1 }
 0x3d6   : > { %p4918_p10 = scmp.eq.s32.totalorder %s8014_s26, 0 }
 0x3d7   : > { %p3383_p11 = scmp.lt.u32.totalorder (!%p4918_p10), %s8014_s26, 8 }
 0x3d8   : > { %3382 = sbr.rel (%p4918_p10) target bundleno = 1128 (0x468), region = 92 }
 0x3dd   : > { %3386 = sbr.rel (%p3383_p11) target bundleno = 1119 (0x45f), region = 96  ;;  %s8019_s21 = sand.u32 (!%p3383_p11), 7, %s8014_s26  }
 0x3de   : > { %p3403_p6 = scmp.eq.s32.totalorder (!%p3383_p11), %s8019_s21, 0  ;;  %p4919_p12 = scmp.ne.s32.totalorder (!%p3383_p11), %s8019_s21, 0 }
 0x3e2   : > { %3406 = sbr.rel (%p4919_p12) target bundleno = 1054 (0x41e), region = 111  ;;  %s3407_s14 = sshrl.u32 (!%p4919_p12), %s8014_s26, 3 }
 0x3e3   : > { %s8026_s5 = sshrl.u32 (!%p4919_p12), %s3407_s14, 5 }
 0x3e4   : > { %p4920_p13 = scmp.le.s32.totalorder (!%p4919_p12), %s8026_s5, 0 }
 0x3e7   : > { %3767 = sbr.rel (%p4920_p13) target bundleno = 1037 (0x40d), region = 236  ;;  %s8320_s27 = smov (!%p4920_p13), %s8012_s25 }
 0x3e8   : > { %s8321_s28 = smov (!%p4920_p13), %s8002_s20  ;;  %s8035_s30 = smov (!%p4920_p13), 0  }
 0x3e9   : > { %s8037_s6 = smov (!%p4920_p13), 0  }
 0x3ec LB: >> { %v3418_v15 = vld [vmem:[%s5617_s28] sm:$0xff]  ;;  %v3420_v16 = vld [vmem:[%s5617_s28 + $0x8] sm:$0xff]  ;;  %v3422_v17 = vld [vmem:[%s5617_s28 + $0x10] sm:$0xff]  ;;  %s3482_s29 = sadd.s32 1, %s5621_s30  ;;  %s3412_s6 = sadd.s32 1, %s5625_s6   ;;  %s5625_s6 = sphi %s8037_s6, %s3412_s6   ;;  %s5621_s30 = sphi %s8035_s30, %s8324_s30   ;;  %s5617_s28 = sphi %s8321_s28, %s8323_s28   ;;  %s5613_s27 = sphi %s8320_s27, %s8322_s27  }
 0x3ed   : >> { %3419 = vst [vmem:[%s5613_s27] sm:$0xff] %v3418_v15  ;;  %v3424_v18 = vld [vmem:[%s5617_s28 + $0x18] sm:$0xff]  ;;  %p3483_p0 = scmp.ge.s32.totalorder %s3482_s29, %s8026_s5  ;;  %v3426_v19 = vld [vmem:[%s5617_s28 + $0x20] sm:$0xff]  ;;  %v3428_v20 = vld [vmem:[%s5617_s28 + $0x28] sm:$0xff]  ;;  %p3411_p1 = scmp.ge.s32.totalorder %s3412_s6, %s8026_s5 }
 0x3ee   : >> { %3421 = vst [vmem:[%s5613_s27 + $0x8] sm:$0xff] %v3420_v16  ;;  %v3430_v21 = vld [vmem:[%s5617_s28 + $0x30] sm:$0xff]  ;;  %v3432_v39 = vld [vmem:[%s5617_s28 + $0x38] sm:$0xff]  ;;  %v3434_v22 = vld [vmem:[%s5617_s28 + $0x40] sm:$0xff] }
 0x3ef   : >> { %3423 = vst [vmem:[%s5613_s27 + $0x10] sm:$0xff] %v3422_v17  ;;  %s8345_s29 = smov (%p3483_p0, %s3482_s29), 0  ;;  %v3436_v42 = vld [vmem:[%s5617_s28 + $0x48] sm:$0xff]  ;;  %v3438_v36 = vld [vmem:[%s5617_s28 + $0x50] sm:$0xff]  ;;  %v3440_v23 = vld [vmem:[%s5617_s28 + $0x58] sm:$0xff] }
 0x3f0   : >> { %3425 = vst [vmem:[%s5613_s27 + $0x18] sm:$0xff] %v3424_v18  ;;  %s4921_s4 = sshll.u32 %s8345_s29, 8  ;;  %v3442_v40 = vld [vmem:[%s5617_s28 + $0x60] sm:$0xff]  ;;  %v3444_v24 = vld [vmem:[%s5617_s28 + $0x68] sm:$0xff]  ;;  %v3446_v27 = vld [vmem:[%s5617_s28 + $0x70] sm:$0xff]  ;;  %s8324_s30 = smov %s8345_s29 }
 0x3f1   : >> { %3427 = vst [vmem:[%s5613_s27 + $0x20] sm:$0xff] %v3426_v19  ;;  %s8069_s8 = scalar_lea.vmem %s8002_s20, %s4921_s4 [#allocation3]   ;;  %s8072_s9 = scalar_lea.vmem %s8012_s25, %s4921_s4   ;;  %v3448_v28 = vld [vmem:[%s5617_s28 + $0x78] sm:$0xff]  ;;  %v3450_v29 = vld [vmem:[%s5617_s28 + $0x80] sm:$0xff]  ;;  %v3452_v33 = vld [vmem:[%s5617_s28 + $0x88] sm:$0xff] }
 0x3f2   : >> { %3429 = vst [vmem:[%s5613_s27 + $0x28] sm:$0xff] %v3428_v20  ;;  %v3454_v34 = vld [vmem:[%s5617_s28 + $0x90] sm:$0xff]  ;;  %v3456_v35 = vld [vmem:[%s5617_s28 + $0x98] sm:$0xff]  ;;  %v3458_v37 = vld [vmem:[%s5617_s28 + $0xa0] sm:$0xff] }
 0x3f3   : >> { %3431 = vst [vmem:[%s5613_s27 + $0x30] sm:$0xff] %v3430_v21  ;;  %v3460_v38 = vld [vmem:[%s5617_s28 + $0xa8] sm:$0xff]  ;;  %v3462_v41 = vld [vmem:[%s5617_s28 + $0xb0] sm:$0xff]  ;;  %v3464_v43 = vld [vmem:[%s5617_s28 + $0xb8] sm:$0xff] }
 0x3f4   : >> { %3433 = vst [vmem:[%s5613_s27 + $0x38] sm:$0xff] %v3432_v39  ;;  %v3466_v44 = vld [vmem:[%s5617_s28 + $0xc0] sm:$0xff]  ;;  %v3468_v45 = vld [vmem:[%s5617_s28 + $0xc8] sm:$0xff]  ;;  %v3470_v50 = vld [vmem:[%s5617_s28 + $0xd0] sm:$0xff] }
 0x3f5   : >> { %3435 = vst [vmem:[%s5613_s27 + $0x40] sm:$0xff] %v3434_v22  ;;  %v3472_v46 = vld [vmem:[%s5617_s28 + $0xd8] sm:$0xff]  ;;  %v3474_v47 = vld [vmem:[%s5617_s28 + $0xe0] sm:$0xff]  ;;  %v3476_v48 = vld [vmem:[%s5617_s28 + $0xe8] sm:$0xff] }
 0x3f6   : >> { %3437 = vst [vmem:[%s5613_s27 + $0x48] sm:$0xff] %v3436_v42  ;;  %v3478_v49 = vld [vmem:[%s5617_s28 + $0xf0] sm:$0xff]  ;;  %v3480_v51 = vld [vmem:[%s5617_s28 + $0xf8] sm:$0xff]  ;;  %s8323_s28 = smov %s8069_s8 }
 0x3f7   : >> { %3439 = vst [vmem:[%s5613_s27 + $0x50] sm:$0xff] %v3438_v36 }
 0x3f8   : >> { %3441 = vst [vmem:[%s5613_s27 + $0x58] sm:$0xff] %v3440_v23 }
 0x3f9   : >> { %3443 = vst [vmem:[%s5613_s27 + $0x60] sm:$0xff] %v3442_v40 }
 0x3fa   : >> { %3445 = vst [vmem:[%s5613_s27 + $0x68] sm:$0xff] %v3444_v24 }
 0x3fb   : >> { %3447 = vst [vmem:[%s5613_s27 + $0x70] sm:$0xff] %v3446_v27 }
 0x3fc   : >> { %3449 = vst [vmem:[%s5613_s27 + $0x78] sm:$0xff] %v3448_v28 }
 0x3fd   : >> { %3451 = vst [vmem:[%s5613_s27 + $0x80] sm:$0xff] %v3450_v29 }
 0x3fe   : >> { %3453 = vst [vmem:[%s5613_s27 + $0x88] sm:$0xff] %v3452_v33 }
 0x3ff   : >> { %3455 = vst [vmem:[%s5613_s27 + $0x90] sm:$0xff] %v3454_v34 }
 0x400   : >> { %3457 = vst [vmem:[%s5613_s27 + $0x98] sm:$0xff] %v3456_v35 }
 0x401   : >> { %3459 = vst [vmem:[%s5613_s27 + $0xa0] sm:$0xff] %v3458_v37 }
 0x402   : >> { %3461 = vst [vmem:[%s5613_s27 + $0xa8] sm:$0xff] %v3460_v38 }
 0x403   : >> { %3463 = vst [vmem:[%s5613_s27 + $0xb0] sm:$0xff] %v3462_v41 }
 0x404   : >> { %3465 = vst [vmem:[%s5613_s27 + $0xb8] sm:$0xff] %v3464_v43 }
 0x405   : >> { %3467 = vst [vmem:[%s5613_s27 + $0xc0] sm:$0xff] %v3466_v44 }
 0x406   : >> { %3469 = vst [vmem:[%s5613_s27 + $0xc8] sm:$0xff] %v3468_v45 }
 0x407   : >> { %3471 = vst [vmem:[%s5613_s27 + $0xd0] sm:$0xff] %v3470_v50 }
 0x408   : >> { %3473 = vst [vmem:[%s5613_s27 + $0xd8] sm:$0xff] %v3472_v46  ;;  %3414 = sbr.rel (!%p3411_p1) target bundleno = 1004 (0x3ec), region = 242 }
 0x409   : >> { %3475 = vst [vmem:[%s5613_s27 + $0xe0] sm:$0xff] %v3474_v47 }
 0x40a   : >> { %3477 = vst [vmem:[%s5613_s27 + $0xe8] sm:$0xff] %v3476_v48 }
 0x40b   : >> { %3479 = vst [vmem:[%s5613_s27 + $0xf0] sm:$0xff] %v3478_v49 }
 0x40c   : >> { %3481 = vst [vmem:[%s5613_s27 + $0xf8] sm:$0xff] %v3480_v51  ;;  %s8322_s27 = smov %s8072_s9 }
 0x40d PF: > { %s8138_s10 = sand.u32 31, %s3407_s14   ;;  %s5201_s11 = sshll.u32 %s8026_s5, 8 }
 0x40e   : > { %s3493_s18 = scalar_lea.vmem %s8002_s20, %s5201_s11 [#allocation3]   ;;  %s3495_s19 = scalar_lea.vmem %s8012_s25, %s5201_s11  }
 0x40f   : > { %p4926_p2 = scmp.le.s32.totalorder %s8138_s10, 0 }
 0x410   : > { %s5627_s12 = smov (!%p4926_p2), %s3495_s19   ;;  %s5631_s23 = smov (!%p4926_p2), %s3493_s18  }
 0x411   : > { %3781 = sbr.rel (%p4926_p2) target bundleno = 1054 (0x41e), region = 247  ;;  %s5635_s24 = smov (!%p4926_p2), 0  }
 0x412   : > { %s5639_s7 = smov (!%p4926_p2), 0  }
 0x416 LB: >> { %v3505_v52 = vld [vmem:[%s5633_s23] sm:$0xff]  ;;  %s3507_s14 = sadd.s32 1, %s5637_s24  ;;  %s3499_s7 = sadd.s32 1, %s5641_s7   ;;  %s5641_s7 = sphi %s5639_s7, %s3499_s7   ;;  %s5637_s24 = sphi %s5635_s24, %s5636_s24   ;;  %s5633_s23 = sphi %s5631_s23, %s3512_s23   ;;  %s5629_s12 = sphi %s5627_s12, %s3513_s12  }
 0x417   : >> { %3506 = vst [vmem:[%s5629_s12] sm:$0xff] %v3505_v52  ;;  %p3508_p3 = scmp.ge.s32.totalorder %s3507_s14, %s8138_s10  ;;  %p3498_p4 = scmp.ge.s32.totalorder %s3499_s7, %s8138_s10 }
 0x419   : >> { %s8347_s14 = smov (%p3508_p3, %s3507_s14), 0  ;;  %3501 = sbr.rel (!%p3498_p4) target bundleno = 1046 (0x416), region = 253 }
 0x41a   : >> { %s4927_s5 = sshll.u32 %s8347_s14, 3  ;;  %s5636_s24 = smov %s8347_s14  }
 0x41b   : >> { %s3512_s23 = scalar_lea.vmem %s3493_s18, %s4927_s5 [#allocation3]   ;;  %s3513_s12 = scalar_lea.vmem %s3495_s19, %s4927_s5  }
 0x41e PF: > { %3516 = sbr.rel (%p3403_p6) target bundleno = 1119 (0x45f), region = 129  ;;  %s8150_s27 = ssub.s32 (!%p3403_p6), %s8014_s26, %s8019_s21 }
 0x41f   : > { %s3522_s28 = sshrl.u32 (!%p3403_p6), %s8014_s26, 3  ;;  %s3519_s30 = scalar_lea.vmem (!%p3403_p6), %s8002_s20, %s8150_s27 [#allocation3] }
 0x420   : > { %s3521_s6 = scalar_lea.vmem (!%p3403_p6), %s8012_s25, %s8150_s27  ;;  %s8159_s29 = sshrl.u32 (!%p3403_p6), %s3522_s28, 5 }
 0x421   : > { %p4929_p5 = scmp.le.s32.totalorder (!%p3403_p6), %s8159_s29, 0 }
 0x423   : > { %3795 = sbr.rel (%p4929_p5) target bundleno = 1097 (0x449), region = 258  ;;  %s8325_s4 = smov (!%p4929_p5), %s8012_s25 }
 0x424   : > { %s8326_s8 = smov (!%p4929_p5), %s8002_s20  ;;  %s8168_s9 = smov (!%p4929_p5), 0  }
 0x425   : > { %s8170_s10 = smov (!%p4929_p5), 0  }
 0x428 LB: >> { %v3533_v53 = vld [vmem:[%s5649_s8] sm:$0xff]  ;;  %v3535_v54 = vld [vmem:[%s5649_s8 + $0x8] sm:$0xff]  ;;  %v3537_v55 = vld [vmem:[%s5649_s8 + $0x10] sm:$0xff]  ;;  %s3597_s11 = sadd.s32 1, %s5653_s9  ;;  %s3527_s10 = sadd.s32 1, %s5657_s10   ;;  %s5657_s10 = sphi %s8170_s10, %s3527_s10   ;;  %s5653_s9 = sphi %s8168_s9, %s8329_s9   ;;  %s5649_s8 = sphi %s8326_s8, %s8328_s8   ;;  %s5645_s4 = sphi %s8325_s4, %s8327_s4  }
 0x429   : >> { %3534 = vst [vmem:[%s5645_s4] sm:$0xff] %v3533_v53  ;;  %v3539_v56 = vld [vmem:[%s5649_s8 + $0x18] sm:$0xff]  ;;  %p3598_p7 = scmp.ge.s32.totalorder %s3597_s11, %s8159_s29  ;;  %v3541_v57 = vld [vmem:[%s5649_s8 + $0x20] sm:$0xff]  ;;  %v3543_v58 = vld [vmem:[%s5649_s8 + $0x28] sm:$0xff]  ;;  %p3526_p8 = scmp.ge.s32.totalorder %s3527_s10, %s8159_s29 }
 0x42a   : >> { %3536 = vst [vmem:[%s5645_s4 + $0x8] sm:$0xff] %v3535_v54  ;;  %v3545_v59 = vld [vmem:[%s5649_s8 + $0x30] sm:$0xff]  ;;  %v3547_v60 = vld [vmem:[%s5649_s8 + $0x38] sm:$0xff]  ;;  %v3549_v25 = vld [vmem:[%s5649_s8 + $0x40] sm:$0xff] }
 0x42b   : >> { %3538 = vst [vmem:[%s5645_s4 + $0x10] sm:$0xff] %v3537_v55  ;;  %s8349_s11 = smov (%p3598_p7, %s3597_s11), 0  ;;  %v3551_v61 = vld [vmem:[%s5649_s8 + $0x48] sm:$0xff]  ;;  %v3553_v62 = vld [vmem:[%s5649_s8 + $0x50] sm:$0xff]  ;;  %v3555_v63 = vld [vmem:[%s5649_s8 + $0x58] sm:$0xff] }
 0x42c   : >> { %3540 = vst [vmem:[%s5645_s4 + $0x18] sm:$0xff] %v3539_v56  ;;  %s4930_s18 = sshll.u32 %s8349_s11, 8  ;;  %v3557_v31 = vld [vmem:[%s5649_s8 + $0x60] sm:$0xff]  ;;  %v3559_v0 = vld [vmem:[%s5649_s8 + $0x68] sm:$0xff]  ;;  %v3561_v26 = vld [vmem:[%s5649_s8 + $0x70] sm:$0xff]  ;;  %s8329_s9 = smov %s8349_s11 }
 0x42d   : >> { %3542 = vst [vmem:[%s5645_s4 + $0x20] sm:$0xff] %v3541_v57  ;;  %s8202_s19 = scalar_lea.vmem %s8002_s20, %s4930_s18 [#allocation3]   ;;  %s8205_s12 = scalar_lea.vmem %s8012_s25, %s4930_s18   ;;  %v3563_v1 = vld [vmem:[%s5649_s8 + $0x78] sm:$0xff]  ;;  %v3565_v2 = vld [vmem:[%s5649_s8 + $0x80] sm:$0xff]  ;;  %v3567_v3 = vld [vmem:[%s5649_s8 + $0x88] sm:$0xff] }
 0x42e   : >> { %3544 = vst [vmem:[%s5645_s4 + $0x28] sm:$0xff] %v3543_v58  ;;  %v3569_v4 = vld [vmem:[%s5649_s8 + $0x90] sm:$0xff]  ;;  %v3571_v32 = vld [vmem:[%s5649_s8 + $0x98] sm:$0xff]  ;;  %v3573_v5 = vld [vmem:[%s5649_s8 + $0xa0] sm:$0xff] }
 0x42f   : >> { %3546 = vst [vmem:[%s5645_s4 + $0x30] sm:$0xff] %v3545_v59  ;;  %v3575_v6 = vld [vmem:[%s5649_s8 + $0xa8] sm:$0xff]  ;;  %v3577_v7 = vld [vmem:[%s5649_s8 + $0xb0] sm:$0xff]  ;;  %v3579_v30 = vld [vmem:[%s5649_s8 + $0xb8] sm:$0xff] }
 0x430   : >> { %3548 = vst [vmem:[%s5645_s4 + $0x38] sm:$0xff] %v3547_v60  ;;  %v3581_v8 = vld [vmem:[%s5649_s8 + $0xc0] sm:$0xff]  ;;  %v3583_v9 = vld [vmem:[%s5649_s8 + $0xc8] sm:$0xff]  ;;  %v3585_v10 = vld [vmem:[%s5649_s8 + $0xd0] sm:$0xff] }
 0x431   : >> { %3550 = vst [vmem:[%s5645_s4 + $0x40] sm:$0xff] %v3549_v25  ;;  %v3587_v11 = vld [vmem:[%s5649_s8 + $0xd8] sm:$0xff]  ;;  %v3589_v12 = vld [vmem:[%s5649_s8 + $0xe0] sm:$0xff]  ;;  %v3591_v13 = vld [vmem:[%s5649_s8 + $0xe8] sm:$0xff] }
 0x432   : >> { %3552 = vst [vmem:[%s5645_s4 + $0x48] sm:$0xff] %v3551_v61  ;;  %v3593_v14 = vld [vmem:[%s5649_s8 + $0xf0] sm:$0xff]  ;;  %v3595_v15 = vld [vmem:[%s5649_s8 + $0xf8] sm:$0xff]  ;;  %s8328_s8 = smov %s8202_s19 }
 0x433   : >> { %3554 = vst [vmem:[%s5645_s4 + $0x50] sm:$0xff] %v3553_v62 }
 0x434   : >> { %3556 = vst [vmem:[%s5645_s4 + $0x58] sm:$0xff] %v3555_v63 }
 0x435   : >> { %3558 = vst [vmem:[%s5645_s4 + $0x60] sm:$0xff] %v3557_v31 }
 0x436   : >> { %3560 = vst [vmem:[%s5645_s4 + $0x68] sm:$0xff] %v3559_v0 }
 0x437   : >> { %3562 = vst [vmem:[%s5645_s4 + $0x70] sm:$0xff] %v3561_v26 }
 0x438   : >> { %3564 = vst [vmem:[%s5645_s4 + $0x78] sm:$0xff] %v3563_v1 }
 0x439   : >> { %3566 = vst [vmem:[%s5645_s4 + $0x80] sm:$0xff] %v3565_v2 }
 0x43a   : >> { %3568 = vst [vmem:[%s5645_s4 + $0x88] sm:$0xff] %v3567_v3 }
 0x43b   : >> { %3570 = vst [vmem:[%s5645_s4 + $0x90] sm:$0xff] %v3569_v4 }
 0x43c   : >> { %3572 = vst [vmem:[%s5645_s4 + $0x98] sm:$0xff] %v3571_v32 }
 0x43d   : >> { %3574 = vst [vmem:[%s5645_s4 + $0xa0] sm:$0xff] %v3573_v5 }
 0x43e   : >> { %3576 = vst [vmem:[%s5645_s4 + $0xa8] sm:$0xff] %v3575_v6 }
 0x43f   : >> { %3578 = vst [vmem:[%s5645_s4 + $0xb0] sm:$0xff] %v3577_v7 }
 0x440   : >> { %3580 = vst [vmem:[%s5645_s4 + $0xb8] sm:$0xff] %v3579_v30 }
 0x441   : >> { %3582 = vst [vmem:[%s5645_s4 + $0xc0] sm:$0xff] %v3581_v8 }
 0x442   : >> { %3584 = vst [vmem:[%s5645_s4 + $0xc8] sm:$0xff] %v3583_v9 }
 0x443   : >> { %3586 = vst [vmem:[%s5645_s4 + $0xd0] sm:$0xff] %v3585_v10 }
 0x444   : >> { %3588 = vst [vmem:[%s5645_s4 + $0xd8] sm:$0xff] %v3587_v11  ;;  %3529 = sbr.rel (!%p3526_p8) target bundleno = 1064 (0x428), region = 264 }
 0x445   : >> { %3590 = vst [vmem:[%s5645_s4 + $0xe0] sm:$0xff] %v3589_v12 }
 0x446   : >> { %3592 = vst [vmem:[%s5645_s4 + $0xe8] sm:$0xff] %v3591_v13 }
 0x447   : >> { %3594 = vst [vmem:[%s5645_s4 + $0xf0] sm:$0xff] %v3593_v14 }
 0x448   : >> { %3596 = vst [vmem:[%s5645_s4 + $0xf8] sm:$0xff] %v3595_v15  ;;  %s8327_s4 = smov %s8205_s12 }
 0x449 PF: > { %s8271_s23 = sand.u32 31, %s3522_s28   ;;  %s5203_s24 = sshll.u32 %s8159_s29, 8 }
 0x44a   : > { %s3608_s7 = scalar_lea.vmem %s8002_s20, %s5203_s24 [#allocation3]   ;;  %s3610_s14 = scalar_lea.vmem %s8012_s25, %s5203_s24  }
 0x44b   : > { %p4935_p9 = scmp.le.s32.totalorder %s8271_s23, 0 }
 0x44c   : > { %s5659_s5 = smov (!%p4935_p9), %s3610_s14   ;;  %s5663_s18 = smov (!%p4935_p9), %s3608_s7  }
 0x44d   : > { %3809 = sbr.rel (%p4935_p9) target bundleno = 1114 (0x45a), region = 269  ;;  %s5667_s11 = smov (!%p4935_p9), 0  }
 0x44e   : > { %s5671_s19 = smov (!%p4935_p9), 0  }
 0x452 LB: >> { %v3620_v16 = vld [vmem:[%s5665_s18] sm:$0xff]  ;;  %s3622_s28 = sadd.s32 1, %s5669_s11  ;;  %s3614_s19 = sadd.s32 1, %s5673_s19   ;;  %s5673_s19 = sphi %s5671_s19, %s3614_s19   ;;  %s5669_s11 = sphi %s5667_s11, %s5668_s11   ;;  %s5665_s18 = sphi %s5663_s18, %s3627_s18   ;;  %s5661_s5 = sphi %s5659_s5, %s3628_s5  }
 0x453   : >> { %3621 = vst [vmem:[%s5661_s5] sm:$0xff] %v3620_v16  ;;  %p3623_p10 = scmp.ge.s32.totalorder %s3622_s28, %s8271_s23  ;;  %p3613_p11 = scmp.ge.s32.totalorder %s3614_s19, %s8271_s23 }
 0x455   : >> { %s8351_s28 = smov (%p3623_p10, %s3622_s28), 0  ;;  %3616 = sbr.rel (!%p3613_p11) target bundleno = 1106 (0x452), region = 275 }
 0x456   : >> { %s4936_s29 = sshll.u32 %s8351_s28, 3  ;;  %s5668_s11 = smov %s8351_s28  }
 0x457   : >> { %s3627_s18 = scalar_lea.vmem %s3608_s7, %s4936_s29 [#allocation3]   ;;  %s3628_s5 = scalar_lea.vmem %s3610_s14, %s4936_s29  }
 0x45a PF: > { %s5677_s4 = smov 1  }
 0x45b   : > { %s3629_s8 = sshll.u32 %s5677_s4, %s8019_s21 }
 0x45c   : > { %s4938_s9 = sadd.s32 4294967295, %s3629_s8 }
 0x45d   : > { %v3639_v17 = vld [vmem:[%s3519_s30] sm:%s4938_s9] }
 0x45e   : > { %3640 = vst [vmem:[%s3521_s6] sm:%s4938_s9] %v3639_v17 }
 0x45f PF: > { %p4939_p6 = scmp.ge.u32.totalorder %s8014_s26, 8 }
 0x460   : > { %s5678_s10 = smov (!%p4939_p6), 1  }
 0x461   : > { %3389 = sbr.rel (%p4939_p6) target bundleno = 1128 (0x468), region = 100  ;;  %s3390_s12 = sshll.u32 (!%p4939_p6), %s5678_s10, %s8014_s26 }
 0x462   : > { %s4940_s23 = sadd.s32 (!%p4939_p6), 4294967295, %s3390_s12 }
 0x466   : > { %v3400_v18 = vld [vmem:[%s8002_s20] sm:%s4940_s23] }
 0x467   : > { %3401 = vst [vmem:[%s8012_s25] sm:%s4940_s23] %v3400_v18 }
 0x468 PF: > { %s13_s16 = sadd.s32 1, %s5577_s16   ;;  %s8330_s12 = smov %s5565_s13 }
 0x469   : > { %p10_p12 = scmp.ge.s32.totalorder %s13_s16, 4   ;;  %s8331_s13 = smov %s5739_s22 }
 0x46a   : > { %s8332_s14 = smov %s5573_s15  ;;  %s8333_s15 = smov %s8335_s17 }
 0x46b   :  { %12 = sbr.rel (!%p10_p12) target bundleno = 3 (0x3), region = 286 }

</bundles_post_ra>
